<compile_context>
chip_gen: v7x
topology: tpu7x:2x2x1
jax: 0.10.0
libtpu: 0.0.40
codegen_flags: <defaults>
</compile_context>

<pallas_src>
import functools

import jax
import jax.numpy as jnp
from jax.experimental import pallas as pl
from jax.experimental.pallas import tpu as pltpu


def _attention_kernel(x_ref, wqkv_ref, wout_ref, bout_ref, o_ref,
                      q_scr, m_scr, *, heads, dim_head):
    """grid = (B,); one batch element per step, all heads in-kernel.

    x_ref:    (1, C, N)           input slab (input dtype)
    wqkv_ref: (3*hidden, C)       to_qkv weight, head-major [q_h, k_h, v_h] rows
    wout_ref: (C, hidden)         to_out weight (Rezero g already folded in)
    bout_ref: (C, 1) fp32         to_out bias  (Rezero g already folded in)
    o_ref:    (1, C, N)           output slab = x + g * to_out(attn(x))
    q_scr:    (hidden, N)         softmaxed q, all heads concatenated
    m_scr:    (C, hidden)         per-head wout_h @ ctx_h^T, concatenated
    """
    d = dim_head

    x = x_ref[0]                                   # (C, N), native dtype (MXU)
    w = wqkv_ref[...]                              # (3*hidden, C)

    # to_qkv 1x1 conv for ALL heads at once: full-height MXU matmul,
    # fp32 accumulation.
    qkv = jnp.dot(w, x, preferred_element_type=jnp.float32)   # (3*hidden, N) f32

    for h in range(heads):
        base = h * 3 * d
        q = qkv[base:base + d, :]                  # (d, N) f32
        k = qkv[base + d:base + 2 * d, :]          # (d, N) f32
        v = qkv[base + 2 * d:base + 3 * d, :]      # (d, N) f32

        # q.softmax(dim=-2): over the dim_head (sublane) axis.
        q = jnp.exp(q - jnp.max(q, axis=0, keepdims=True))
        q = q * pl.reciprocal(jnp.sum(q, axis=0, keepdims=True), approx=True)

        # k.softmax(dim=-1): over the spatial (lane) axis.  Exact reciprocal:
        # this error would otherwise propagate through two matmuls.
        k = jnp.exp(k - jnp.max(k, axis=1, keepdims=True))
        k = k * (1.0 / jnp.sum(k, axis=1, keepdims=True))

        # ctx^T[e, d'] = sum_n v[e, n] * k[d', n]  — lane-axis contraction on
        # both operands, no transposes materialized.  Input-dtype operands.
        ctx_t = jax.lax.dot_general(
            v.astype(x.dtype), k.astype(x.dtype),
            dimension_numbers=(((1,), (1,)), ((), ())),
            preferred_element_type=jnp.float32)    # (d, d)

        # Tiny fused to_out piece: m_h = wout_h @ ctx^T  (C, d).
        m_h = jnp.dot(wout_ref[:, h * d:(h + 1) * d],
                      ctx_t.astype(x.dtype),
                      preferred_element_type=jnp.float32)      # (C, d)

        q_scr[h * d:(h + 1) * d, :] = q.astype(q_scr.dtype)
        m_scr[:, h * d:(h + 1) * d] = m_h.astype(m_scr.dtype)

    # Single big output matmul: (C, hidden) @ (hidden, N), K = hidden fills
    # the MXU; the head-sum is the K contraction (no VPU accumulator RMW).
    y = jnp.dot(m_scr[...], q_scr[...],
                preferred_element_type=jnp.float32)            # (C, N) f32

    # Fused Rezero bias + Residual add (x already resident in VMEM).
    o_ref[0] = (x.astype(jnp.float32) + bout_ref[...] + y).astype(o_ref.dtype)


def rezero_linear_attention(x, w_qkv, w_out, b_out, g, *, heads, dim_head):
    """Computes x + g * LinearAttention_to_out(x)  (Residual(Rezero(LinAttn))).

    x: (B, C, H, W) NCHW; w_qkv: (3*heads*dim_head, C, 1, 1);
    w_out: (C, heads*dim_head, 1, 1); b_out: (C,); g: scalar Rezero gain.
    """
    B, C, H, W = x.shape
    N = H * W
    d = dim_head
    hidden = heads * d
    dt = x.dtype

    x2 = x.reshape(B, C, N)

    # Regroup to_qkv rows so each head's (q, k, v) rows are contiguous and
    # head-major: (3*hidden, C) -> (heads*3*d, C).
    wqkv2 = (w_qkv.reshape(3, heads, d, C)
                  .transpose(1, 0, 2, 3)
                  .reshape(heads * 3 * d, C)).astype(dt)
    # to_out columns are already head-major (channel = head*d + c).  Fold the
    # Rezero gain into the output projection — zero kernel cost.
    wout2 = (g * w_out.reshape(C, hidden)).astype(dt)
    bout2 = (g * b_out).reshape(C, 1).astype(jnp.float32)

    # Per-step VMEM estimate (double-buffering already included once; no
    # extra 2x).  Cap at 56 MiB so it stays valid on v7x's 64 MiB VMEM;
    # floor at the 32 MiB scoped default.
    itm = jnp.dtype(dt).itemsize
    est = (4 * C * N * itm                                     # x + o, 2-buffered
           + 2 * (3 * hidden * C + C * hidden + C) * itm       # weights + bias
           + (hidden * N + C * hidden) * itm                   # q / m scratch
           + 3 * hidden * N * 4                                # qkv fp32 temp
           + 8 * d * N * 4                                     # per-head temps
           + C * N * 4)                                        # fp32 matmul out
    vmem_limit = int(min(56 * 1024 * 1024,
                         max(32 * 1024 * 1024, int(1.25 * est))))

    kernel = functools.partial(_attention_kernel, heads=heads, dim_head=d)

    y = pl.pallas_call(
        kernel,
        out_shape=jax.ShapeDtypeStruct((B, C, N), dt),
        grid_spec=pltpu.PrefetchScalarGridSpec(
            num_scalar_prefetch=0,
            grid=(B,),
            in_specs=[
                pl.BlockSpec((1, C, N), lambda b: (b, 0, 0)),          # x slab
                pl.BlockSpec((3 * hidden, C), lambda b: (0, 0)),       # qkv W (resident)
                pl.BlockSpec((C, hidden), lambda b: (0, 0)),           # out W (resident)
                pl.BlockSpec((C, 1), lambda b: (0, 0)),                # out bias
            ],
            out_specs=pl.BlockSpec((1, C, N), lambda b: (b, 0, 0)),
            scratch_shapes=[
                pltpu.VMEM((hidden, N), dt),        # concatenated softmaxed q
                pltpu.VMEM((C, hidden), dt),        # concatenated wout_h @ ctx^T
            ],
        ),
        compiler_params=pltpu.CompilerParams(
            dimension_semantics=("parallel",),
            vmem_limit_bytes=vmem_limit),
    )(x2, wqkv2, wout2, bout2)

    return y.reshape(B, C, H, W)


def reference(x, w_qkv, w_out, b_out, g, heads, dim_head):
    """Pure-JAX replica of the PyTorch Residual(Rezero(LinearAttention))."""
    B, C, H, W = x.shape
    N = H * W
    hidden = heads * dim_head
    qkv = jnp.einsum('oc,bcn->bon', w_qkv.reshape(3 * hidden, C),
                     x.reshape(B, C, N))
    qkv = qkv.reshape(B, 3, heads, dim_head, N)
    q, k, v = qkv[:, 0], qkv[:, 1], qkv[:, 2]
    q = jax.nn.softmax(q, axis=-2)
    k = jax.nn.softmax(k, axis=-1)
    context = jnp.einsum('bhdn,bhen->bhde', k, v)
    out = jnp.einsum('bhde,bhdn->bhen', context, q)
    out = out.reshape(B, hidden, N)
    y = jnp.einsum('oc,bcn->bon', w_out.reshape(C, hidden), out)
    y = y + b_out.reshape(1, C, 1)
    return (g * y).reshape(B, C, H, W) + x


if __name__ == "__main__":
    B, C, H, W = 2, 4, 16, 16            # small NCHW input, dim = 4
    heads, dim_head = 8, 32              # LinearAttention defaults
    hidden = heads * dim_head

    key = jax.random.PRNGKey(0)
    k1, k2, k3, k4 = jax.random.split(key, 4)
    x = jax.random.normal(k1, (B, C, H, W), jnp.float32)
    # Deterministic synthetic parameters (conv-weight shapes from __init__).
    w_qkv = jax.random.normal(k2, (3 * hidden, C, 1, 1), jnp.float32) / jnp.sqrt(C)
    w_out = jax.random.normal(k3, (C, hidden, 1, 1), jnp.float32) / jnp.sqrt(hidden)
    b_out = 0.01 * jax.random.normal(k4, (C,), jnp.float32)
    # Rezero gain is initialised to 0 in the module; use a nonzero value so
    # the attention path is actually exercised by the check.
    g = jnp.float32(0.5)

    y = rezero_linear_attention(x, w_qkv, w_out, b_out, g,
                                heads=heads, dim_head=dim_head)
    jax.block_until_ready(y)

    y_ref = reference(x, w_qkv, w_out, b_out, g, heads, dim_head)
    max_err = float(jnp.max(jnp.abs(y - y_ref)))
    scale = float(jnp.max(jnp.abs(y_ref)))
    # approx (EUP) reciprocal is used only for the q-softmax denominator, so a
    # small relative tolerance suffices; structural bugs give O(scale) errors.
    assert max_err <= 1e-2 * max(scale, 1.0), f"max_err={max_err}, scale={scale}"

    print("KERNEL_OK")
</pallas_src>

<mosaic_0001>
module attributes {stable_mosaic.version = 11 : i64} {
  func.func @_attention_kernel(%arg0: i32, %arg1: memref<1x4x256xf32, #tpu.memory_space<vmem>>, %arg2: memref<768x4xf32, #tpu.memory_space<vmem>>, %arg3: memref<4x256xf32, #tpu.memory_space<vmem>>, %arg4: memref<4x1xf32, #tpu.memory_space<vmem>>, %arg5: memref<1x4x256xf32, #tpu.memory_space<vmem>>, %arg6: memref<256x256xf32, #tpu.memory_space<vmem>>, %arg7: memref<4x256xf32, #tpu.memory_space<vmem>>) attributes {dimension_semantics = [#tpu.dimension_semantics<parallel>], iteration_bounds = array<i64: 2>, scalar_prefetch = 0 : i64, scratch_operands = 2 : i64, tpu.core_type = #tpu.core_type<tc>, window_params = [{transform_indices = @transform_0, window_bounds = array<i64: 1, 4, 256>}, {pipeline_mode = #tpu.pipeline_mode<synchronous>, transform_indices = @transform_1, window_bounds = array<i64: 768, 4>}, {pipeline_mode = #tpu.pipeline_mode<synchronous>, transform_indices = @transform_2, window_bounds = array<i64: 4, 256>}, {pipeline_mode = #tpu.pipeline_mode<synchronous>, transform_indices = @transform_3, window_bounds = array<i64: 4, 1>}, {transform_indices = @transform_4, window_bounds = array<i64: 1, 4, 256>}]} {
    %c0 = arith.constant 0 : index
    %c0_0 = arith.constant 0 : index
    %c0_1 = arith.constant 0 : index
    %0 = vector.load %arg1[%c0, %c0_0, %c0_1] : memref<1x4x256xf32, #tpu.memory_space<vmem>>, vector<1x4x256xf32>
    %1 = vector.shape_cast %0 : vector<1x4x256xf32> to vector<4x256xf32>
    %c0_2 = arith.constant 0 : index
    %c0_3 = arith.constant 0 : index
    %2 = vector.load %arg2[%c0_2, %c0_3] : memref<768x4xf32, #tpu.memory_space<vmem>>, vector<768x4xf32>
    %cst = arith.constant dense<0.000000e+00> : vector<768x256xf32>
    %3 = tpu.matmul %2, %1, %cst {dimension_numbers = #tpu.dot_dimension_numbers<[1], [0], [0], [1], [0, 0, 1, 1], [], []>} : vector<768x4xf32>, vector<4x256xf32>, vector<768x256xf32> -> vector<768x256xf32>
    %4 = vector.extract_strided_slice %3 {offsets = [0, 0], sizes = [32, 256], strides = [1, 1]} : vector<768x256xf32> to vector<32x256xf32>
    %5 = vector.extract_strided_slice %3 {offsets = [32, 0], sizes = [32, 256], strides = [1, 1]} : vector<768x256xf32> to vector<32x256xf32>
    %6 = vector.extract_strided_slice %3 {offsets = [64, 0], sizes = [32, 256], strides = [1, 1]} : vector<768x256xf32> to vector<32x256xf32>
    %cst_4 = arith.constant dense<0xFF800000> : vector<256xf32>
    %7 = vector.multi_reduction <maximumf>, %4, %cst_4 [0] : vector<32x256xf32> to vector<256xf32>
    %8 = vector.shape_cast %7 : vector<256xf32> to vector<1x256xf32>
    %9 = vector.broadcast %8 : vector<1x256xf32> to vector<32x256xf32>
    %10 = arith.subf %4, %9 : vector<32x256xf32>
    %11 = math.exp %10 : vector<32x256xf32>
    %cst_5 = arith.constant dense<0.000000e+00> : vector<256xf32>
    %12 = vector.multi_reduction <add>, %11, %cst_5 [0] : vector<32x256xf32> to vector<256xf32>
    %13 = vector.shape_cast %12 : vector<256xf32> to vector<1x256xf32>
    %14 = tpu.reciprocal %13 {approx = true} : vector<1x256xf32> -> vector<1x256xf32>
    %15 = vector.broadcast %14 : vector<1x256xf32> to vector<32x256xf32>
    %16 = arith.mulf %11, %15 : vector<32x256xf32>
    %cst_6 = arith.constant dense<0xFF800000> : vector<32xf32>
    %17 = vector.multi_reduction <maximumf>, %5, %cst_6 [1] : vector<32x256xf32> to vector<32xf32>
    %18 = vector.shape_cast %17 : vector<32xf32> to vector<32x1xf32>
    %19 = vector.broadcast %18 : vector<32x1xf32> to vector<32x256xf32>
    %20 = arith.subf %5, %19 : vector<32x256xf32>
    %21 = math.exp %20 : vector<32x256xf32>
    %cst_7 = arith.constant dense<0.000000e+00> : vector<32xf32>
    %22 = vector.multi_reduction <add>, %21, %cst_7 [1] : vector<32x256xf32> to vector<32xf32>
    %23 = vector.shape_cast %22 : vector<32xf32> to vector<32x1xf32>
    %cst_8 = arith.constant 1.000000e+00 : f32
    %24 = vector.broadcast %cst_8 : f32 to vector<32x1xf32>
    %25 = arith.divf %24, %23 : vector<32x1xf32>
    %26 = vector.broadcast %25 : vector<32x1xf32> to vector<32x256xf32>
    %27 = arith.mulf %21, %26 : vector<32x256xf32>
    %cst_9 = arith.constant dense<0.000000e+00> : vector<32x32xf32>
    %28 = tpu.matmul %6, %27, %cst_9 {dimension_numbers = #tpu.dot_dimension_numbers<[1], [1], [0], [0], [0, 0, 1, 0], [], []>} : vector<32x256xf32>, vector<32x256xf32>, vector<32x32xf32> -> vector<32x32xf32>
    %c0_10 = arith.constant 0 : index
    %c0_11 = arith.constant 0 : index
    %29 = vector.load %arg3[%c0_10, %c0_11] : memref<4x256xf32, #tpu.memory_space<vmem>>, vector<4x32xf32>
    %cst_12 = arith.constant dense<0.000000e+00> : vector<4x32xf32>
    %30 = tpu.matmul %29, %28, %cst_12 {dimension_numbers = #tpu.dot_dimension_numbers<[1], [0], [0], [1], [0, 0, 1, 1], [], []>} : vector<4x32xf32>, vector<32x32xf32>, vector<4x32xf32> -> vector<4x32xf32>
    %c0_13 = arith.constant 0 : index
    %c0_14 = arith.constant 0 : index
    %31 = vector.load %arg6[%c0_13, %c0_14] : memref<256x256xf32, #tpu.memory_space<vmem>>, vector<32x256xf32>
    tpu.vector_store %arg6[%c0_13, %c0_14], %16 {strides = array<i32>} : memref<256x256xf32, #tpu.memory_space<vmem>>, vector<32x256xf32>,
    %c0_15 = arith.constant 0 : index
    %c0_16 = arith.constant 0 : index
    %32 = vector.load %arg7[%c0_15, %c0_16] : memref<4x256xf32, #tpu.memory_space<vmem>>, vector<4x32xf32>
    tpu.vector_store %arg7[%c0_15, %c0_16], %30 {strides = array<i32>} : memref<4x256xf32, #tpu.memory_space<vmem>>, vector<4x32xf32>,
    %33 = vector.extract_strided_slice %3 {offsets = [96, 0], sizes = [32, 256], strides = [1, 1]} : vector<768x256xf32> to vector<32x256xf32>
    %34 = vector.extract_strided_slice %3 {offsets = [128, 0], sizes = [32, 256], strides = [1, 1]} : vector<768x256xf32> to vector<32x256xf32>
    %35 = vector.extract_strided_slice %3 {offsets = [160, 0], sizes = [32, 256], strides = [1, 1]} : vector<768x256xf32> to vector<32x256xf32>
    %cst_17 = arith.constant dense<0xFF800000> : vector<256xf32>
    %36 = vector.multi_reduction <maximumf>, %33, %cst_17 [0] : vector<32x256xf32> to vector<256xf32>
    %37 = vector.shape_cast %36 : vector<256xf32> to vector<1x256xf32>
    %38 = vector.broadcast %37 : vector<1x256xf32> to vector<32x256xf32>
    %39 = arith.subf %33, %38 : vector<32x256xf32>
    %40 = math.exp %39 : vector<32x256xf32>
    %cst_18 = arith.constant dense<0.000000e+00> : vector<256xf32>
    %41 = vector.multi_reduction <add>, %40, %cst_18 [0] : vector<32x256xf32> to vector<256xf32>
    %42 = vector.shape_cast %41 : vector<256xf32> to vector<1x256xf32>
    %43 = tpu.reciprocal %42 {approx = true} : vector<1x256xf32> -> vector<1x256xf32>
    %44 = vector.broadcast %43 : vector<1x256xf32> to vector<32x256xf32>
    %45 = arith.mulf %40, %44 : vector<32x256xf32>
    %cst_19 = arith.constant dense<0xFF800000> : vector<32xf32>
    %46 = vector.multi_reduction <maximumf>, %34, %cst_19 [1] : vector<32x256xf32> to vector<32xf32>
    %47 = vector.shape_cast %46 : vector<32xf32> to vector<32x1xf32>
    %48 = vector.broadcast %47 : vector<32x1xf32> to vector<32x256xf32>
    %49 = arith.subf %34, %48 : vector<32x256xf32>
    %50 = math.exp %49 : vector<32x256xf32>
    %cst_20 = arith.constant dense<0.000000e+00> : vector<32xf32>
    %51 = vector.multi_reduction <add>, %50, %cst_20 [1] : vector<32x256xf32> to vector<32xf32>
    %52 = vector.shape_cast %51 : vector<32xf32> to vector<32x1xf32>
    %cst_21 = arith.constant 1.000000e+00 : f32
    %53 = vector.broadcast %cst_21 : f32 to vector<32x1xf32>
    %54 = arith.divf %53, %52 : vector<32x1xf32>
    %55 = vector.broadcast %54 : vector<32x1xf32> to vector<32x256xf32>
    %56 = arith.mulf %50, %55 : vector<32x256xf32>
    %cst_22 = arith.constant dense<0.000000e+00> : vector<32x32xf32>
    %57 = tpu.matmul %35, %56, %cst_22 {dimension_numbers = #tpu.dot_dimension_numbers<[1], [1], [0], [0], [0, 0, 1, 0], [], []>} : vector<32x256xf32>, vector<32x256xf32>, vector<32x32xf32> -> vector<32x32xf32>
    %c0_23 = arith.constant 0 : index
    %c32 = arith.constant 32 : index
    %58 = vector.load %arg3[%c0_23, %c32] : memref<4x256xf32, #tpu.memory_space<vmem>>, vector<4x32xf32>
    %cst_24 = arith.constant dense<0.000000e+00> : vector<4x32xf32>
    %59 = tpu.matmul %58, %57, %cst_24 {dimension_numbers = #tpu.dot_dimension_numbers<[1], [0], [0], [1], [0, 0, 1, 1], [], []>} : vector<4x32xf32>, vector<32x32xf32>, vector<4x32xf32> -> vector<4x32xf32>
    %c32_25 = arith.constant 32 : index
    %c0_26 = arith.constant 0 : index
    %60 = vector.load %arg6[%c32_25, %c0_26] : memref<256x256xf32, #tpu.memory_space<vmem>>, vector<32x256xf32>
    tpu.vector_store %arg6[%c32_25, %c0_26], %45 {strides = array<i32>} : memref<256x256xf32, #tpu.memory_space<vmem>>, vector<32x256xf32>,
    %c0_27 = arith.constant 0 : index
    %c32_28 = arith.constant 32 : index
    %61 = vector.load %arg7[%c0_27, %c32_28] : memref<4x256xf32, #tpu.memory_space<vmem>>, vector<4x32xf32>
    tpu.vector_store %arg7[%c0_27, %c32_28], %59 {strides = array<i32>} : memref<4x256xf32, #tpu.memory_space<vmem>>, vector<4x32xf32>,
    %62 = vector.extract_strided_slice %3 {offsets = [192, 0], sizes = [32, 256], strides = [1, 1]} : vector<768x256xf32> to vector<32x256xf32>
    %63 = vector.extract_strided_slice %3 {offsets = [224, 0], sizes = [32, 256], strides = [1, 1]} : vector<768x256xf32> to vector<32x256xf32>
    %64 = vector.extract_strided_slice %3 {offsets = [256, 0], sizes = [32, 256], strides = [1, 1]} : vector<768x256xf32> to vector<32x256xf32>
    %cst_29 = arith.constant dense<0xFF800000> : vector<256xf32>
    %65 = vector.multi_reduction <maximumf>, %62, %cst_29 [0] : vector<32x256xf32> to vector<256xf32>
    %66 = vector.shape_cast %65 : vector<256xf32> to vector<1x256xf32>
    %67 = vector.broadcast %66 : vector<1x256xf32> to vector<32x256xf32>
    %68 = arith.subf %62, %67 : vector<32x256xf32>
    %69 = math.exp %68 : vector<32x256xf32>
    %cst_30 = arith.constant dense<0.000000e+00> : vector<256xf32>
    %70 = vector.multi_reduction <add>, %69, %cst_30 [0] : vector<32x256xf32> to vector<256xf32>
    %71 = vector.shape_cast %70 : vector<256xf32> to vector<1x256xf32>
    %72 = tpu.reciprocal %71 {approx = true} : vector<1x256xf32> -> vector<1x256xf32>
    %73 = vector.broadcast %72 : vector<1x256xf32> to vector<32x256xf32>
    %74 = arith.mulf %69, %73 : vector<32x256xf32>
    %cst_31 = arith.constant dense<0xFF800000> : vector<32xf32>
    %75 = vector.multi_reduction <maximumf>, %63, %cst_31 [1] : vector<32x256xf32> to vector<32xf32>
    %76 = vector.shape_cast %75 : vector<32xf32> to vector<32x1xf32>
    %77 = vector.broadcast %76 : vector<32x1xf32> to vector<32x256xf32>
    %78 = arith.subf %63, %77 : vector<32x256xf32>
    %79 = math.exp %78 : vector<32x256xf32>
    %cst_32 = arith.constant dense<0.000000e+00> : vector<32xf32>
    %80 = vector.multi_reduction <add>, %79, %cst_32 [1] : vector<32x256xf32> to vector<32xf32>
    %81 = vector.shape_cast %80 : vector<32xf32> to vector<32x1xf32>
    %cst_33 = arith.constant 1.000000e+00 : f32
    %82 = vector.broadcast %cst_33 : f32 to vector<32x1xf32>
    %83 = arith.divf %82, %81 : vector<32x1xf32>
    %84 = vector.broadcast %83 : vector<32x1xf32> to vector<32x256xf32>
    %85 = arith.mulf %79, %84 : vector<32x256xf32>
    %cst_34 = arith.constant dense<0.000000e+00> : vector<32x32xf32>
    %86 = tpu.matmul %64, %85, %cst_34 {dimension_numbers = #tpu.dot_dimension_numbers<[1], [1], [0], [0], [0, 0, 1, 0], [], []>} : vector<32x256xf32>, vector<32x256xf32>, vector<32x32xf32> -> vector<32x32xf32>
    %c0_35 = arith.constant 0 : index
    %c64 = arith.constant 64 : index
    %87 = vector.load %arg3[%c0_35, %c64] : memref<4x256xf32, #tpu.memory_space<vmem>>, vector<4x32xf32>
    %cst_36 = arith.constant dense<0.000000e+00> : vector<4x32xf32>
    %88 = tpu.matmul %87, %86, %cst_36 {dimension_numbers = #tpu.dot_dimension_numbers<[1], [0], [0], [1], [0, 0, 1, 1], [], []>} : vector<4x32xf32>, vector<32x32xf32>, vector<4x32xf32> -> vector<4x32xf32>
    %c64_37 = arith.constant 64 : index
    %c0_38 = arith.constant 0 : index
    %89 = vector.load %arg6[%c64_37, %c0_38] : memref<256x256xf32, #tpu.memory_space<vmem>>, vector<32x256xf32>
    tpu.vector_store %arg6[%c64_37, %c0_38], %74 {strides = array<i32>} : memref<256x256xf32, #tpu.memory_space<vmem>>, vector<32x256xf32>,
    %c0_39 = arith.constant 0 : index
    %c64_40 = arith.constant 64 : index
    %90 = vector.load %arg7[%c0_39, %c64_40] : memref<4x256xf32, #tpu.memory_space<vmem>>, vector<4x32xf32>
    tpu.vector_store %arg7[%c0_39, %c64_40], %88 {strides = array<i32>} : memref<4x256xf32, #tpu.memory_space<vmem>>, vector<4x32xf32>,
    %91 = vector.extract_strided_slice %3 {offsets = [288, 0], sizes = [32, 256], strides = [1, 1]} : vector<768x256xf32> to vector<32x256xf32>
    %92 = vector.extract_strided_slice %3 {offsets = [320, 0], sizes = [32, 256], strides = [1, 1]} : vector<768x256xf32> to vector<32x256xf32>
    %93 = vector.extract_strided_slice %3 {offsets = [352, 0], sizes = [32, 256], strides = [1, 1]} : vector<768x256xf32> to vector<32x256xf32>
    %cst_41 = arith.constant dense<0xFF800000> : vector<256xf32>
    %94 = vector.multi_reduction <maximumf>, %91, %cst_41 [0] : vector<32x256xf32> to vector<256xf32>
    %95 = vector.shape_cast %94 : vector<256xf32> to vector<1x256xf32>
    %96 = vector.broadcast %95 : vector<1x256xf32> to vector<32x256xf32>
    %97 = arith.subf %91, %96 : vector<32x256xf32>
    %98 = math.exp %97 : vector<32x256xf32>
    %cst_42 = arith.constant dense<0.000000e+00> : vector<256xf32>
    %99 = vector.multi_reduction <add>, %98, %cst_42 [0] : vector<32x256xf32> to vector<256xf32>
    %100 = vector.shape_cast %99 : vector<256xf32> to vector<1x256xf32>
    %101 = tpu.reciprocal %100 {approx = true} : vector<1x256xf32> -> vector<1x256xf32>
    %102 = vector.broadcast %101 : vector<1x256xf32> to vector<32x256xf32>
    %103 = arith.mulf %98, %102 : vector<32x256xf32>
    %cst_43 = arith.constant dense<0xFF800000> : vector<32xf32>
    %104 = vector.multi_reduction <maximumf>, %92, %cst_43 [1] : vector<32x256xf32> to vector<32xf32>
    %105 = vector.shape_cast %104 : vector<32xf32> to vector<32x1xf32>
    %106 = vector.broadcast %105 : vector<32x1xf32> to vector<32x256xf32>
    %107 = arith.subf %92, %106 : vector<32x256xf32>
    %108 = math.exp %107 : vector<32x256xf32>
    %cst_44 = arith.constant dense<0.000000e+00> : vector<32xf32>
    %109 = vector.multi_reduction <add>, %108, %cst_44 [1] : vector<32x256xf32> to vector<32xf32>
    %110 = vector.shape_cast %109 : vector<32xf32> to vector<32x1xf32>
    %cst_45 = arith.constant 1.000000e+00 : f32
    %111 = vector.broadcast %cst_45 : f32 to vector<32x1xf32>
    %112 = arith.divf %111, %110 : vector<32x1xf32>
    %113 = vector.broadcast %112 : vector<32x1xf32> to vector<32x256xf32>
    %114 = arith.mulf %108, %113 : vector<32x256xf32>
    %cst_46 = arith.constant dense<0.000000e+00> : vector<32x32xf32>
    %115 = tpu.matmul %93, %114, %cst_46 {dimension_numbers = #tpu.dot_dimension_numbers<[1], [1], [0], [0], [0, 0, 1, 0], [], []>} : vector<32x256xf32>, vector<32x256xf32>, vector<32x32xf32> -> vector<32x32xf32>
    %c0_47 = arith.constant 0 : index
    %c96 = arith.constant 96 : index
    %116 = vector.load %arg3[%c0_47, %c96] : memref<4x256xf32, #tpu.memory_space<vmem>>, vector<4x32xf32>
    %cst_48 = arith.constant dense<0.000000e+00> : vector<4x32xf32>
    %117 = tpu.matmul %116, %115, %cst_48 {dimension_numbers = #tpu.dot_dimension_numbers<[1], [0], [0], [1], [0, 0, 1, 1], [], []>} : vector<4x32xf32>, vector<32x32xf32>, vector<4x32xf32> -> vector<4x32xf32>
    %c96_49 = arith.constant 96 : index
    %c0_50 = arith.constant 0 : index
    %118 = vector.load %arg6[%c96_49, %c0_50] : memref<256x256xf32, #tpu.memory_space<vmem>>, vector<32x256xf32>
    tpu.vector_store %arg6[%c96_49, %c0_50], %103 {strides = array<i32>} : memref<256x256xf32, #tpu.memory_space<vmem>>, vector<32x256xf32>,
    %c0_51 = arith.constant 0 : index
    %c96_52 = arith.constant 96 : index
    %119 = vector.load %arg7[%c0_51, %c96_52] : memref<4x256xf32, #tpu.memory_space<vmem>>, vector<4x32xf32>
    tpu.vector_store %arg7[%c0_51, %c96_52], %117 {strides = array<i32>} : memref<4x256xf32, #tpu.memory_space<vmem>>, vector<4x32xf32>,
    %120 = vector.extract_strided_slice %3 {offsets = [384, 0], sizes = [32, 256], strides = [1, 1]} : vector<768x256xf32> to vector<32x256xf32>
    %121 = vector.extract_strided_slice %3 {offsets = [416, 0], sizes = [32, 256], strides = [1, 1]} : vector<768x256xf32> to vector<32x256xf32>
    %122 = vector.extract_strided_slice %3 {offsets = [448, 0], sizes = [32, 256], strides = [1, 1]} : vector<768x256xf32> to vector<32x256xf32>
    %cst_53 = arith.constant dense<0xFF800000> : vector<256xf32>
    %123 = vector.multi_reduction <maximumf>, %120, %cst_53 [0] : vector<32x256xf32> to vector<256xf32>
    %124 = vector.shape_cast %123 : vector<256xf32> to vector<1x256xf32>
    %125 = vector.broadcast %124 : vector<1x256xf32> to vector<32x256xf32>
    %126 = arith.subf %120, %125 : vector<32x256xf32>
    %127 = math.exp %126 : vector<32x256xf32>
    %cst_54 = arith.constant dense<0.000000e+00> : vector<256xf32>
    %128 = vector.multi_reduction <add>, %127, %cst_54 [0] : vector<32x256xf32> to vector<256xf32>
    %129 = vector.shape_cast %128 : vector<256xf32> to vector<1x256xf32>
    %130 = tpu.reciprocal %129 {approx = true} : vector<1x256xf32> -> vector<1x256xf32>
    %131 = vector.broadcast %130 : vector<1x256xf32> to vector<32x256xf32>
    %132 = arith.mulf %127, %131 : vector<32x256xf32>
    %cst_55 = arith.constant dense<0xFF800000> : vector<32xf32>
    %133 = vector.multi_reduction <maximumf>, %121, %cst_55 [1] : vector<32x256xf32> to vector<32xf32>
    %134 = vector.shape_cast %133 : vector<32xf32> to vector<32x1xf32>
    %135 = vector.broadcast %134 : vector<32x1xf32> to vector<32x256xf32>
    %136 = arith.subf %121, %135 : vector<32x256xf32>
    %137 = math.exp %136 : vector<32x256xf32>
    %cst_56 = arith.constant dense<0.000000e+00> : vector<32xf32>
    %138 = vector.multi_reduction <add>, %137, %cst_56 [1] : vector<32x256xf32> to vector<32xf32>
    %139 = vector.shape_cast %138 : vector<32xf32> to vector<32x1xf32>
    %cst_57 = arith.constant 1.000000e+00 : f32
    %140 = vector.broadcast %cst_57 : f32 to vector<32x1xf32>
    %141 = arith.divf %140, %139 : vector<32x1xf32>
    %142 = vector.broadcast %141 : vector<32x1xf32> to vector<32x256xf32>
    %143 = arith.mulf %137, %142 : vector<32x256xf32>
    %cst_58 = arith.constant dense<0.000000e+00> : vector<32x32xf32>
    %144 = tpu.matmul %122, %143, %cst_58 {dimension_numbers = #tpu.dot_dimension_numbers<[1], [1], [0], [0], [0, 0, 1, 0], [], []>} : vector<32x256xf32>, vector<32x256xf32>, vector<32x32xf32> -> vector<32x32xf32>
    %c0_59 = arith.constant 0 : index
    %c128 = arith.constant 128 : index
    %145 = vector.load %arg3[%c0_59, %c128] : memref<4x256xf32, #tpu.memory_space<vmem>>, vector<4x32xf32>
    %cst_60 = arith.constant dense<0.000000e+00> : vector<4x32xf32>
    %146 = tpu.matmul %145, %144, %cst_60 {dimension_numbers = #tpu.dot_dimension_numbers<[1], [0], [0], [1], [0, 0, 1, 1], [], []>} : vector<4x32xf32>, vector<32x32xf32>, vector<4x32xf32> -> vector<4x32xf32>
    %c128_61 = arith.constant 128 : index
    %c0_62 = arith.constant 0 : index
    %147 = vector.load %arg6[%c128_61, %c0_62] : memref<256x256xf32, #tpu.memory_space<vmem>>, vector<32x256xf32>
    tpu.vector_store %arg6[%c128_61, %c0_62], %132 {strides = array<i32>} : memref<256x256xf32, #tpu.memory_space<vmem>>, vector<32x256xf32>,
    %c0_63 = arith.constant 0 : index
    %c128_64 = arith.constant 128 : index
    %148 = vector.load %arg7[%c0_63, %c128_64] : memref<4x256xf32, #tpu.memory_space<vmem>>, vector<4x32xf32>
    tpu.vector_store %arg7[%c0_63, %c128_64], %146 {strides = array<i32>} : memref<4x256xf32, #tpu.memory_space<vmem>>, vector<4x32xf32>,
    %149 = vector.extract_strided_slice %3 {offsets = [480, 0], sizes = [32, 256], strides = [1, 1]} : vector<768x256xf32> to vector<32x256xf32>
    %150 = vector.extract_strided_slice %3 {offsets = [512, 0], sizes = [32, 256], strides = [1, 1]} : vector<768x256xf32> to vector<32x256xf32>
    %151 = vector.extract_strided_slice %3 {offsets = [544, 0], sizes = [32, 256], strides = [1, 1]} : vector<768x256xf32> to vector<32x256xf32>
    %cst_65 = arith.constant dense<0xFF800000> : vector<256xf32>
    %152 = vector.multi_reduction <maximumf>, %149, %cst_65 [0] : vector<32x256xf32> to vector<256xf32>
    %153 = vector.shape_cast %152 : vector<256xf32> to vector<1x256xf32>
    %154 = vector.broadcast %153 : vector<1x256xf32> to vector<32x256xf32>
    %155 = arith.subf %149, %154 : vector<32x256xf32>
    %156 = math.exp %155 : vector<32x256xf32>
    %cst_66 = arith.constant dense<0.000000e+00> : vector<256xf32>
    %157 = vector.multi_reduction <add>, %156, %cst_66 [0] : vector<32x256xf32> to vector<256xf32>
    %158 = vector.shape_cast %157 : vector<256xf32> to vector<1x256xf32>
    %159 = tpu.reciprocal %158 {approx = true} : vector<1x256xf32> -> vector<1x256xf32>
    %160 = vector.broadcast %159 : vector<1x256xf32> to vector<32x256xf32>
    %161 = arith.mulf %156, %160 : vector<32x256xf32>
    %cst_67 = arith.constant dense<0xFF800000> : vector<32xf32>
    %162 = vector.multi_reduction <maximumf>, %150, %cst_67 [1] : vector<32x256xf32> to vector<32xf32>
    %163 = vector.shape_cast %162 : vector<32xf32> to vector<32x1xf32>
    %164 = vector.broadcast %163 : vector<32x1xf32> to vector<32x256xf32>
    %165 = arith.subf %150, %164 : vector<32x256xf32>
    %166 = math.exp %165 : vector<32x256xf32>
    %cst_68 = arith.constant dense<0.000000e+00> : vector<32xf32>
    %167 = vector.multi_reduction <add>, %166, %cst_68 [1] : vector<32x256xf32> to vector<32xf32>
    %168 = vector.shape_cast %167 : vector<32xf32> to vector<32x1xf32>
    %cst_69 = arith.constant 1.000000e+00 : f32
    %169 = vector.broadcast %cst_69 : f32 to vector<32x1xf32>
    %170 = arith.divf %169, %168 : vector<32x1xf32>
    %171 = vector.broadcast %170 : vector<32x1xf32> to vector<32x256xf32>
    %172 = arith.mulf %166, %171 : vector<32x256xf32>
    %cst_70 = arith.constant dense<0.000000e+00> : vector<32x32xf32>
    %173 = tpu.matmul %151, %172, %cst_70 {dimension_numbers = #tpu.dot_dimension_numbers<[1], [1], [0], [0], [0, 0, 1, 0], [], []>} : vector<32x256xf32>, vector<32x256xf32>, vector<32x32xf32> -> vector<32x32xf32>
    %c0_71 = arith.constant 0 : index
    %c160 = arith.constant 160 : index
    %174 = vector.load %arg3[%c0_71, %c160] : memref<4x256xf32, #tpu.memory_space<vmem>>, vector<4x32xf32>
    %cst_72 = arith.constant dense<0.000000e+00> : vector<4x32xf32>
    %175 = tpu.matmul %174, %173, %cst_72 {dimension_numbers = #tpu.dot_dimension_numbers<[1], [0], [0], [1], [0, 0, 1, 1], [], []>} : vector<4x32xf32>, vector<32x32xf32>, vector<4x32xf32> -> vector<4x32xf32>
    %c160_73 = arith.constant 160 : index
    %c0_74 = arith.constant 0 : index
    %176 = vector.load %arg6[%c160_73, %c0_74] : memref<256x256xf32, #tpu.memory_space<vmem>>, vector<32x256xf32>
    tpu.vector_store %arg6[%c160_73, %c0_74], %161 {strides = array<i32>} : memref<256x256xf32, #tpu.memory_space<vmem>>, vector<32x256xf32>,
    %c0_75 = arith.constant 0 : index
    %c160_76 = arith.constant 160 : index
    %177 = vector.load %arg7[%c0_75, %c160_76] : memref<4x256xf32, #tpu.memory_space<vmem>>, vector<4x32xf32>
    tpu.vector_store %arg7[%c0_75, %c160_76], %175 {strides = array<i32>} : memref<4x256xf32, #tpu.memory_space<vmem>>, vector<4x32xf32>,
    %178 = vector.extract_strided_slice %3 {offsets = [576, 0], sizes = [32, 256], strides = [1, 1]} : vector<768x256xf32> to vector<32x256xf32>
    %179 = vector.extract_strided_slice %3 {offsets = [608, 0], sizes = [32, 256], strides = [1, 1]} : vector<768x256xf32> to vector<32x256xf32>
    %180 = vector.extract_strided_slice %3 {offsets = [640, 0], sizes = [32, 256], strides = [1, 1]} : vector<768x256xf32> to vector<32x256xf32>
    %cst_77 = arith.constant dense<0xFF800000> : vector<256xf32>
    %181 = vector.multi_reduction <maximumf>, %178, %cst_77 [0] : vector<32x256xf32> to vector<256xf32>
    %182 = vector.shape_cast %181 : vector<256xf32> to vector<1x256xf32>
    %183 = vector.broadcast %182 : vector<1x256xf32> to vector<32x256xf32>
    %184 = arith.subf %178, %183 : vector<32x256xf32>
    %185 = math.exp %184 : vector<32x256xf32>
    %cst_78 = arith.constant dense<0.000000e+00> : vector<256xf32>
    %186 = vector.multi_reduction <add>, %185, %cst_78 [0] : vector<32x256xf32> to vector<256xf32>
    %187 = vector.shape_cast %186 : vector<256xf32> to vector<1x256xf32>
    %188 = tpu.reciprocal %187 {approx = true} : vector<1x256xf32> -> vector<1x256xf32>
    %189 = vector.broadcast %188 : vector<1x256xf32> to vector<32x256xf32>
    %190 = arith.mulf %185, %189 : vector<32x256xf32>
    %cst_79 = arith.constant dense<0xFF800000> : vector<32xf32>
    %191 = vector.multi_reduction <maximumf>, %179, %cst_79 [1] : vector<32x256xf32> to vector<32xf32>
    %192 = vector.shape_cast %191 : vector<32xf32> to vector<32x1xf32>
    %193 = vector.broadcast %192 : vector<32x1xf32> to vector<32x256xf32>
    %194 = arith.subf %179, %193 : vector<32x256xf32>
    %195 = math.exp %194 : vector<32x256xf32>
    %cst_80 = arith.constant dense<0.000000e+00> : vector<32xf32>
    %196 = vector.multi_reduction <add>, %195, %cst_80 [1] : vector<32x256xf32> to vector<32xf32>
    %197 = vector.shape_cast %196 : vector<32xf32> to vector<32x1xf32>
    %cst_81 = arith.constant 1.000000e+00 : f32
    %198 = vector.broadcast %cst_81 : f32 to vector<32x1xf32>
    %199 = arith.divf %198, %197 : vector<32x1xf32>
    %200 = vector.broadcast %199 : vector<32x1xf32> to vector<32x256xf32>
    %201 = arith.mulf %195, %200 : vector<32x256xf32>
    %cst_82 = arith.constant dense<0.000000e+00> : vector<32x32xf32>
    %202 = tpu.matmul %180, %201, %cst_82 {dimension_numbers = #tpu.dot_dimension_numbers<[1], [1], [0], [0], [0, 0, 1, 0], [], []>} : vector<32x256xf32>, vector<32x256xf32>, vector<32x32xf32> -> vector<32x32xf32>
    %c0_83 = arith.constant 0 : index
    %c192 = arith.constant 192 : index
    %203 = vector.load %arg3[%c0_83, %c192] : memref<4x256xf32, #tpu.memory_space<vmem>>, vector<4x32xf32>
    %cst_84 = arith.constant dense<0.000000e+00> : vector<4x32xf32>
    %204 = tpu.matmul %203, %202, %cst_84 {dimension_numbers = #tpu.dot_dimension_numbers<[1], [0], [0], [1], [0, 0, 1, 1], [], []>} : vector<4x32xf32>, vector<32x32xf32>, vector<4x32xf32> -> vector<4x32xf32>
    %c192_85 = arith.constant 192 : index
    %c0_86 = arith.constant 0 : index
    %205 = vector.load %arg6[%c192_85, %c0_86] : memref<256x256xf32, #tpu.memory_space<vmem>>, vector<32x256xf32>
    tpu.vector_store %arg6[%c192_85, %c0_86], %190 {strides = array<i32>} : memref<256x256xf32, #tpu.memory_space<vmem>>, vector<32x256xf32>,
    %c0_87 = arith.constant 0 : index
    %c192_88 = arith.constant 192 : index
    %206 = vector.load %arg7[%c0_87, %c192_88] : memref<4x256xf32, #tpu.memory_space<vmem>>, vector<4x32xf32>
    tpu.vector_store %arg7[%c0_87, %c192_88], %204 {strides = array<i32>} : memref<4x256xf32, #tpu.memory_space<vmem>>, vector<4x32xf32>,
    %207 = vector.extract_strided_slice %3 {offsets = [672, 0], sizes = [32, 256], strides = [1, 1]} : vector<768x256xf32> to vector<32x256xf32>
    %208 = vector.extract_strided_slice %3 {offsets = [704, 0], sizes = [32, 256], strides = [1, 1]} : vector<768x256xf32> to vector<32x256xf32>
    %209 = vector.extract_strided_slice %3 {offsets = [736, 0], sizes = [32, 256], strides = [1, 1]} : vector<768x256xf32> to vector<32x256xf32>
    %cst_89 = arith.constant dense<0xFF800000> : vector<256xf32>
    %210 = vector.multi_reduction <maximumf>, %207, %cst_89 [0] : vector<32x256xf32> to vector<256xf32>
    %211 = vector.shape_cast %210 : vector<256xf32> to vector<1x256xf32>
    %212 = vector.broadcast %211 : vector<1x256xf32> to vector<32x256xf32>
    %213 = arith.subf %207, %212 : vector<32x256xf32>
    %214 = math.exp %213 : vector<32x256xf32>
    %cst_90 = arith.constant dense<0.000000e+00> : vector<256xf32>
    %215 = vector.multi_reduction <add>, %214, %cst_90 [0] : vector<32x256xf32> to vector<256xf32>
    %216 = vector.shape_cast %215 : vector<256xf32> to vector<1x256xf32>
    %217 = tpu.reciprocal %216 {approx = true} : vector<1x256xf32> -> vector<1x256xf32>
    %218 = vector.broadcast %217 : vector<1x256xf32> to vector<32x256xf32>
    %219 = arith.mulf %214, %218 : vector<32x256xf32>
    %cst_91 = arith.constant dense<0xFF800000> : vector<32xf32>
    %220 = vector.multi_reduction <maximumf>, %208, %cst_91 [1] : vector<32x256xf32> to vector<32xf32>
    %221 = vector.shape_cast %220 : vector<32xf32> to vector<32x1xf32>
    %222 = vector.broadcast %221 : vector<32x1xf32> to vector<32x256xf32>
    %223 = arith.subf %208, %222 : vector<32x256xf32>
    %224 = math.exp %223 : vector<32x256xf32>
    %cst_92 = arith.constant dense<0.000000e+00> : vector<32xf32>
    %225 = vector.multi_reduction <add>, %224, %cst_92 [1] : vector<32x256xf32> to vector<32xf32>
    %226 = vector.shape_cast %225 : vector<32xf32> to vector<32x1xf32>
    %cst_93 = arith.constant 1.000000e+00 : f32
    %227 = vector.broadcast %cst_93 : f32 to vector<32x1xf32>
    %228 = arith.divf %227, %226 : vector<32x1xf32>
    %229 = vector.broadcast %228 : vector<32x1xf32> to vector<32x256xf32>
    %230 = arith.mulf %224, %229 : vector<32x256xf32>
    %cst_94 = arith.constant dense<0.000000e+00> : vector<32x32xf32>
    %231 = tpu.matmul %209, %230, %cst_94 {dimension_numbers = #tpu.dot_dimension_numbers<[1], [1], [0], [0], [0, 0, 1, 0], [], []>} : vector<32x256xf32>, vector<32x256xf32>, vector<32x32xf32> -> vector<32x32xf32>
    %c0_95 = arith.constant 0 : index
    %c224 = arith.constant 224 : index
    %232 = vector.load %arg3[%c0_95, %c224] : memref<4x256xf32, #tpu.memory_space<vmem>>, vector<4x32xf32>
    %cst_96 = arith.constant dense<0.000000e+00> : vector<4x32xf32>
    %233 = tpu.matmul %232, %231, %cst_96 {dimension_numbers = #tpu.dot_dimension_numbers<[1], [0], [0], [1], [0, 0, 1, 1], [], []>} : vector<4x32xf32>, vector<32x32xf32>, vector<4x32xf32> -> vector<4x32xf32>
    %c224_97 = arith.constant 224 : index
    %c0_98 = arith.constant 0 : index
    %234 = vector.load %arg6[%c224_97, %c0_98] : memref<256x256xf32, #tpu.memory_space<vmem>>, vector<32x256xf32>
    tpu.vector_store %arg6[%c224_97, %c0_98], %219 {strides = array<i32>} : memref<256x256xf32, #tpu.memory_space<vmem>>, vector<32x256xf32>,
    %c0_99 = arith.constant 0 : index
    %c224_100 = arith.constant 224 : index
    %235 = vector.load %arg7[%c0_99, %c224_100] : memref<4x256xf32, #tpu.memory_space<vmem>>, vector<4x32xf32>
    tpu.vector_store %arg7[%c0_99, %c224_100], %233 {strides = array<i32>} : memref<4x256xf32, #tpu.memory_space<vmem>>, vector<4x32xf32>,
    %c0_101 = arith.constant 0 : index
    %c0_102 = arith.constant 0 : index
    %236 = vector.load %arg7[%c0_101, %c0_102] : memref<4x256xf32, #tpu.memory_space<vmem>>, vector<4x256xf32>
    %c0_103 = arith.constant 0 : index
    %c0_104 = arith.constant 0 : index
    %237 = vector.load %arg6[%c0_103, %c0_104] : memref<256x256xf32, #tpu.memory_space<vmem>>, vector<256x256xf32>
    %cst_105 = arith.constant dense<0.000000e+00> : vector<4x256xf32>
    %238 = tpu.matmul %236, %237, %cst_105 {dimension_numbers = #tpu.dot_dimension_numbers<[1], [0], [0], [1], [0, 0, 1, 1], [], []>} : vector<4x256xf32>, vector<256x256xf32>, vector<4x256xf32> -> vector<4x256xf32>
    %c0_106 = arith.constant 0 : index
    %c0_107 = arith.constant 0 : index
    %239 = vector.load %arg4[%c0_106, %c0_107] : memref<4x1xf32, #tpu.memory_space<vmem>>, vector<4x1xf32>
    %240 = vector.broadcast %239 : vector<4x1xf32> to vector<4x256xf32>
    %241 = arith.addf %1, %240 : vector<4x256xf32>
    %242 = arith.addf %241, %238 : vector<4x256xf32>
    %c0_108 = arith.constant 0 : index
    %c0_109 = arith.constant 0 : index
    %c0_110 = arith.constant 0 : index
    %243 = vector.load %arg5[%c0_108, %c0_109, %c0_110] : memref<1x4x256xf32, #tpu.memory_space<vmem>>, vector<1x4x256xf32>
    %244 = vector.shape_cast %243 : vector<1x4x256xf32> to vector<4x256xf32>
    %245 = vector.shape_cast %242 : vector<4x256xf32> to vector<1x4x256xf32>
    tpu.vector_store %arg5[%c0_108, %c0_109, %c0_110], %245 {strides = array<i32>} : memref<1x4x256xf32, #tpu.memory_space<vmem>>, vector<1x4x256xf32>,
    return
  }
  func.func @transform_0(%arg0: i32) -> (i32, i32, i32) {
    %c0_i32 = arith.constant 0 : i32
    %c0_i32_0 = arith.constant 0 : i32
    %c0_i32_1 = arith.constant 0 : i32
    return %arg0, %c0_i32, %c0_i32_0 : i32, i32, i32
  }
  func.func @transform_1(%arg0: i32) -> (i32, i32) {
    %c0_i32 = arith.constant 0 : i32
    %c0_i32_0 = arith.constant 0 : i32
    %c0_i32_1 = arith.constant 0 : i32
    return %c0_i32, %c0_i32_0 : i32, i32
  }
  func.func @transform_2(%arg0: i32) -> (i32, i32) {
    %c0_i32 = arith.constant 0 : i32
    %c0_i32_0 = arith.constant 0 : i32
    %c0_i32_1 = arith.constant 0 : i32
    return %c0_i32, %c0_i32_0 : i32, i32
  }
  func.func @transform_3(%arg0: i32) -> (i32, i32) {
    %c0_i32 = arith.constant 0 : i32
    %c0_i32_0 = arith.constant 0 : i32
    %c0_i32_1 = arith.constant 0 : i32
    return %c0_i32, %c0_i32_0 : i32, i32
  }
  func.func @transform_4(%arg0: i32) -> (i32, i32, i32) {
    %c0_i32 = arith.constant 0 : i32
    %c0_i32_0 = arith.constant 0 : i32
    %c0_i32_1 = arith.constant 0 : i32
    return %arg0, %c0_i32, %c0_i32_0 : i32, i32, i32
  }
}

</mosaic_0001>

<bundles_post_ra>
// kernel: tpu_custom_call.1
= control target key start
LH: loop header
LB: loop body
LE: loop exit
PB: predicated region body
PF: predicated region fallthrough
CT: control target
= control target key end

     0   :  { %9 = vsyncpa [#allocation5], 0  ;;  %s7287_s0 = inlined_call_operand.vmem [shape: f32[2,4,256], index: 0, kind: input, shape index: {}]   ;;  %s7288_s1 = inlined_call_operand.vmem [shape: f32[768,4], index: 1, kind: input, shape index: {}]   ;;  %s7289_s2 = inlined_call_operand.vmem [shape: f32[4,256], index: 2, kind: input, shape index: {}]   ;;  %s7290_s3 = inlined_call_operand.vmem [shape: f32[4,1], index: 3, kind: input, shape index: {}]   ;;  %s7291_s4 = inlined_call_operand.hbm [shape: f32[2,4,256], index: 4, kind: output, shape index: {}]  }
   0x1   :  { %11 = vsyncpa [#allocation5 + $0x1], 0  ;;  %s4847_s15 = smov 0   ;;  %s4849_s16 = smov 0  }
   0x2   :  { %s4851_s17 = smov 0   ;;  %s4853_s18 = smov 0  }
   0x3 LB: > { %s4868_s19 = sadd.s32 4294967295, %s4811_s18   ;;  %s3920_s20 = sadd.s32 4294967294, %s4811_s18   ;;  %s4811_s18 = sphi %s4853_s18, %s7854_s18   ;;  %s4807_s17 = sphi %s4851_s17, %s7853_s17   ;;  %s4803_s16 = sphi %s4849_s16, %s7852_s16   ;;  %s4799_s15 = sphi %s4847_s15, %s7851_s15  }
   0x4   : > { %s4872_s21 = sadd.s32 1, %s4811_s18   ;;  %s113_s22 = sadd.s32 1, %s4807_s17 }
   0x5   : > { %s110_s23 = ssub.s32 %s4811_s18, %s4872_s21  ;;  %p123_p0 = scmp.ne.s32.totalorder %s4807_s17, %s4803_s16 }
   0x6   : > { %p111_p1 = scmp.eq.s32.totalorder %s110_s23, 0  ;;  %p124_p2 = scmp.eq.s32.totalorder %s4868_s19, 1 }
   0x7   : > { %p129_p3 = scmp.ne.s32.totalorder %s4803_s16, %s4799_s15  ;;  %p130_p4 = scmp.eq.s32.totalorder %s3920_s20, 1 }
   0x8   : > { %s4883_s24 = scalar_select %p111_p1, %s4807_s17, %s113_s22  }
   0x9   : > { %p4885_p5 = por %p124_p2, %p123_p0  ;;  %p4889_p6 = por %p130_p4, %p129_p3 }
   0xa   : > { %p3923_p7 = scmp.ge.s32.totalorder %s4811_s18, 1  ;;  %p165_p8 = scmp.lt.s32.totalorder %s4811_s18, 3 }
   0xc   : > { %p166_p9 = pnand %p3923_p7, %p165_p8 }
   0xe   : > { %169 = sbr.rel (%p166_p9) target bundleno = 3149 (0xc4d), region = 36 }
  0x15   : > { %p191_p10 = scmp.lt.s32.totalorder %s4868_s19, 1  ;;  %v7292_v0 = vmov 0.0   ;;  %vm584_vm0 = vcmask 1043456   ;;  %v197_v3 = vld [vmem:[%s7288_s1] sm:$0xff]  ;;  %vm295_vm1 = vcmask 31744   ;;  %v198_v4 = vld [vmem:[%s7288_s1 + $0x8] sm:$0xff] }
  0x16   : > { %653 = vmatprep.mubr.f32.mxu0 %v7292_v0  ;;  %1175 = vmatprep.mubr.f32.mxu1 %v7292_v0  ;;  %v199_v5 = vld [vmem:[%s7288_s1 + $0x10] sm:$0xff]  ;;  %v200_v6 = vld [vmem:[%s7288_s1 + $0x18] sm:$0xff]  ;;  %v201_v7 = vld [vmem:[%s7288_s1 + $0x20] sm:$0xff]  ;;  %vm4815_vm2 = vmmov 0   ;;  %s4816_s8 = smov 96   ;;  %vm1450_vm3 = vcmask 261120  }
  0x17   : > { %s192_s27 = scalar_select %p191_p10, %s4868_s19, 1  ;;  %v202_v8 = vld [vmem:[%s7288_s1 + $0x28] sm:$0xff]  ;;  %v203_v9 = vld [vmem:[%s7288_s1 + $0x30] sm:$0xff]  ;;  %v204_v10 = vld [vmem:[%s7288_s1 + $0x38] sm:$0xff]  ;;  %vm1532_vm4 = vcmask 257024   ;;  %vm1841_vm5 = vcmask 519424  }
  0x18   : > { %v205_v11 = vld [vmem:[%s7288_s1 + $0x40] sm:$0xff]  ;;  %v206_v12 = vld [vmem:[%s7288_s1 + $0x48] sm:$0xff]  ;;  %v207_v13 = vld [vmem:[%s7288_s1 + $0x50] sm:$0xff]  ;;  %s4817_s13 = smov 64   ;;  %s4818_s22 = smov 32   ;;  %vm2150_vm6 = vcmask 781824  }
  0x19   : > { %s4038_s28 = sshll.u32 %s192_s27, 3  ;;  %v208_v14 = vld [vmem:[%s7288_s1 + $0x58] sm:$0xff]  ;;  %v209_v15 = vld [vmem:[%s7288_s1 + $0x60] sm:$0xff]  ;;  %v210_v16 = vld [vmem:[%s7288_s1 + $0x68] sm:$0xff]  ;;  %vm2459_vm7 = vcmask 1044224   ;;  %s188_s12 = sand.u32 1, %s4803_s16  }
  0x1a   : > { %s4902_s5 = scalar_lea.vmem %s7287_s0, %s4038_s28  ;;  %v211_v17 = vld [vmem:[%s7288_s1 + $0x70] sm:$0xff]  ;;  %v212_v18 = vld [vmem:[%s7288_s1 + $0x78] sm:$0xff]  ;;  %v213_v19 = vld [vmem:[%s7288_s1 + $0x80] sm:$0xff] }
  0x1b   : > { %v196_v1 = vld [vmem:[%s4902_s5] sm:$0xff]  ;;  %v214_v20 = vld [vmem:[%s7288_s1 + $0x88] sm:$0xff]  ;;  %v215_v21 = vld [vmem:[%s7288_s1 + $0x90] sm:$0xff] }
  0x1c   : > { %v294_v2 = vcombine.high %v196_v1, %v196_v1  ;;  %v216_v22 = vld [vmem:[%s7288_s1 + $0x98] sm:$0xff]  ;;  %v217_v23 = vld [vmem:[%s7288_s1 + $0xa0] sm:$0xff]  ;;  %v218_v24 = vld [vmem:[%s7288_s1 + $0xa8] sm:$0xff] }
  0x1d   : > { %v219_v25 = vld [vmem:[%s7288_s1 + $0xb0] sm:$0xff]  ;;  %v220_v26 = vld [vmem:[%s7288_s1 + $0xb8] sm:$0xff]  ;;  %v221_v27 = vld [vmem:[%s7288_s1 + $0xc0] sm:$0xff] }
  0x1e   : > { %3927 = vmatprep.subr.msk.mxu0 %vm584_vm0, %v294_v2  ;;  %4344 = vmatprep.subr.msk.mxu1 %vm584_vm0, %v294_v2  ;;  %v222_v28 = vld [vmem:[%s7288_s1 + $0xc8] sm:$0xff]  ;;  %v223_v29 = vld [vmem:[%s7288_s1 + $0xd0] sm:$0xff]  ;;  %v224_v30 = vld [vmem:[%s7288_s1 + $0xd8] sm:$0xff] }
  0x1f   : > { %3928 = vmatpush1.msk.msra.mxu0 %vm584_vm0, %v196_v1  ;;  %4345 = vmatpush1.msk.msra.mxu1 %vm584_vm0, %v196_v1  ;;  %v225_v31 = vld [vmem:[%s7288_s1 + $0xe0] sm:$0xff]  ;;  %v226_v32 = vld [vmem:[%s7288_s1 + $0xe8] sm:$0xff]  ;;  %v227_v33 = vld [vmem:[%s7288_s1 + $0xf0] sm:$0xff] }
  0x20   : > { %3929 = vmatmul.mubr.msk.f32.vlgmr.msra.gmra.mrb[0].mxu0 %vm295_vm1, %v197_v3  ;;  %v228_v34 = vld [vmem:[%s7288_s1 + $0xf8] sm:$0xff]  ;;  %v229_v35 = vld [vmem:[%s7288_s1 + $0x100] sm:$0xff]  ;;  %v230_v36 = vld [vmem:[%s7288_s1 + $0x108] sm:$0xff] }
  0x21   : > { %659 = vmatprep.mubr.f32.mxu0 %v7292_v0  ;;  %v231_v37 = vld [vmem:[%s7288_s1 + $0x110] sm:$0xff]  ;;  %v232_v38 = vld [vmem:[%s7288_s1 + $0x118] sm:$0xff]  ;;  %v233_v39 = vld [vmem:[%s7288_s1 + $0x120] sm:$0xff] }
  0x22   : > { %v234_v40 = vld [vmem:[%s7288_s1 + $0x128] sm:$0xff]  ;;  %v235_v41 = vld [vmem:[%s7288_s1 + $0x130] sm:$0xff]  ;;  %v236_v42 = vld [vmem:[%s7288_s1 + $0x138] sm:$0xff] }
  0x23   : > { %v237_v43 = vld [vmem:[%s7288_s1 + $0x140] sm:$0xff]  ;;  %v238_v44 = vld [vmem:[%s7288_s1 + $0x148] sm:$0xff]  ;;  %v239_v45 = vld [vmem:[%s7288_s1 + $0x150] sm:$0xff] }
  0x24   : > { %3930 = vmatmul.mubr.msk.f32.gmra.mrb[2].mxu0 %vm295_vm1, %v198_v4  ;;  %v240_v46 = vld [vmem:[%s7288_s1 + $0x158] sm:$0xff]  ;;  %v241_v47 = vld [vmem:[%s7288_s1 + $0x160] sm:$0xff]  ;;  %v242_v48 = vld [vmem:[%s7288_s1 + $0x168] sm:$0xff] }
  0x25   : > { %665 = vmatprep.mubr.f32.mxu0 %v7292_v0  ;;  %v243_v49 = vld [vmem:[%s7288_s1 + $0x170] sm:$0xff]  ;;  %v244_v50 = vld [vmem:[%s7288_s1 + $0x178] sm:$0xff]  ;;  %v245_v51 = vld [vmem:[%s7288_s1 + $0x180] sm:$0xff] }
  0x26   : > { %v246_v54 = vld [vmem:[%s7288_s1 + $0x188] sm:$0xff]  ;;  %v247_v57 = vld [vmem:[%s7288_s1 + $0x190] sm:$0xff]  ;;  %v248_v61 = vld [vmem:[%s7288_s1 + $0x198] sm:$0xff] }
  0x27   : > { %v249_v3 = vld [vmem:[%s7288_s1 + $0x1a0] sm:$0xff] }
  0x28   : > { %3931 = vmatmul.mubr.msk.f32.gmra.mrb[4].mxu0 %vm295_vm1, %v199_v5 }
  0x29   : > { %671 = vmatprep.mubr.f32.mxu0 %v7292_v0 }
  0x2c   : > { %3932 = vmatmul.mubr.msk.f32.gmra.mrb[6].mxu0 %vm295_vm1, %v200_v6 }
  0x2d   : > { %677 = vmatprep.mubr.f32.mxu0 %v7292_v0 }
  0x30   : > { %3933 = vmatmul.mubr.msk.f32.gmra.mrb[8].mxu0 %vm295_vm1, %v201_v7 }
  0x31   : > { %683 = vmatprep.mubr.f32.mxu0 %v7292_v0 }
  0x34   : > { %3934 = vmatmul.mubr.msk.f32.gmra.mrb[10].mxu0 %vm295_vm1, %v202_v8 }
  0x35   : > { %689 = vmatprep.mubr.f32.mxu0 %v7292_v0 }
  0x38   : > { %3935 = vmatmul.mubr.msk.f32.gmra.mrb[12].mxu0 %vm295_vm1, %v203_v9 }
  0x39   : > { %695 = vmatprep.mubr.f32.mxu0 %v7292_v0 }
  0x3c   : > { %3936 = vmatmul.mubr.msk.f32.gmra.mrb[14].mxu0 %vm295_vm1, %v204_v10  ;;  %v250_v10 = vld [vmem:[%s7288_s1 + $0x1a8] sm:$0xff] }
  0x3d   : > { %701 = vmatprep.mubr.f32.mxu0 %v7292_v0 }
  0x40   : > { %3937 = vmatmul.mubr.msk.f32.gmra.mrb[16].mxu0 %vm295_vm1, %v205_v11 }
  0x41   : > { %707 = vmatprep.mubr.f32.mxu0 %v7292_v0 }
  0x44   : > { %3938 = vmatmul.mubr.msk.f32.gmra.mrb[18].mxu0 %vm295_vm1, %v206_v12 }
  0x45   : > { %713 = vmatprep.mubr.f32.mxu0 %v7292_v0 }
  0x48   : > { %3939 = vmatmul.mubr.msk.f32.gmra.mrb[20].mxu0 %vm295_vm1, %v207_v13 }
  0x49   : > { %719 = vmatprep.mubr.f32.mxu0 %v7292_v0 }
  0x4c   : > { %3940 = vmatmul.mubr.msk.f32.gmra.mrb[22].mxu0 %vm295_vm1, %v208_v14 }
  0x4d   : > { %725 = vmatprep.mubr.f32.mxu0 %v7292_v0 }
  0x50   : > { %3941 = vmatmul.mubr.msk.f32.gmra.mrb[24].mxu0 %vm295_vm1, %v209_v15 }
  0x51   : > { %731 = vmatprep.mubr.f32.mxu0 %v7292_v0 }
  0x54   : > { %3942 = vmatmul.mubr.msk.f32.gmra.mrb[26].mxu0 %vm295_vm1, %v210_v16 }
  0x55   : > { %737 = vmatprep.mubr.f32.mxu0 %v7292_v0 }
  0x58   : > { %3943 = vmatmul.mubr.msk.f32.gmra.mrb[28].mxu0 %vm295_vm1, %v211_v17 }
  0x59   : > { %743 = vmatprep.mubr.f32.mxu0 %v7292_v0 }
  0x5c   : > { %3944 = vmatmul.mubr.msk.f32.gmra.mrb[30].mxu0 %vm295_vm1, %v212_v18 }
  0x5d   : > { %749 = vmatprep.mubr.f32.mxu0 %v7292_v0 }
  0x60   : > { %3945 = vmatmul.mubr.msk.f32.gmra.mrb[32].mxu0 %vm295_vm1, %v213_v19 }
  0x61   : > { %755 = vmatprep.mubr.f32.mxu0 %v7292_v0 }
  0x64   : > { %3946 = vmatmul.mubr.msk.f32.gmra.mrb[34].mxu0 %vm295_vm1, %v214_v20 }
  0x65   : > { %761 = vmatprep.mubr.f32.mxu0 %v7292_v0 }
  0x68   : > { %3947 = vmatmul.mubr.msk.f32.gmra.mrb[36].mxu0 %vm295_vm1, %v215_v21  ;;  %v251_v21 = vld [vmem:[%s7288_s1 + $0x1b0] sm:$0xff] }
  0x69   : > { %767 = vmatprep.mubr.f32.mxu0 %v7292_v0 }
  0x6c   : > { %3948 = vmatmul.mubr.msk.f32.gmra.mrb[38].mxu0 %vm295_vm1, %v216_v22 }
  0x6d   : > { %773 = vmatprep.mubr.f32.mxu0 %v7292_v0 }
  0x70   : > { %3949 = vmatmul.mubr.msk.f32.gmra.mrb[40].mxu0 %vm295_vm1, %v217_v23 }
  0x71   : > { %779 = vmatprep.mubr.f32.mxu0 %v7292_v0 }
  0x74   : > { %3950 = vmatmul.mubr.msk.f32.gmra.mrb[42].mxu0 %vm295_vm1, %v218_v24 }
  0x75   : > { %785 = vmatprep.mubr.f32.mxu0 %v7292_v0 }
  0x78   : > { %3951 = vmatmul.mubr.msk.f32.gmra.mrb[44].mxu0 %vm295_vm1, %v219_v25 }
  0x79   : > { %791 = vmatprep.mubr.f32.mxu0 %v7292_v0 }
  0x7c   : > { %3952 = vmatmul.mubr.msk.f32.gmra.mrb[46].mxu0 %vm295_vm1, %v220_v26 }
  0x7d   : > { %797 = vmatprep.mubr.f32.mxu0 %v7292_v0 }
  0x80   : > { %3953 = vmatmul.mubr.msk.f32.gmra.mrb[48].mxu0 %vm295_vm1, %v221_v27 }
  0x81   : > { %803 = vmatprep.mubr.f32.mxu0 %v7292_v0 }
  0x84   : > { %3954 = vmatmul.mubr.msk.f32.gmra.mrb[50].mxu0 %vm295_vm1, %v222_v28 }
  0x85   : > { %809 = vmatprep.mubr.f32.mxu0 %v7292_v0 }
  0x88   : > { %3955 = vmatmul.mubr.msk.f32.gmra.mrb[52].mxu0 %vm295_vm1, %v223_v29  ;;  %v252_v29 = vld [vmem:[%s7288_s1 + $0x1b8] sm:$0xff] }
  0x89   : > { %815 = vmatprep.mubr.f32.mxu0 %v7292_v0 }
  0x8c   : > { %3956 = vmatmul.mubr.msk.f32.gmra.mrb[54].mxu0 %vm295_vm1, %v224_v30 }
  0x8d   : > { %821 = vmatprep.mubr.f32.mxu0 %v7292_v0 }
  0x90   : > { %3957 = vmatmul.mubr.msk.f32.gmra.mrb[56].mxu0 %vm295_vm1, %v225_v31 }
  0x91   : > { %827 = vmatprep.mubr.f32.mxu0 %v7292_v0 }
  0x94   : > { %3958 = vmatmul.mubr.msk.f32.gmra.mrb[58].mxu0 %vm295_vm1, %v226_v32 }
  0x95   : > { %833 = vmatprep.mubr.f32.mxu0 %v7292_v0 }
  0x98   : > { %3959 = vmatmul.mubr.msk.f32.gmra.mrb[60].mxu0 %vm295_vm1, %v227_v33 }
  0x99   : > { %839 = vmatprep.mubr.f32.mxu0 %v7292_v0 }
  0x9c   : > { %3960 = vmatmul.mubr.msk.f32.gmra.mrb[62].mxu0 %vm295_vm1, %v228_v34 }
  0x9d   : > { %845 = vmatprep.mubr.f32.mxu0 %v7292_v0 }
  0xa0   : > { %3961 = vmatmul.mubr.msk.f32.gmra.mrb[64].mxu0 %vm295_vm1, %v229_v35 }
  0xa1   : > { %851 = vmatprep.mubr.f32.mxu0 %v7292_v0 }
  0xa4   : > { %3962 = vmatmul.mubr.msk.f32.gmra.mrb[66].mxu0 %vm295_vm1, %v230_v36 }
  0xa5   : > { %857 = vmatprep.mubr.f32.mxu0 %v7292_v0 }
  0xa8   : > { %3963 = vmatmul.mubr.msk.f32.gmra.mrb[68].mxu0 %vm295_vm1, %v231_v37 }
  0xa9   : > { %863 = vmatprep.mubr.f32.mxu0 %v7292_v0 }
  0xac   : > { %3964 = vmatmul.mubr.msk.f32.gmra.mrb[70].mxu0 %vm295_vm1, %v232_v38 }
  0xad   : > { %869 = vmatprep.mubr.f32.mxu0 %v7292_v0 }
  0xb0   : > { %3965 = vmatmul.mubr.msk.f32.gmra.mrb[72].mxu0 %vm295_vm1, %v233_v39 }
  0xb1   : > { %875 = vmatprep.mubr.f32.mxu0 %v7292_v0 }
  0xb4   : > { %3966 = vmatmul.mubr.msk.f32.gmra.mrb[74].mxu0 %vm295_vm1, %v234_v40 }
  0xb5   : > { %881 = vmatprep.mubr.f32.mxu0 %v7292_v0 }
  0xb8   : > { %3967 = vmatmul.mubr.msk.f32.gmra.mrb[76].mxu0 %vm295_vm1, %v235_v41 }
  0xb9   : > { %887 = vmatprep.mubr.f32.mxu0 %v7292_v0 }
  0xbc   : > { %3968 = vmatmul.mubr.msk.f32.gmra.mrb[78].mxu0 %vm295_vm1, %v236_v42 }
  0xbd   : > { %893 = vmatprep.mubr.f32.mxu0 %v7292_v0 }
  0xc0   : > { %3969 = vmatmul.mubr.msk.f32.gmra.mrb[80].mxu0 %vm295_vm1, %v237_v43 }
  0xc1   : > { %899 = vmatprep.mubr.f32.mxu0 %v7292_v0 }
  0xc4   : > { %3970 = vmatmul.mubr.msk.f32.gmra.mrb[82].mxu0 %vm295_vm1, %v238_v44 }
  0xc5   : > { %905 = vmatprep.mubr.f32.mxu0 %v7292_v0 }
  0xc8   : > { %3971 = vmatmul.mubr.msk.f32.gmra.mrb[84].mxu0 %vm295_vm1, %v239_v45 }
  0xc9   : > { %911 = vmatprep.mubr.f32.mxu0 %v7292_v0 }
  0xcc   : > { %3972 = vmatmul.mubr.msk.f32.gmra.mrb[86].mxu0 %vm295_vm1, %v240_v46 }
  0xcd   : > { %917 = vmatprep.mubr.f32.mxu0 %v7292_v0 }
  0xd0   : > { %3973 = vmatmul.mubr.msk.f32.gmra.mrb[88].mxu0 %vm295_vm1, %v241_v47  ;;  %v253_v47 = vld [vmem:[%s7288_s1 + $0x1c0] sm:$0xff] }
  0xd1   : > { %923 = vmatprep.mubr.f32.mxu0 %v7292_v0 }
  0xd4   : > { %3974 = vmatmul.mubr.msk.f32.gmra.mrb[90].mxu0 %vm295_vm1, %v242_v48 }
  0xd5   : > { %929 = vmatprep.mubr.f32.mxu0 %v7292_v0 }
  0xd8   : > { %3975 = vmatmul.mubr.msk.f32.gmra.mrb[92].mxu0 %vm295_vm1, %v243_v49  ;;  %v254_v49 = vld [vmem:[%s7288_s1 + $0x1c8] sm:$0xff] }
  0xd9   : > { %935 = vmatprep.mubr.f32.mxu0 %v7292_v0 }
  0xdc   : > { %3976 = vmatmul.mubr.msk.f32.gmra.mrb[94].mxu0 %vm295_vm1, %v244_v50 }
  0xdd   : > { %941 = vmatprep.mubr.f32.mxu0 %v7292_v0 }
  0xe0   : > { %3977 = vmatmul.mubr.msk.f32.gmra.mrb[96].mxu0 %vm295_vm1, %v245_v51 }
  0xe1   : > { %947 = vmatprep.mubr.f32.mxu0 %v7292_v0 }
  0xe4   : > { %3978 = vmatmul.mubr.msk.f32.gmra.mrb[98].mxu0 %vm295_vm1, %v246_v54  ;;  %v256_v54 = vld [vmem:[%s7288_s1 + $0x1d8] sm:$0xff] }
  0xe5   : > { %953 = vmatprep.mubr.f32.mxu0 %v7292_v0 }
  0xe8   : > { %3979 = vmatmul.mubr.msk.f32.gmra.mrb[100].mxu0 %vm295_vm1, %v247_v57 }
  0xe9   : > { %959 = vmatprep.mubr.f32.mxu0 %v7292_v0 }
  0xec   : > { %3980 = vmatmul.mubr.msk.f32.gmra.mrb[102].mxu0 %vm295_vm1, %v248_v61 }
  0xed   : > { %965 = vmatprep.mubr.f32.mxu0 %v7292_v0 }
  0xf0   : > { %3981 = vmatmul.mubr.msk.f32.gmra.mrb[104].mxu0 %vm295_vm1, %v249_v3 }
  0xf1   : > { %971 = vmatprep.mubr.f32.mxu0 %v7292_v0 }
  0xf3   : > { %v5148_v52 = vpop.f32.mrb[0].mxu0 }
  0xf4   : > { %v5151_v53 = vpop.f32.mrb[1].mxu0  ;;  %3982 = vmatmul.mubr.msk.f32.gmra.mrb[106].mxu0 %vm295_vm1, %v250_v10  ;;  %v258_v10 = vld [vmem:[%s7288_s1 + $0x1e8] sm:$0xff] }
  0xf5   : > { %977 = vmatprep.mubr.f32.mxu0 %v7292_v0 }
  0xf7   : > { %v5157_v55 = vpop.f32.mrb[2].mxu0 }
  0xf8   : > { %v5160_v56 = vpop.f32.mrb[3].mxu0  ;;  %3983 = vmatmul.mubr.msk.f32.gmra.mrb[108].mxu0 %vm295_vm1, %v251_v21 }
  0xf9   : > { %983 = vmatprep.mubr.f32.mxu0 %v7292_v0 }
  0xfb   : > { %v5166_v58 = vpop.f32.mrb[4].mxu0 }
  0xfc   : > { %v1230_v59 = vmax.f32 %v5148_v52, %v5166_v58  ;;  %v5171_v60 = vpop.f32.mrb[5].mxu0  ;;  %3984 = vmatmul.mubr.msk.f32.gmra.mrb[110].mxu0 %vm295_vm1, %v252_v29 }
  0xfd   : > { %v1239_v62 = vmax.f32 %v5151_v53, %v5171_v60  ;;  %989 = vmatprep.mubr.f32.mxu0 %v7292_v0 }
  0xff   : > { %v673_v63 = vpop.f32.mrb[6].mxu0 }
 0x100   : > { %v1231_v1 = vmax.f32 %v5157_v55, %v673_v63  ;;  %v5181_v2 = vpop.f32.mrb[7].mxu0  ;;  %3985 = vmatmul.mubr.msk.f32.gmra.mrb[112].mxu0 %vm295_vm1, %v253_v47 }
 0x101   : > { %v1240_v4 = vmax.f32 %v5160_v56, %v5181_v2  ;;  %995 = vmatprep.mubr.f32.mxu0 %v7292_v0 }
 0x102   : > { %v1232_v5 = vmax.f32 %v1230_v59, %v1231_v1 }
 0x103   : > { %v1241_v6 = vmax.f32 %v1239_v62, %v1240_v4  ;;  %v5189_v7 = vpop.f32.mrb[8].mxu0  ;;  %v257_v62 = vld [vmem:[%s7288_s1 + $0x1e0] sm:$0xff] }
 0x104   : > { %v1233_v8 = vrot.slane %v1232_v5, 4  ;;  %v5192_v9 = vpop.f32.mrb[9].mxu0  ;;  %3986 = vmatmul.mubr.msk.f32.gmra.mrb[114].mxu0 %vm295_vm1, %v254_v49 }
 0x105   : > { %v1242_v11 = vrot.slane %v1241_v6, 4  ;;  %v1300_v12 = vmax.f32 %v5189_v7, %v5192_v9  ;;  %1001 = vmatprep.mubr.f32.mxu0 %v7292_v0 }
 0x106   : > { %v1234_v13 = vmax.f32 %v1232_v5, %v1233_v8 }
 0x107   : > { %v1243_v14 = vmax.f32 %v1241_v6, %v1242_v11  ;;  %1301 = vmax.xlane.f32.xlu0 %v1300_v12  ;;  %v5200_v15 = vpop.f32.mrb[10].mxu0 }
 0x108   : > { %v1235_v16 = vrot.slane %v1234_v13, 2  ;;  %v5203_v17 = vpop.f32.mrb[11].mxu0 }
 0x109   : > { %v1244_v18 = vrot.slane %v1243_v14, 2  ;;  %v1303_v19 = vmax.f32 %v5200_v15, %v5203_v17 }
 0x10a   : > { %v1236_v20 = vmax.f32 %v1234_v13, %v1235_v16 }
 0x10b   : > { %v1245_v22 = vmax.f32 %v1243_v14, %v1244_v18  ;;  %1304 = vmax.xlane.f32.xlu0 %v1303_v19  ;;  %v5211_v23 = vpop.f32.mrb[12].mxu0 }
 0x10c   : > { %v1237_v24 = vrot.slane %v1236_v20, 1  ;;  %v5214_v25 = vpop.f32.mrb[13].mxu0 }
 0x10d   : > { %v1246_v26 = vrot.slane %v1245_v22, 1  ;;  %v1306_v27 = vmax.f32 %v5211_v23, %v5214_v25 }
 0x10e   : > { %v1238_v28 = vmax.f32 %v1236_v20, %v1237_v24 }
 0x10f   : > { %v1247_v30 = vmax.f32 %v1245_v22, %v1246_v26  ;;  %1307 = vmax.xlane.f32.xlu1 %v1306_v27  ;;  %v5222_v31 = vpop.f32.mrb[14].mxu0  ;;  %v259_v22 = vld [vmem:[%s7288_s1 + $0x1f0] sm:$0xff] }
 0x110   : > { %v1248_v32 = vsub.f32 %v5148_v52, %v1238_v28  ;;  %v1250_v33 = vsub.f32 %v5157_v55, %v1238_v28  ;;  %v1252_v34 = vsub.f32 %v5166_v58, %v1238_v28  ;;  %v1254_v35 = vsub.f32 %v673_v63, %v1238_v28  ;;  %v5228_v36 = vpop.f32.mrb[15].mxu0  ;;  %v255_v52 = vld [vmem:[%s7288_s1 + $0x1d0] sm:$0xff] }
 0x111   : > { %v1249_v37 = vsub.f32 %v5151_v53, %v1247_v30  ;;  %v1251_v38 = vsub.f32 %v5160_v56, %v1247_v30  ;;  %v1253_v39 = vsub.f32 %v5171_v60, %v1247_v30  ;;  %v1255_v40 = vsub.f32 %v5181_v2, %v1247_v30  ;;  %3987 = vmatmul.mubr.msk.f32.gmra.mrb[116].mxu0 %vm295_vm1, %v255_v52 }
 0x112   : > { %v1256_v41 = vmul.f32 1.442695, %v1248_v32  ;;  %v1260_v42 = vmul.f32 1.442695, %v1250_v33  ;;  %v1264_v43 = vmul.f32 1.442695, %v1252_v34  ;;  %v1309_v44 = vmax.f32 %v5222_v31, %v5228_v36  ;;  %1007 = vmatprep.mubr.f32.mxu0 %v7292_v0 }
 0x113   : > { %v1268_v45 = vmul.f32 1.442695, %v1254_v35  ;;  %v1258_v46 = vmul.f32 1.442695, %v1249_v37  ;;  %v1262_v48 = vmul.f32 1.442695, %v1251_v38 }
 0x114   : > { %4396 = vpow2.f32 %v1256_v41  ;;  %1310 = vmax.xlane.f32.xlu1 %v1309_v44  ;;  %v1266_v50 = vmul.f32 1.442695, %v1253_v39  ;;  %v1270_v51 = vmul.f32 1.442695, %v1255_v40  ;;  %v5269_v61 = vpop.f32.mrb[16].mxu0  ;;  %v260_v34 = vld [vmem:[%s7288_s1 + $0x1f8] sm:$0xff] }
 0x115   : > { %4398 = vpow2.f32 %v1260_v42  ;;  %3988 = vmatmul.mubr.msk.f32.gmra.mrb[118].mxu0 %vm295_vm1, %v256_v54  ;;  %v5277_v1 = vpop.f32.mrb[17].mxu0 }
 0x116   : > { %4400 = vpow2.f32 %v1264_v43  ;;  %1013 = vmatprep.mubr.f32.mxu0 %v7292_v0 }
 0x117   : > { %4402 = vpow2.f32 %v1268_v45  ;;  %v5286_v8 = vpop.f32.mrb[18].mxu0  ;;  %v261_v45 = vld [vmem:[%s7288_s1 + $0x200] sm:$0xff] }
 0x118   : > { %4404 = vpow2.f32 %v1258_v46  ;;  %v5294_v12 = vpop.f32.mrb[19].mxu0 }
 0x119   : > { %4406 = vpow2.f32 %v1262_v48  ;;  %3989 = vmatmul.mubr.msk.f32.gmra.mrb[120].mxu0 %vm295_vm1, %v257_v62 }
 0x11a   : > { %4408 = vpow2.f32 %v1266_v50  ;;  %1019 = vmatprep.mubr.f32.mxu0 %v7292_v0 }
 0x11b   : > { %4410 = vpow2.f32 %v1270_v51  ;;  %v5297_v16 = vpop.f32.mrb[20].mxu0 }
 0x11c   : > { %v5299_v18 = vpop.f32.mrb[21].mxu0 }
 0x11d   : > { %3990 = vmatmul.mubr.msk.f32.gmra.mrb[122].mxu0 %vm295_vm1, %v258_v10 }
 0x11e   : > { %v5251_v53 = vpop.eup %4396  ;;  %1025 = vmatprep.mubr.f32.mxu0 %v7292_v0 }
 0x11f   : > { %v5257_v55 = vpop.eup %4398  ;;  %v5302_v21 = vpop.f32.mrb[22].mxu0 }
 0x120   : > { %v5259_v56 = vpop.eup %4400  ;;  %v1272_v57 = vadd.f32 %v5257_v55, %v5251_v53  ;;  %v5308_v24 = vpop.f32.mrb[23].mxu0 }
 0x121   : > { %v5263_v58 = vpop.eup %4402  ;;  %3991 = vmatmul.mubr.msk.f32.gmra.mrb[124].mxu0 %vm295_vm1, %v259_v22 }
 0x122   : > { %v5266_v59 = vpop.eup %4404  ;;  %v1273_v60 = vadd.f32 %v5259_v56, %v1272_v57  ;;  %1031 = vmatprep.mubr.f32.mxu0 %v7292_v0 }
 0x123   : > { %v5275_v63 = vpop.eup %4406  ;;  %v5310_v28 = vpop.f32.mrb[24].mxu0 }
 0x124   : > { %v1274_v2 = vadd.f32 %v5263_v58, %v1273_v60  ;;  %v1281_v3 = vadd.f32 %v5275_v63, %v5266_v59  ;;  %v5282_v4 = vpop.eup %4408  ;;  %v5312_v29 = vpop.f32.mrb[25].mxu0  ;;  %v262_v60 = vld [vmem:[%s7288_s1 + $0x208] sm:$0xff] }
 0x125   : > { %v5292_v11 = vpop.eup %4410  ;;  %3992 = vmatmul.mubr.msk.f32.gmra.mrb[126].mxu0 %vm295_vm1, %v260_v34 }
 0x126   : > { %v1275_v5 = vrot.slane %v1274_v2, 4  ;;  %v1282_v6 = vadd.f32 %v5282_v4, %v1281_v3  ;;  %1037 = vmatprep.mubr.f32.mxu0 %v7292_v0 }
 0x127   : > { %v5315_v33 = vpop.f32.mrb[26].mxu0 }
 0x128   : > { %v1276_v13 = vadd.f32 %v1275_v5, %v1274_v2  ;;  %v1283_v14 = vadd.f32 %v5292_v11, %v1282_v6  ;;  %v5321_v35 = vpop.f32.mrb[27].mxu0 }
 0x129   : > { %3993 = vmatmul.mubr.msk.f32.gmra.mrb[128].mxu0 %vm295_vm1, %v261_v45 }
 0x12a   : > { %v1277_v19 = vrot.slane %v1276_v13, 2  ;;  %v1284_v20 = vrot.slane %v1283_v14, 4  ;;  %1043 = vmatprep.mubr.f32.mxu0 %v7292_v0 }
 0x12b   : > { %v5323_v39 = vpop.f32.mrb[28].mxu0 }
 0x12c   : > { %v1278_v26 = vadd.f32 %v1277_v19, %v1276_v13  ;;  %v1285_v27 = vadd.f32 %v1284_v20, %v1283_v14  ;;  %v1534_v40 = vmax.f32 %v5310_v28, %v5323_v39  ;;  %v5327_v41 = vpop.f32.mrb[29].mxu0  ;;  %v263_v14 = vld [vmem:[%s7288_s1 + $0x210] sm:$0xff] }
 0x12d   : > { %v1543_v43 = vmax.f32 %v5312_v29, %v5327_v41  ;;  %3994 = vmatmul.mubr.msk.f32.gmra.mrb[130].mxu0 %vm295_vm1, %v262_v60 }
 0x12e   : > { %v1279_v30 = vrot.slane %v1278_v26, 1  ;;  %v1286_v32 = vrot.slane %v1285_v27, 2  ;;  %1049 = vmatprep.mubr.f32.mxu0 %v7292_v0 }
 0x12f   : > { %v5332_v44 = vpop.f32.mrb[30].mxu0 }
 0x130   : > { %v1280_v37 = vadd.f32 %v1279_v30, %v1278_v26  ;;  %v1287_v38 = vadd.f32 %v1286_v32, %v1285_v27  ;;  %v1535_v46 = vmax.f32 %v5315_v33, %v5332_v44  ;;  %v5340_v47 = vpop.f32.mrb[31].mxu0  ;;  %v284_v30 = vld [vmem:[%s7288_s1 + $0x2b8] sm:$0xff] }
 0x131   : > { %v1544_v49 = vmax.f32 %v5321_v35, %v5340_v47  ;;  %3995 = vmatmul.mubr.msk.f32.gmra.mrb[132].mxu0 %vm295_vm1, %v263_v14  ;;  %4016 = vmatmul.mubr.msk.f32.vlgmr.msra.gmra.mrb[0].mxu1 %vm295_vm1, %v284_v30 }
 0x132   : > { %4412 = vrcp.f32 %v1280_v37  ;;  %v1288_v42 = vrot.slane %v1287_v38, 1  ;;  %v1536_v51 = vmax.f32 %v1534_v40, %v1535_v46  ;;  %1055 = vmatprep.mubr.f32.mxu0 %v7292_v0  ;;  %v264_v40 = vld [vmem:[%s7288_s1 + $0x218] sm:$0xff]  ;;  %1181 = vmatprep.mubr.f32.mxu1 %v7292_v0 }
 0x133   : > { %v5344_v50 = vpop.f32.mrb[32].mxu0  ;;  %v1545_v54 = vmax.f32 %v1543_v43, %v1544_v49 }
 0x134   : > { %v1289_v48 = vadd.f32 %v1288_v42, %v1287_v38  ;;  %v5346_v52 = vpop.f32.mrb[33].mxu0  ;;  %v1537_v62 = vrot.slane %v1536_v51, 4  ;;  %v285_v42 = vld [vmem:[%s7288_s1 + $0x2c0] sm:$0xff] }
 0x135   : > { %v1604_v57 = vmax.f32 %v5344_v50, %v5346_v52  ;;  %v1546_v3 = vrot.slane %v1545_v54, 4  ;;  %3996 = vmatmul.mubr.msk.f32.gmra.mrb[134].mxu0 %vm295_vm1, %v264_v40  ;;  %4017 = vmatmul.mubr.msk.f32.gmra.mrb[2].mxu1 %vm295_vm1, %v285_v42 }
 0x136   : > { %4414 = vrcp.f32 %v1289_v48  ;;  %v1538_v6 = vmax.f32 %v1536_v51, %v1537_v62  ;;  %1061 = vmatprep.mubr.f32.mxu0 %v7292_v0  ;;  %1187 = vmatprep.mubr.f32.mxu1 %v7292_v0 }
 0x137   : > { %v5355_v2 = vpop.f32.mrb[34].mxu0  ;;  %v1547_v13 = vmax.f32 %v1545_v54, %v1546_v3  ;;  %v265_v3 = vld [vmem:[%s7288_s1 + $0x220] sm:$0xff] }
 0x138   : > { %v5357_v5 = vpop.f32.mrb[35].mxu0  ;;  %v1539_v19 = vrot.slane %v1538_v6, 2 }
 0x139   : > { %v1607_v10 = vmax.f32 %v5355_v2, %v5357_v5  ;;  %v1548_v26 = vrot.slane %v1547_v13, 2  ;;  %3997 = vmatmul.mubr.msk.f32.gmra.mrb[136].mxu0 %vm295_vm1, %v265_v3  ;;  %v289_v3 = vld [vmem:[%s7288_s1 + $0x2e0] sm:$0xff] }
 0x13a   : > { %v1540_v32 = vmax.f32 %v1538_v6, %v1539_v19  ;;  %v286_v6 = vld [vmem:[%s7288_s1 + $0x2c8] sm:$0xff]  ;;  %1067 = vmatprep.mubr.f32.mxu0 %v7292_v0 }
 0x13b   : > { %v5366_v20 = vpop.f32.mrb[36].mxu0  ;;  %v1549_v38 = vmax.f32 %v1547_v13, %v1548_v26  ;;  %4018 = vmatmul.mubr.msk.f32.gmra.mrb[4].mxu1 %vm295_vm1, %v286_v6 }
 0x13c   : > { %v4413_v22 = vpop.eup %4412  ;;  %v5368_v27 = vpop.f32.mrb[37].mxu0  ;;  %1193 = vmatprep.mubr.f32.mxu1 %v7292_v0 }
 0x13d   : > { %v1610_v34 = vmax.f32 %v5366_v20, %v5368_v27  ;;  %v5378_v37 = vmul.f32 %v4413_v22, %v5251_v53  ;;  %v5389_v43 = vmul.f32 %v4413_v22, %v5257_v55  ;;  %v5392_v45 = vmul.f32 %v4413_v22, %v5259_v56 }
 0x13e   : > { %v1541_v53 = vrot.slane %v1540_v32, 1  ;;  %v5397_v48 = vmul.f32 %v4413_v22, %v5263_v58  ;;  %v1550_v51 = vrot.slane %v1549_v38, 1 }
 0x13f   : > { %7423 = vst [vmem:[#allocation7_spill] sm:$0xff] %v5378_v37  ;;  %7424 = vst [vmem:[#allocation8_spill] sm:$0xff] %v5389_v43  ;;  %v5394_v46 = vpop.f32.mrb[38].mxu0 }
 0x140   : > { %7425 = vst [vmem:[#allocation9_spill] sm:$0xff] %v5392_v45  ;;  %7426 = vst [vmem:[#allocation10_spill] sm:$0xff] %v5397_v48  ;;  %v4415_v49 = vpop.eup %4414  ;;  %v5399_v54 = vpop.f32.mrb[39].mxu0  ;;  %v1542_v62 = vmax.f32 %v1540_v32, %v1541_v53  ;;  %v1551_v58 = vmax.f32 %v1549_v38, %v1550_v51 }
 0x141   : > { %v1613_v55 = vmax.f32 %v5394_v46, %v5399_v54  ;;  %v5408_v56 = vmul.f32 %v4415_v49, %v5266_v59  ;;  %v5419_v13 = vmul.f32 %v4415_v49, %v5275_v63  ;;  %v5422_v14 = vmul.f32 %v4415_v49, %v5282_v4 }
 0x142   : > { %v1552_v59 = vsub.f32 %v5310_v28, %v1542_v62  ;;  %v1554_v19 = vsub.f32 %v5315_v33, %v1542_v62  ;;  %v1556_v22 = vsub.f32 %v5323_v39, %v1542_v62  ;;  %v1558_v26 = vsub.f32 %v5332_v44, %v1542_v62 }
 0x143   : > { %7427 = vst [vmem:[#allocation11_spill] sm:$0xff] %v5408_v56  ;;  %7428 = vst [vmem:[#allocation12_spill] sm:$0xff] %v5419_v13  ;;  %v1553_v30 = vsub.f32 %v5312_v29, %v1551_v58  ;;  %v1555_v32 = vsub.f32 %v5321_v35, %v1551_v58  ;;  %v1557_v38 = vsub.f32 %v5327_v41, %v1551_v58  ;;  %v266_v29 = vld [vmem:[%s7288_s1 + $0x228] sm:$0xff]  ;;  %v287_v35 = vld [vmem:[%s7288_s1 + $0x2d0] sm:$0xff] }
 0x144   : > { %7429 = vst [vmem:[#allocation13_spill] sm:$0xff] %v5422_v14  ;;  %v1559_v63 = vsub.f32 %v5340_v47, %v1551_v58  ;;  %v1560_v40 = vmul.f32 1.442695, %v1552_v59  ;;  %v1564_v42 = vmul.f32 1.442695, %v1554_v19  ;;  %v5445_v39 = vmul.f32 %v4415_v49, %v5292_v11  ;;  %3998 = vmatmul.mubr.msk.f32.gmra.mrb[138].mxu0 %vm295_vm1, %v266_v29  ;;  %4019 = vmatmul.mubr.msk.f32.gmra.mrb[6].mxu1 %vm295_vm1, %v287_v35  ;;  %v267_v11 = vld [vmem:[%s7288_s1 + $0x230] sm:$0xff] }
 0x145   : > { %v1568_v4 = vmul.f32 1.442695, %v1556_v22  ;;  %v1572_v33 = vmul.f32 1.442695, %v1558_v26  ;;  %v1562_v41 = vmul.f32 1.442695, %v1553_v30  ;;  %1073 = vmatprep.mubr.f32.mxu0 %v7292_v0  ;;  %1199 = vmatprep.mubr.f32.mxu1 %v7292_v0 }
 0x146   : > { %7430 = vst [vmem:[#allocation14_spill] sm:$0xff] %v5445_v39  ;;  %4416 = vpow2.f32 %v1560_v40  ;;  %v1566_v47 = vmul.f32 1.442695, %v1555_v32  ;;  %v1570_v51 = vmul.f32 1.442695, %v1557_v38  ;;  %v288_v49 = vld [vmem:[%s7288_s1 + $0x2d8] sm:$0xff] }
 0x147   : > { %4418 = vpow2.f32 %v1564_v42  ;;  %v1574_v62 = vmul.f32 1.442695, %v1559_v63  ;;  %v268_v58 = vld [vmem:[%s7288_s1 + $0x238] sm:$0xff]  ;;  %v269_v19 = vld [vmem:[%s7288_s1 + $0x240] sm:$0xff]  ;;  %v290_v22 = vld [vmem:[%s7288_s1 + $0x2e8] sm:$0xff] }
 0x148   : > { %4420 = vpow2.f32 %v1568_v4  ;;  %3999 = vmatmul.mubr.msk.f32.gmra.mrb[140].mxu0 %vm295_vm1, %v267_v11  ;;  %4020 = vmatmul.mubr.msk.f32.gmra.mrb[8].mxu1 %vm295_vm1, %v288_v49  ;;  %v270_v42 = vld [vmem:[%s7288_s1 + $0x248] sm:$0xff]  ;;  %v291_v4 = vld [vmem:[%s7288_s1 + $0x2f0] sm:$0xff]  ;;  %v272_v49 = vld [vmem:[%s7288_s1 + $0x258] sm:$0xff] }
 0x149   : > { %4422 = vpow2.f32 %v1572_v33  ;;  %1079 = vmatprep.mubr.f32.mxu0 %v7292_v0  ;;  %1205 = vmatprep.mubr.f32.mxu1 %v7292_v0 }
 0x14a   : > { %4424 = vpow2.f32 %v1562_v41 }
 0x14b   : > { %4426 = vpow2.f32 %v1566_v47 }
 0x14c   : > { %4428 = vpow2.f32 %v1570_v51  ;;  %4000 = vmatmul.mubr.msk.f32.gmra.mrb[142].mxu0 %vm295_vm1, %v268_v58  ;;  %4021 = vmatmul.mubr.msk.f32.gmra.mrb[10].mxu1 %vm295_vm1, %v289_v3  ;;  %v271_v51 = vld [vmem:[%s7288_s1 + $0x250] sm:$0xff] }
 0x14d   : > { %4430 = vpow2.f32 %v1574_v62  ;;  %1085 = vmatprep.mubr.f32.mxu0 %v7292_v0  ;;  %1211 = vmatprep.mubr.f32.mxu1 %v7292_v0  ;;  %v292_v62 = vld [vmem:[%s7288_s1 + $0x2f8] sm:$0xff] }
 0x150   : > { %v5471_v6 = vpop.eup %4416  ;;  %4001 = vmatmul.mubr.msk.f32.gmra.mrb[144].mxu0 %vm295_vm1, %v269_v19  ;;  %4022 = vmatmul.mubr.msk.f32.gmra.mrb[12].mxu1 %vm295_vm1, %v290_v22  ;;  %v273_v19 = vld [vmem:[%s7288_s1 + $0x260] sm:$0xff] }
 0x151   : > { %v5475_v59 = vpop.eup %4418  ;;  %1091 = vmatprep.mubr.f32.mxu0 %v7292_v0  ;;  %1217 = vmatprep.mubr.f32.mxu1 %v7292_v0 }
 0x152   : > { %v5485_v26 = vpop.eup %4420  ;;  %v1576_v30 = vadd.f32 %v5475_v59, %v5471_v6 }
 0x153   : > { %v5489_v32 = vpop.eup %4422 }
 0x154   : > { %v5491_v38 = vpop.eup %4424  ;;  %v1577_v63 = vadd.f32 %v5485_v26, %v1576_v30  ;;  %4002 = vmatmul.mubr.msk.f32.gmra.mrb[146].mxu0 %vm295_vm1, %v270_v42  ;;  %4023 = vmatmul.mubr.msk.f32.gmra.mrb[14].mxu1 %vm295_vm1, %v291_v4  ;;  %v275_v4 = vld [vmem:[%s7288_s1 + $0x270] sm:$0xff] }
 0x155   : > { %v5496_v40 = vpop.eup %4426  ;;  %1097 = vmatprep.mubr.f32.mxu0 %v7292_v0  ;;  %1223 = vmatprep.mubr.f32.mxu1 %v7292_v0 }
 0x156   : > { %v5506_v33 = vpop.eup %4428  ;;  %v1578_v29 = vadd.f32 %v5489_v32, %v1577_v63  ;;  %v1585_v35 = vadd.f32 %v5496_v40, %v5491_v38 }
 0x157   : > { %v5511_v41 = vpop.eup %4430 }
 0x158   : > { %v1586_v47 = vadd.f32 %v5506_v33, %v1585_v35  ;;  %4003 = vmatmul.mubr.msk.f32.gmra.mrb[148].mxu0 %vm295_vm1, %v271_v51  ;;  %4024 = vmatmul.mubr.msk.f32.gmra.mrb[16].mxu1 %vm295_vm1, %v292_v62  ;;  %v1579_v58 = vrot.slane %v1578_v29, 4 }
 0x159   : > { %1103 = vmatprep.mubr.f32.mxu0 %v7292_v0  ;;  %1428 = vmatprep.mubr.f32.mxu1 %v5277_v1  ;;  %v274_v1 = vld [vmem:[%s7288_s1 + $0x268] sm:$0xff] }
 0x15a   : > { %v1587_v11 = vadd.f32 %v5511_v41, %v1586_v47  ;;  %v1580_v22 = vadd.f32 %v1579_v58, %v1578_v29  ;;  %v276_v47 = vld [vmem:[%s7288_s1 + $0x278] sm:$0xff] }
 0x15c   : > { %v1588_v3 = vrot.slane %v1587_v11, 4  ;;  %4004 = vmatmul.mubr.msk.f32.gmra.mrb[150].mxu0 %vm295_vm1, %v272_v49  ;;  %v1581_v63 = vrot.slane %v1580_v22, 2 }
 0x15d   : > { %1109 = vmatprep.mubr.f32.mxu0 %v7292_v0 }
 0x15e   : > { %v1589_v30 = vadd.f32 %v1588_v3, %v1587_v11  ;;  %v1582_v29 = vadd.f32 %v1581_v63, %v1580_v22  ;;  %v277_v11 = vld [vmem:[%s7288_s1 + $0x280] sm:$0xff]  ;;  %v278_v3 = vld [vmem:[%s7288_s1 + $0x288] sm:$0xff]  ;;  %v280_v22 = vld [vmem:[%s7288_s1 + $0x298] sm:$0xff] }
 0x160   : > { %4005 = vmatmul.mubr.msk.f32.gmra.mrb[152].mxu0 %vm295_vm1, %v273_v19  ;;  %v1590_v42 = vrot.slane %v1589_v30, 2  ;;  %v1583_v51 = vrot.slane %v1582_v29, 1  ;;  %v279_v19 = vld [vmem:[%s7288_s1 + $0x290] sm:$0xff] }
 0x161   : > { %1115 = vmatprep.mubr.f32.mxu0 %v7292_v0 }
 0x162   : > { %v1591_v35 = vadd.f32 %v1590_v42, %v1589_v30  ;;  %v1584_v49 = vadd.f32 %v1583_v51, %v1582_v29  ;;  %v282_v42 = vld [vmem:[%s7288_s1 + $0x2a8] sm:$0xff] }
 0x164   : > { %4006 = vmatmul.mubr.msk.f32.gmra.mrb[154].mxu0 %vm295_vm1, %v274_v1  ;;  %v1592_v62 = vrot.slane %v1591_v35, 1  ;;  %4432 = vrcp.f32 %v1584_v49  ;;  %v281_v1 = vld [vmem:[%s7288_s1 + $0x2a0] sm:$0xff] }
 0x165   : > { %1121 = vmatprep.mubr.f32.mxu0 %v7292_v0 }
 0x166   : > { %v1593_v58 = vadd.f32 %v1592_v62, %v1591_v35 }
 0x168   : > { %4007 = vmatmul.mubr.msk.f32.gmra.mrb[156].mxu0 %vm295_vm1, %v275_v4  ;;  %4434 = vrcp.f32 %v1593_v58 }
 0x169   : > { %1127 = vmatprep.mubr.f32.mxu0 %v7292_v0 }
 0x16c   : > { %4008 = vmatmul.mubr.msk.f32.gmra.mrb[158].mxu0 %vm295_vm1, %v276_v47 }
 0x16d   : > { %1133 = vmatprep.mubr.f32.mxu0 %v7292_v0 }
 0x16e   : > { %v4433_v30 = vpop.eup %4432 }
 0x16f   : > { %v5589_v35 = vmul.f32 %v4433_v30, %v5471_v6  ;;  %v5592_v47 = vmul.f32 %v4433_v30, %v5475_v59 }
 0x170   : > { %4009 = vmatmul.mubr.msk.f32.gmra.mrb[160].mxu0 %vm295_vm1, %v277_v11  ;;  %v5614_v11 = vmul.f32 %v4433_v30, %v5489_v32 }
 0x171   : > { %1139 = vmatprep.mubr.f32.mxu0 %v7292_v0  ;;  %7433 = vst [vmem:[#allocation17_spill] sm:$0xff] %v5589_v35  ;;  %7434 = vst [vmem:[#allocation18_spill] sm:$0xff] %v5592_v47 }
 0x172   : > { %v4435_v63 = vpop.eup %4434  ;;  %7438 = vst [vmem:[#allocation22_spill] sm:$0xff] %v5614_v11 }
 0x173   : > { %v5583_v4 = vmul.f32 %v4435_v63, %v5491_v38  ;;  %v5586_v29 = vmul.f32 %v4435_v63, %v5496_v40  ;;  %v283_v38 = vld [vmem:[%s7288_s1 + $0x2b0] sm:$0xff]  ;;  %v5605_v6 = vmul.f32 %v4435_v63, %v5506_v33  ;;  %v5608_v59 = vmul.f32 %v4435_v63, %v5511_v41 }
 0x174   : > { %4010 = vmatmul.mubr.msk.f32.gmra.mrb[162].mxu0 %vm295_vm1, %v278_v3  ;;  %v5611_v40 = vmul.f32 %v4433_v30, %v5485_v26 }
 0x175   : > { %1145 = vmatprep.mubr.f32.mxu0 %v7292_v0  ;;  %7431 = vst [vmem:[#allocation15_spill] sm:$0xff] %v5583_v4  ;;  %7432 = vst [vmem:[#allocation16_spill] sm:$0xff] %v5586_v29 }
 0x176   : > { %7435 = vst [vmem:[#allocation19_spill] sm:$0xff] %v5605_v6  ;;  %7436 = vst [vmem:[#allocation20_spill] sm:$0xff] %v5608_v59 }
 0x177   : > { %7437 = vst [vmem:[#allocation21_spill] sm:$0xff] %v5611_v40 }
 0x178   : > { %4011 = vmatmul.mubr.msk.f32.gmra.mrb[164].mxu0 %vm295_vm1, %v279_v19 }
 0x179   : > { %1151 = vmatprep.mubr.f32.mxu0 %v7292_v0 }
 0x17c   : > { %4012 = vmatmul.mubr.msk.f32.gmra.mrb[166].mxu0 %vm295_vm1, %v280_v22 }
 0x17d   : > { %1157 = vmatprep.mubr.f32.mxu0 %v7292_v0 }
 0x180   : > { %4013 = vmatmul.mubr.msk.f32.gmra.mrb[168].mxu0 %vm295_vm1, %v281_v1 }
 0x181   : > { %1163 = vmatprep.mubr.f32.mxu0 %v7292_v0 }
 0x184   : > { %4014 = vmatmul.mubr.msk.f32.gmra.mrb[170].mxu0 %vm295_vm1, %v282_v42 }
 0x185   : > { %1169 = vmatprep.mubr.f32.mxu0 %v7292_v0 }
 0x188   : > { %4015 = vmatmul.mubr.msk.f32.gmra.mrb[172].mxu0 %vm295_vm1, %v283_v38 }
 0x194   : > { %v1302_v3 = vpop.xlane.xlu0 %1301 }
 0x195   : > { %v1312_v19 = vsub.f32 %v5189_v7, %v1302_v3  ;;  %v1313_v33 = vsub.f32 %v5192_v9, %v1302_v3 }
 0x197   : > { %v1320_v22 = vmul.f32 1.442695, %v1312_v19  ;;  %v1322_v41 = vmul.f32 1.442695, %v1313_v33 }
 0x198   : > { %v1305_v1 = vpop.xlane.xlu0 %1304 }
 0x199   : > { %4436 = vpow2.f32 %v1320_v22  ;;  %v1314_v26 = vsub.f32 %v5200_v15, %v1305_v1  ;;  %v1315_v32 = vsub.f32 %v5203_v17, %v1305_v1 }
 0x19a   : > { %4438 = vpow2.f32 %v1322_v41 }
 0x19b   : > { %v1324_v30 = vmul.f32 1.442695, %v1314_v26  ;;  %v1326_v63 = vmul.f32 1.442695, %v1315_v32 }
 0x19c   : > { %v1308_v42 = vpop.xlane.xlu1 %1307 }
 0x19d   : > { %4440 = vpow2.f32 %v1324_v30  ;;  %v1316_v38 = vsub.f32 %v5211_v23, %v1308_v42  ;;  %v1317_v58 = vsub.f32 %v5214_v25, %v1308_v42  ;;  %v5664_v42 = vpop.f32.mrb[40].mxu0 }
 0x19e   : > { %4442 = vpow2.f32 %v1326_v63  ;;  %7439 = vst [vmem:[#allocation23_spill] sm:$0xff] %v5664_v42 }
 0x19f   : > { %v1328_v7 = vmul.f32 1.442695, %v1316_v38  ;;  %v1330_v9 = vmul.f32 1.442695, %v1317_v58  ;;  %v5666_v38 = vpop.f32.mrb[41].mxu0 }
 0x1a0   : > { %7440 = vst [vmem:[#allocation24_spill] sm:$0xff] %v5666_v38 }
 0x1a1   : > { %4444 = vpow2.f32 %v1328_v7  ;;  %v1311_v3 = vpop.xlane.xlu1 %1310  ;;  %v5668_v7 = vpop.f32.mrb[42].mxu0 }
 0x1a2   : > { %4446 = vpow2.f32 %v1330_v9  ;;  %v1318_v19 = vsub.f32 %v5222_v31, %v1311_v3  ;;  %v1319_v15 = vsub.f32 %v5228_v36, %v1311_v3  ;;  %7441 = vst [vmem:[#allocation25_spill] sm:$0xff] %v5668_v7 }
 0x1a3   : > { %v5628_v17 = vpop.eup %4436 }
 0x1a4   : > { %v5630_v33 = vpop.eup %4438  ;;  %v1332_v22 = vmul.f32 1.442695, %v1318_v19  ;;  %v1334_v41 = vmul.f32 1.442695, %v1319_v15 }
 0x1a5   : > { %v1336_v23 = vadd.f32 %v5630_v33, %v5628_v17 }
 0x1a6   : > { %4448 = vpow2.f32 %v1332_v22 }
 0x1a7   : > { %v5634_v25 = vpop.eup %4440  ;;  %4450 = vpow2.f32 %v1334_v41  ;;  %1337 = vadd.xlane.f32.xlu0 %v1336_v23 }
 0x1a8   : > { %v5636_v58 = vpop.eup %4442 }
 0x1a9   : > { %v1339_v31 = vadd.f32 %v5636_v58, %v5634_v25 }
 0x1ab   : > { %v5640_v36 = vpop.eup %4444  ;;  %1340 = vadd.xlane.f32.xlu1 %v1339_v31 }
 0x1ac   : > { %v5642_v1 = vpop.eup %4446 }
 0x1ad   : > { %v1342_v26 = vadd.f32 %v5642_v1, %v5640_v36 }
 0x1af   : > { %1343 = vadd.xlane.f32.xlu0 %v1342_v26 }
 0x1b0   : > { %v5646_v32 = vpop.eup %4448 }
 0x1b1   : > { %v5648_v30 = vpop.eup %4450 }
 0x1b2   : > { %v1345_v63 = vadd.f32 %v5648_v30, %v5646_v32 }
 0x1b3   : > { %1605 = vmax.xlane.f32.xlu0 %v1604_v57  ;;  %v5670_v57 = vpop.f32.mrb[43].mxu0 }
 0x1b4   : > { %1346 = vadd.xlane.f32.xlu1 %v1345_v63  ;;  %7442 = vst [vmem:[#allocation26_spill] sm:$0xff] %v5670_v57  ;;  %v5672_v9 = vpop.f32.mrb[44].mxu0 }
 0x1b5   : > { %7443 = vst [vmem:[#allocation27_spill] sm:$0xff] %v5672_v9  ;;  %v5674_v3 = vpop.f32.mrb[45].mxu0 }
 0x1b6   : > { %7444 = vst [vmem:[#allocation28_spill] sm:$0xff] %v5674_v3 }
 0x1b7   : > { %1611 = vmax.xlane.f32.xlu0 %v1610_v34  ;;  %v5676_v34 = vpop.f32.mrb[46].mxu0 }
 0x1b8   : > { %1608 = vmax.xlane.f32.xlu1 %v1607_v10  ;;  %7445 = vst [vmem:[#allocation29_spill] sm:$0xff] %v5676_v34  ;;  %v5678_v19 = vpop.f32.mrb[47].mxu0 }
 0x1b9   : > { %7446 = vst [vmem:[#allocation30_spill] sm:$0xff] %v5678_v19  ;;  %v799_v10 = vpop.f32.mrb[48].mxu0 }
 0x1ba   : > { %v801_v15 = vpop.f32.mrb[49].mxu0 }
 0x1bb   : > { %v805_v22 = vpop.f32.mrb[50].mxu0 }
 0x1bc   : > { %1614 = vmax.xlane.f32.xlu1 %v1613_v55  ;;  %v807_v55 = vpop.f32.mrb[51].mxu0 }
 0x1bd   : > { %v811_v41 = vpop.f32.mrb[52].mxu0 }
 0x1be   : > { %v1843_v23 = vmax.f32 %v799_v10, %v811_v41  ;;  %v813_v31 = vpop.f32.mrb[53].mxu0 }
 0x1bf   : > { %v1852_v26 = vmax.f32 %v801_v15, %v813_v31  ;;  %v817_v63 = vpop.f32.mrb[54].mxu0 }
 0x1c0   : > { %v1844_v49 = vmax.f32 %v805_v22, %v817_v63  ;;  %v819_v62 = vpop.f32.mrb[55].mxu0 }
 0x1c1   : > { %v1853_v51 = vmax.f32 %v807_v55, %v819_v62  ;;  %v5680_v44 = vpop.f32.mrb[56].mxu0 }
 0x1c2   : > { %v1845_v53 = vmax.f32 %v1843_v23, %v1844_v49  ;;  %v5682_v60 = vpop.f32.mrb[57].mxu0 }
 0x1c3   : > { %v1854_v28 = vmax.f32 %v1852_v26, %v1853_v51  ;;  %v5684_v0 = vpop.f32.mrb[58].mxu0 }
 0x1c4   : > { %v1846_v11 = vrot.slane %v1845_v53, 4  ;;  %v5688_v6 = vpop.f32.mrb[59].mxu0 }
 0x1c5   : > { %v1855_v59 = vrot.slane %v1854_v28, 4  ;;  %v5690_v35 = vpop.f32.mrb[60].mxu0 }
 0x1c6   : > { %v1847_v4 = vmax.f32 %v1845_v53, %v1846_v11  ;;  %v5694_v29 = vpop.f32.mrb[61].mxu0 }
 0x1c7   : > { %v1856_v49 = vmax.f32 %v1854_v28, %v1855_v59  ;;  %v5698_v23 = vpop.f32.mrb[62].mxu0 }
 0x1c8   : > { %v1848_v26 = vrot.slane %v1847_v4, 2  ;;  %v5700_v40 = vpop.f32.mrb[63].mxu0 }
 0x1c9   : > { %v1857_v45 = vrot.slane %v1856_v49, 2  ;;  %v5704_v37 = vpop.f32.mrb[64].mxu0 }
 0x1ca   : > { %v1849_v14 = vmax.f32 %v1847_v4, %v1848_v26  ;;  %7447 = vst [vmem:[#allocation31_spill] sm:$0xff] %v5704_v37  ;;  %v5706_v11 = vpop.f32.mrb[65].mxu0 }
 0x1cb   : > { %v1858_v39 = vmax.f32 %v1856_v49, %v1857_v45  ;;  %7448 = vst [vmem:[#allocation32_spill] sm:$0xff] %v5706_v11  ;;  %v5708_v59 = vpop.f32.mrb[66].mxu0 }
 0x1cc   : > { %v1850_v53 = vrot.slane %v1849_v14, 1  ;;  %7449 = vst [vmem:[#allocation33_spill] sm:$0xff] %v5708_v59  ;;  %v5710_v47 = vpop.f32.mrb[67].mxu0 }
 0x1cd   : > { %v1859_v28 = vrot.slane %v1858_v39, 1  ;;  %7450 = vst [vmem:[#allocation34_spill] sm:$0xff] %v5710_v47  ;;  %v5712_v56 = vpop.f32.mrb[68].mxu0 }
 0x1ce   : > { %v1851_v51 = vmax.f32 %v1849_v14, %v1850_v53  ;;  %7451 = vst [vmem:[#allocation35_spill] sm:$0xff] %v5712_v56  ;;  %v5714_v4 = vpop.f32.mrb[69].mxu0 }
 0x1cf   : > { %v1860_v43 = vmax.f32 %v1858_v39, %v1859_v28  ;;  %7452 = vst [vmem:[#allocation36_spill] sm:$0xff] %v5714_v4  ;;  %v5716_v11 = vpop.f32.mrb[70].mxu0 }
 0x1d0   : > { %v1861_v13 = vsub.f32 %v799_v10, %v1851_v51  ;;  %v1863_v34 = vsub.f32 %v805_v22, %v1851_v51  ;;  %v1865_v19 = vsub.f32 %v811_v41, %v1851_v51  ;;  %v1867_v48 = vsub.f32 %v817_v63, %v1851_v51  ;;  %7453 = vst [vmem:[#allocation37_spill] sm:$0xff] %v5716_v11  ;;  %v5718_v28 = vpop.f32.mrb[71].mxu0 }
 0x1d1   : > { %v1862_v45 = vsub.f32 %v801_v15, %v1860_v43  ;;  %v1864_v49 = vsub.f32 %v807_v55, %v1860_v43  ;;  %v1866_v26 = vsub.f32 %v813_v31, %v1860_v43  ;;  %v1868_v37 = vsub.f32 %v819_v62, %v1860_v43  ;;  %7454 = vst [vmem:[#allocation38_spill] sm:$0xff] %v5718_v28  ;;  %v5720_v22 = vpop.f32.mrb[72].mxu0 }
 0x1d2   : > { %v1869_v9 = vmul.f32 1.442695, %v1861_v13  ;;  %v1873_v59 = vmul.f32 1.442695, %v1863_v34  ;;  %v1877_v14 = vmul.f32 1.442695, %v1865_v19 }
 0x1d3   : > { %v1881_v53 = vmul.f32 1.442695, %v1867_v48  ;;  %v1871_v39 = vmul.f32 1.442695, %v1862_v45  ;;  %v1875_v10 = vmul.f32 1.442695, %v1864_v49 }
 0x1d4   : > { %4452 = vpow2.f32 %v1869_v9  ;;  %v1879_v41 = vmul.f32 1.442695, %v1866_v26  ;;  %v5722_v15 = vpop.f32.mrb[73].mxu0  ;;  %v1883_v43 = vmul.f32 1.442695, %v1868_v37 }
 0x1d5   : > { %4454 = vpow2.f32 %v1873_v59  ;;  %v5724_v62 = vpop.f32.mrb[74].mxu0 }
 0x1d6   : > { %4456 = vpow2.f32 %v1877_v14  ;;  %v5726_v13 = vpop.f32.mrb[75].mxu0 }
 0x1d7   : > { %4458 = vpow2.f32 %v1881_v53  ;;  %v5728_v48 = vpop.f32.mrb[76].mxu0 }
 0x1d8   : > { %4460 = vpow2.f32 %v1871_v39  ;;  %v2152_v9 = vmax.f32 %v5720_v22, %v5728_v48  ;;  %v5732_v34 = vpop.f32.mrb[77].mxu0 }
 0x1d9   : > { %4462 = vpow2.f32 %v1875_v10  ;;  %v2161_v19 = vmax.f32 %v5722_v15, %v5732_v34  ;;  %v889_v55 = vpop.f32.mrb[78].mxu0 }
 0x1da   : > { %4464 = vpow2.f32 %v1879_v41  ;;  %v2153_v37 = vmax.f32 %v5724_v62, %v889_v55  ;;  %v5737_v31 = vpop.f32.mrb[79].mxu0 }
 0x1db   : > { %4466 = vpow2.f32 %v1883_v43  ;;  %v2162_v63 = vmax.f32 %v5726_v13, %v5737_v31  ;;  %v5741_v51 = vpop.f32.mrb[80].mxu0 }
 0x1dc   : > { %7455 = vst [vmem:[#allocation39_spill] sm:$0xff] %v5741_v51  ;;  %v2154_v45 = vmax.f32 %v2152_v9, %v2153_v37  ;;  %v5745_v49 = vpop.f32.mrb[81].mxu0 }
 0x1dd   : > { %7457 = vst [vmem:[#allocation41_spill] sm:$0xff] %v5745_v49  ;;  %v2163_v14 = vmax.f32 %v2161_v19, %v2162_v63  ;;  %v5749_v53 = vpop.f32.mrb[82].mxu0 }
 0x1de   : > { %v5743_v59 = vpop.eup %4452  ;;  %7459 = vst [vmem:[#allocation43_spill] sm:$0xff] %v5749_v53  ;;  %v2155_v41 = vrot.slane %v2154_v45, 4  ;;  %v5755_v43 = vpop.f32.mrb[83].mxu0 }
 0x1df   : > { %7456 = vst [vmem:[#allocation40_spill] sm:$0xff] %v5743_v59  ;;  %v5747_v26 = vpop.eup %4454  ;;  %7461 = vst [vmem:[#allocation45_spill] sm:$0xff] %v5755_v43  ;;  %v2164_v28 = vrot.slane %v2163_v14, 4  ;;  %v5759_v56 = vpop.f32.mrb[84].mxu0 }
 0x1e0   : > { %7458 = vst [vmem:[#allocation42_spill] sm:$0xff] %v5747_v26  ;;  %v5751_v39 = vpop.eup %4456  ;;  %v1885_v10 = vadd.f32 %v5747_v26, %v5743_v59  ;;  %7463 = vst [vmem:[#allocation47_spill] sm:$0xff] %v5759_v56  ;;  %v2156_v19 = vmax.f32 %v2154_v45, %v2155_v41  ;;  %v5764_v63 = vpop.f32.mrb[85].mxu0 }
 0x1e1   : > { %7460 = vst [vmem:[#allocation44_spill] sm:$0xff] %v5751_v39  ;;  %v5757_v11 = vpop.eup %4458  ;;  %7464 = vst [vmem:[#allocation48_spill] sm:$0xff] %v5764_v63  ;;  %v2165_v47 = vmax.f32 %v2163_v14, %v2164_v28  ;;  %v5768_v3 = vpop.f32.mrb[86].mxu0 }
 0x1e2   : > { %7462 = vst [vmem:[#allocation46_spill] sm:$0xff] %v5757_v11  ;;  %v5761_v9 = vpop.eup %4460  ;;  %v1886_v37 = vadd.f32 %v5751_v39, %v1885_v10  ;;  %7466 = vst [vmem:[#allocation50_spill] sm:$0xff] %v5768_v3  ;;  %v2157_v38 = vrot.slane %v2156_v19, 2  ;;  %v5777_v56 = vpop.f32.mrb[87].mxu0 }
 0x1e3   : > { %v5766_v4 = vpop.eup %4462  ;;  %7468 = vst [vmem:[#allocation52_spill] sm:$0xff] %v5777_v56  ;;  %v2166_v45 = vrot.slane %v2165_v47, 2  ;;  %v5781_v41 = vpop.f32.mrb[88].mxu0 }
 0x1e4   : > { %7465 = vst [vmem:[#allocation49_spill] sm:$0xff] %v5766_v4  ;;  %v5770_v7 = vpop.eup %4464  ;;  %v5773_v57 = vadd.f32 %v5757_v11, %v1886_v37  ;;  %v1894_v42 = vadd.f32 %v5766_v4, %v5761_v9  ;;  %7470 = vst [vmem:[#allocation54_spill] sm:$0xff] %v5781_v41  ;;  %v2158_v14 = vmax.f32 %v2156_v19, %v2157_v38  ;;  %v5784_v3 = vpop.f32.mrb[89].mxu0 }
 0x1e5   : > { %7467 = vst [vmem:[#allocation51_spill] sm:$0xff] %v5770_v7  ;;  %v5779_v10 = vpop.eup %4466  ;;  %7471 = vst [vmem:[#allocation55_spill] sm:$0xff] %v5784_v3  ;;  %v2167_v63 = vmax.f32 %v2165_v47, %v2166_v45  ;;  %v5786_v39 = vpop.f32.mrb[90].mxu0 }
 0x1e6   : > { %7469 = vst [vmem:[#allocation53_spill] sm:$0xff] %v5779_v10  ;;  %v1895_v28 = vadd.f32 %v5770_v7, %v1894_v42  ;;  %7472 = vst [vmem:[#allocation56_spill] sm:$0xff] %v5786_v39  ;;  %v2159_v11 = vrot.slane %v2158_v14, 1  ;;  %v5791_v53 = vpop.f32.mrb[91].mxu0 }
 0x1e7   : > { %7473 = vst [vmem:[#allocation57_spill] sm:$0xff] %v5791_v53  ;;  %v2168_v56 = vrot.slane %v2167_v63, 1  ;;  %v5793_v43 = vpop.f32.mrb[92].mxu0 }
 0x1e8   : > { %v5789_v37 = vadd.f32 %v5779_v10, %v1895_v28  ;;  %7474 = vst [vmem:[#allocation58_spill] sm:$0xff] %v5793_v43  ;;  %v2160_v51 = vmax.f32 %v2158_v14, %v2159_v11  ;;  %v5795_v49 = vpop.f32.mrb[93].mxu0 }
 0x1e9   : > { %7475 = vst [vmem:[#allocation59_spill] sm:$0xff] %v5795_v49  ;;  %v2169_v41 = vmax.f32 %v2167_v63, %v2168_v56  ;;  %v5797_v42 = vpop.f32.mrb[94].mxu0 }
 0x1ea   : > { %7476 = vst [vmem:[#allocation60_spill] sm:$0xff] %v5797_v42  ;;  %v2170_v38 = vsub.f32 %v5720_v22, %v2160_v51  ;;  %v2172_v47 = vsub.f32 %v5724_v62, %v2160_v51  ;;  %v5801_v19 = vpop.f32.mrb[95].mxu0  ;;  %v2174_v45 = vsub.f32 %v5728_v48, %v2160_v51  ;;  %v2176_v28 = vsub.f32 %v889_v55, %v2160_v51 }
 0x1eb   : > { %7477 = vst [vmem:[#allocation61_spill] sm:$0xff] %v5801_v19  ;;  %v2171_v39 = vsub.f32 %v5722_v15, %v2169_v41  ;;  %v2173_v53 = vsub.f32 %v5726_v13, %v2169_v41  ;;  %v5806_v43 = vpop.f32.mrb[96].mxu0  ;;  %v2175_v63 = vsub.f32 %v5732_v34, %v2169_v41  ;;  %v2177_v22 = vsub.f32 %v5737_v31, %v2169_v41 }
 0x1ec   : > { %v2178_v11 = vmul.f32 1.442695, %v2170_v38  ;;  %v2182_v14 = vmul.f32 1.442695, %v2172_v47  ;;  %v2186_v56 = vmul.f32 1.442695, %v2174_v45 }
 0x1ed   : > { %v5810_v42 = vpop.f32.mrb[97].mxu0  ;;  %v2190_v62 = vmul.f32 1.442695, %v2176_v28  ;;  %v2180_v48 = vmul.f32 1.442695, %v2171_v39 }
 0x1ee   : > { %4468 = vpow2.f32 %v2178_v11  ;;  %v5812_v19 = vpop.f32.mrb[98].mxu0  ;;  %v2184_v13 = vmul.f32 1.442695, %v2173_v53  ;;  %v2188_v51 = vmul.f32 1.442695, %v2175_v63 }
 0x1ef   : > { %4470 = vpow2.f32 %v2182_v14  ;;  %v5814_v15 = vpop.f32.mrb[99].mxu0  ;;  %v2192_v41 = vmul.f32 1.442695, %v2177_v22 }
 0x1f0   : > { %4472 = vpow2.f32 %v2186_v56  ;;  %v5816_v55 = vpop.f32.mrb[100].mxu0 }
 0x1f1   : > { %4474 = vpow2.f32 %v2190_v62  ;;  %v2461_v34 = vmax.f32 %v5806_v43, %v5816_v55  ;;  %v5820_v31 = vpop.f32.mrb[101].mxu0 }
 0x1f2   : > { %4476 = vpow2.f32 %v2180_v48  ;;  %v2470_v38 = vmax.f32 %v5810_v42, %v5820_v31  ;;  %v961_v47 = vpop.f32.mrb[102].mxu0 }
 0x1f3   : > { %v2462_v39 = vmax.f32 %v5812_v19, %v961_v47  ;;  %v5825_v45 = vpop.f32.mrb[103].mxu0  ;;  %4478 = vpow2.f32 %v2184_v13 }
 0x1f4   : > { %v2471_v53 = vmax.f32 %v5814_v15, %v5825_v45  ;;  %v5829_v28 = vpop.f32.mrb[104].mxu0  ;;  %4480 = vpow2.f32 %v2188_v51 }
 0x1f5   : > { %7478 = vst [vmem:[#allocation62_spill] sm:$0xff] %v5829_v28  ;;  %v2463_v11 = vmax.f32 %v2461_v34, %v2462_v39  ;;  %v5831_v14 = vpop.f32.mrb[105].mxu0  ;;  %4482 = vpow2.f32 %v2192_v41 }
 0x1f6   : > { %7479 = vst [vmem:[#allocation63_spill] sm:$0xff] %v5831_v14  ;;  %v2472_v56 = vmax.f32 %v2470_v38, %v2471_v53  ;;  %v5833_v63 = vpop.f32.mrb[106].mxu0 }
 0x1f7   : > { %7480 = vst [vmem:[#allocation64_spill] sm:$0xff] %v5833_v63  ;;  %v2464_v62 = vrot.slane %v2463_v11, 4  ;;  %v5837_v48 = vpop.f32.mrb[107].mxu0 }
 0x1f8   : > { %v5835_v22 = vpop.eup %4468  ;;  %7482 = vst [vmem:[#allocation66_spill] sm:$0xff] %v5837_v48  ;;  %v2473_v13 = vrot.slane %v2472_v56, 4  ;;  %v5841_v3 = vpop.f32.mrb[108].mxu0 }
 0x1f9   : > { %7481 = vst [vmem:[#allocation65_spill] sm:$0xff] %v5835_v22  ;;  %v5839_v49 = vpop.eup %4470  ;;  %7484 = vst [vmem:[#allocation68_spill] sm:$0xff] %v5841_v3  ;;  %v2465_v34 = vmax.f32 %v2463_v11, %v2464_v62  ;;  %v5845_v39 = vpop.f32.mrb[109].mxu0 }
 0x1fa   : > { %7483 = vst [vmem:[#allocation67_spill] sm:$0xff] %v5839_v49  ;;  %v2194_v51 = vadd.f32 %v5839_v49, %v5835_v22  ;;  %7485 = vst [vmem:[#allocation69_spill] sm:$0xff] %v5845_v39  ;;  %v5847_v41 = vpop.eup %4472  ;;  %v2474_v38 = vmax.f32 %v2472_v56, %v2473_v13  ;;  %v5849_v53 = vpop.f32.mrb[110].mxu0 }
 0x1fb   : > { %7486 = vst [vmem:[#allocation70_spill] sm:$0xff] %v5847_v41  ;;  %7487 = vst [vmem:[#allocation71_spill] sm:$0xff] %v5849_v53  ;;  %v5851_v63 = vpop.eup %4474  ;;  %v2466_v28 = vrot.slane %v2465_v34, 2  ;;  %v5854_v14 = vpop.f32.mrb[111].mxu0 }
 0x1fc   : > { %7488 = vst [vmem:[#allocation72_spill] sm:$0xff] %v5851_v63  ;;  %v2195_v48 = vadd.f32 %v5847_v41, %v2194_v51  ;;  %7489 = vst [vmem:[#allocation73_spill] sm:$0xff] %v5854_v14  ;;  %v5856_v10 = vpop.eup %4476  ;;  %v2475_v3 = vrot.slane %v2474_v38, 2  ;;  %v5858_v7 = vpop.f32.mrb[112].mxu0 }
 0x1fd   : > { %7490 = vst [vmem:[#allocation74_spill] sm:$0xff] %v5856_v10  ;;  %7491 = vst [vmem:[#allocation75_spill] sm:$0xff] %v5858_v7  ;;  %v2467_v62 = vmax.f32 %v2465_v34, %v2466_v28  ;;  %v5863_v49 = vpop.f32.mrb[113].mxu0  ;;  %v5865_v56 = vpop.eup %4478 }
 0x1fe   : > { %v5861_v11 = vadd.f32 %v5851_v63, %v2195_v48  ;;  %7493 = vst [vmem:[#allocation77_spill] sm:$0xff] %v5863_v49  ;;  %7494 = vst [vmem:[#allocation78_spill] sm:$0xff] %v5865_v56  ;;  %v2476_v13 = vmax.f32 %v2474_v38, %v2475_v3  ;;  %v5867_v22 = vpop.f32.mrb[114].mxu0  ;;  %v5869_v51 = vpop.eup %4480  ;;  %v2203_v41 = vadd.f32 %v5865_v56, %v5856_v10 }
 0x1ff   : > { %7495 = vst [vmem:[#allocation79_spill] sm:$0xff] %v5867_v22  ;;  %7496 = vst [vmem:[#allocation80_spill] sm:$0xff] %v5869_v51  ;;  %v2468_v53 = vrot.slane %v2467_v62, 1  ;;  %v5873_v14 = vpop.f32.mrb[115].mxu0  ;;  %v5875_v7 = vpop.eup %4482 }
 0x200   : > { %7492 = vst [vmem:[#allocation76_spill] sm:$0xff] %v5861_v11  ;;  %7497 = vst [vmem:[#allocation81_spill] sm:$0xff] %v5873_v14  ;;  %v2477_v48 = vrot.slane %v2476_v13, 1  ;;  %v5877_v63 = vpop.f32.mrb[116].mxu0  ;;  %v2204_v28 = vadd.f32 %v5869_v51, %v2203_v41 }
 0x201   : > { %7498 = vst [vmem:[#allocation82_spill] sm:$0xff] %v5875_v7  ;;  %7499 = vst [vmem:[#allocation83_spill] sm:$0xff] %v5877_v63  ;;  %v2469_v34 = vmax.f32 %v2467_v62, %v2468_v53  ;;  %v5880_v49 = vpop.f32.mrb[117].mxu0 }
 0x202   : > { %7500 = vst [vmem:[#allocation84_spill] sm:$0xff] %v5880_v49  ;;  %v2478_v3 = vmax.f32 %v2476_v13, %v2477_v48  ;;  %v5882_v38 = vpop.f32.mrb[118].mxu0  ;;  %v5885_v22 = vadd.f32 %v5875_v7, %v2204_v28 }
 0x203   : > { %7501 = vst [vmem:[#allocation85_spill] sm:$0xff] %v5882_v38  ;;  %v2479_v56 = vsub.f32 %v5806_v43, %v2469_v34  ;;  %v2481_v14 = vsub.f32 %v5812_v19, %v2469_v34  ;;  %v5889_v10 = vpop.f32.mrb[119].mxu0  ;;  %v2483_v39 = vsub.f32 %v5816_v55, %v2469_v34  ;;  %v2485_v63 = vsub.f32 %v961_v47, %v2469_v34 }
 0x204   : > { %7502 = vst [vmem:[#allocation86_spill] sm:$0xff] %v5885_v22  ;;  %7503 = vst [vmem:[#allocation87_spill] sm:$0xff] %v5889_v10  ;;  %v2480_v41 = vsub.f32 %v5810_v42, %v2478_v3  ;;  %v2482_v53 = vsub.f32 %v5814_v15, %v2478_v3  ;;  %v5894_v62 = vpop.f32.mrb[120].mxu0  ;;  %v2484_v43 = vsub.f32 %v5820_v31, %v2478_v3 }
 0x205   : > { %v2487_v13 = vmul.f32 1.442695, %v2479_v56  ;;  %v2491_v48 = vmul.f32 1.442695, %v2481_v14  ;;  %v5896_v38 = vpop.f32.mrb[121].mxu0  ;;  %v2486_v19 = vsub.f32 %v5825_v45, %v2478_v3 }
 0x206   : > { %v2495_v28 = vmul.f32 1.442695, %v2483_v39  ;;  %v2499_v49 = vmul.f32 1.442695, %v2485_v63  ;;  %v5900_v10 = vpop.f32.mrb[122].mxu0 }
 0x207   : > { %4484 = vpow2.f32 %v2487_v13  ;;  %v5902_v55 = vpop.f32.mrb[123].mxu0  ;;  %v2489_v42 = vmul.f32 1.442695, %v2480_v41  ;;  %v2493_v15 = vmul.f32 1.442695, %v2482_v53 }
 0x208   : > { %4486 = vpow2.f32 %v2491_v48  ;;  %v5904_v47 = vpop.f32.mrb[124].mxu0  ;;  %v2497_v14 = vmul.f32 1.442695, %v2484_v43  ;;  %v2501_v31 = vmul.f32 1.442695, %v2486_v19 }
 0x209   : > { %4488 = vpow2.f32 %v2495_v28  ;;  %v2763_v63 = vmax.f32 %v5894_v62, %v5904_v47  ;;  %v5908_v39 = vpop.f32.mrb[125].mxu0 }
 0x20a   : > { %4490 = vpow2.f32 %v2499_v49  ;;  %v2772_v45 = vmax.f32 %v5896_v38, %v5908_v39  ;;  %v5912_v56 = vpop.f32.mrb[126].mxu0 }
 0x20b   : > { %4492 = vpow2.f32 %v2489_v42  ;;  %v2764_v34 = vmax.f32 %v5900_v10, %v5912_v56  ;;  %v5916_v3 = vpop.f32.mrb[127].mxu0 }
 0x20c   : > { %4494 = vpow2.f32 %v2493_v15  ;;  %v2773_v49 = vmax.f32 %v5902_v55, %v5916_v3  ;;  %v5920_v41 = vpop.f32.mrb[128].mxu0 }
 0x20d   : > { %7504 = vst [vmem:[#allocation88_spill] sm:$0xff] %v5920_v41  ;;  %4496 = vpow2.f32 %v2497_v14  ;;  %v2765_v53 = vmax.f32 %v2763_v63, %v2764_v34  ;;  %v5922_v13 = vpop.f32.mrb[129].mxu0 }
 0x20e   : > { %7505 = vst [vmem:[#allocation89_spill] sm:$0xff] %v5922_v13  ;;  %4498 = vpow2.f32 %v2501_v31  ;;  %v2774_v48 = vmax.f32 %v2772_v45, %v2773_v49  ;;  %v5924_v28 = vpop.f32.mrb[130].mxu0 }
 0x20f   : > { %7506 = vst [vmem:[#allocation90_spill] sm:$0xff] %v5924_v28  ;;  %v2766_v43 = vrot.slane %v2765_v53, 4  ;;  %v5926_v19 = vpop.f32.mrb[131].mxu0 }
 0x210   : > { %7507 = vst [vmem:[#allocation91_spill] sm:$0xff] %v5926_v19  ;;  %v2775_v7 = vrot.slane %v2774_v48, 4  ;;  %v5930_v15 = vpop.f32.mrb[132].mxu0 }
 0x211   : > { %v5928_v42 = vpop.eup %4484  ;;  %7509 = vst [vmem:[#allocation93_spill] sm:$0xff] %v5930_v15  ;;  %v2767_v22 = vmax.f32 %v2765_v53, %v2766_v43  ;;  %v5934_v41 = vpop.f32.mrb[133].mxu0 }
 0x212   : > { %7508 = vst [vmem:[#allocation92_spill] sm:$0xff] %v5928_v42  ;;  %v5932_v51 = vpop.eup %4486  ;;  %7511 = vst [vmem:[#allocation95_spill] sm:$0xff] %v5934_v41  ;;  %v2776_v31 = vmax.f32 %v2774_v48, %v2775_v7  ;;  %v5940_v45 = vpop.f32.mrb[134].mxu0 }
 0x213   : > { %7510 = vst [vmem:[#allocation94_spill] sm:$0xff] %v5932_v51  ;;  %v5936_v14 = vpop.eup %4488  ;;  %v2503_v63 = vadd.f32 %v5932_v51, %v5928_v42  ;;  %7513 = vst [vmem:[#allocation97_spill] sm:$0xff] %v5940_v45  ;;  %v2768_v49 = vrot.slane %v2767_v22, 2  ;;  %v5944_v28 = vpop.f32.mrb[135].mxu0 }
 0x214   : > { %7512 = vst [vmem:[#allocation96_spill] sm:$0xff] %v5936_v14  ;;  %v5942_v34 = vpop.eup %4490  ;;  %7515 = vst [vmem:[#allocation99_spill] sm:$0xff] %v5944_v28  ;;  %v2777_v19 = vrot.slane %v2776_v31, 2  ;;  %v5947_v13 = vpop.f32.mrb[136].mxu0 }
 0x215   : > { %7514 = vst [vmem:[#allocation98_spill] sm:$0xff] %v5942_v34  ;;  %v2504_v15 = vadd.f32 %v5936_v14, %v2503_v63  ;;  %7516 = vst [vmem:[#allocation100_spill] sm:$0xff] %v5947_v13  ;;  %v5949_v53 = vpop.eup %4492  ;;  %v2769_v43 = vmax.f32 %v2767_v22, %v2768_v49  ;;  %v5951_v41 = vpop.f32.mrb[137].mxu0 }
 0x216   : > { %7517 = vst [vmem:[#allocation101_spill] sm:$0xff] %v5949_v53  ;;  %7518 = vst [vmem:[#allocation102_spill] sm:$0xff] %v5951_v41  ;;  %v5953_v11 = vpop.eup %4494  ;;  %v2778_v51 = vmax.f32 %v2776_v31, %v2777_v19 }
 0x217   : > { %7519 = vst [vmem:[#allocation103_spill] sm:$0xff] %v5953_v11  ;;  %v5956_v48 = vadd.f32 %v5942_v34, %v2504_v15  ;;  %v5958_v42 = vpop.f32.mrb[138].mxu0  ;;  %v5960_v45 = vpop.eup %4496  ;;  %v2512_v63 = vadd.f32 %v5953_v11, %v5949_v53  ;;  %v2770_v13 = vrot.slane %v2769_v43, 1 }
 0x218   : > { %7521 = vst [vmem:[#allocation105_spill] sm:$0xff] %v5958_v42  ;;  %7522 = vst [vmem:[#allocation106_spill] sm:$0xff] %v5960_v45  ;;  %v5964_v14 = vpop.f32.mrb[139].mxu0  ;;  %v5966_v22 = vpop.eup %4498  ;;  %v2779_v49 = vrot.slane %v2778_v51, 1 }
 0x219   : > { %7520 = vst [vmem:[#allocation104_spill] sm:$0xff] %v5956_v48  ;;  %7523 = vst [vmem:[#allocation107_spill] sm:$0xff] %v5964_v14  ;;  %v2513_v15 = vadd.f32 %v5960_v45, %v2512_v63  ;;  %v2771_v34 = vmax.f32 %v2769_v43, %v2770_v13 }
 0x21a   : > { %7524 = vst [vmem:[#allocation108_spill] sm:$0xff] %v5966_v22  ;;  %v2780_v42 = vmax.f32 %v2778_v51, %v2779_v49 }
 0x21b   : > { %v5968_v41 = vpop.f32.mrb[140].mxu0  ;;  %v5976_v11 = vadd.f32 %v5966_v22, %v2513_v15  ;;  %v2781_v14 = vsub.f32 %v5894_v62, %v2771_v34  ;;  %v2783_v53 = vsub.f32 %v5900_v10, %v2771_v34  ;;  %v2787_v13 = vsub.f32 %v5912_v56, %v2771_v34 }
 0x21c   : > { %7525 = vst [vmem:[#allocation109_spill] sm:$0xff] %v5968_v41  ;;  %v5971_v19 = vpop.f32.mrb[141].mxu0  ;;  %v2782_v43 = vsub.f32 %v5896_v38, %v2780_v42  ;;  %v2786_v10 = vsub.f32 %v5908_v39, %v2780_v42  ;;  %v2788_v56 = vsub.f32 %v5916_v3, %v2780_v42 }
 0x21d   : > { %7526 = vst [vmem:[#allocation110_spill] sm:$0xff] %v5971_v19  ;;  %7528 = vst [vmem:[#allocation112_spill] sm:$0xff] %v5976_v11  ;;  %v2789_v51 = vmul.f32 1.442695, %v2781_v14  ;;  %v2793_v49 = vmul.f32 1.442695, %v2783_v53 }
 0x21e   : > { %v2791_v14 = vmul.f32 1.442695, %v2782_v43  ;;  %v6010_v43 = vmul.f32 1.442695, %v2788_v56 }
 0x21f   : > { %v5973_v48 = vpop.f32.mrb[142].mxu0 }
 0x220   : > { %7527 = vst [vmem:[#allocation111_spill] sm:$0xff] %v5973_v48  ;;  %v5980_v28 = vpop.f32.mrb[143].mxu0 }
 0x221   : > { %7529 = vst [vmem:[#allocation113_spill] sm:$0xff] %v5980_v28 }
 0x223   : > { %v5985_v63 = vpop.f32.mrb[144].mxu0 }
 0x224   : > { %v5988_v15 = vpop.f32.mrb[145].mxu0 }
 0x227   : > { %v5991_v41 = vpop.f32.mrb[146].mxu0 }
 0x234   : > { %v1338_v7 = vpop.xlane.xlu0 %1337 }
 0x235   : > { %4500 = vrcp.f32 %v1338_v7  ;;  %v2785_v7 = vsub.f32 %v5904_v47, %v2771_v34  ;;  %v2801_v47 = vmul.f32 1.442695, %v2787_v13  ;;  %v5994_v34 = vpop.f32.mrb[147].mxu0 }
 0x236   : > { %v5996_v38 = vpop.f32.mrb[148].mxu0 }
 0x237   : > { %v2797_v62 = vmul.f32 1.442695, %v2785_v7  ;;  %v6000_v53 = vpop.f32.mrb[149].mxu0 }
 0x238   : > { %v1341_v31 = vpop.xlane.xlu1 %1340  ;;  %v6006_v13 = vpop.f32.mrb[150].mxu0 }
 0x239   : > { %4502 = vrcp.f32 %v1341_v31  ;;  %v2784_v31 = vsub.f32 %v5902_v55, %v2780_v42  ;;  %v3071_v55 = vmax.f32 %v5985_v63, %v5996_v38  ;;  %v6012_v28 = vpop.f32.mrb[151].mxu0 }
 0x23a   : > { %v6020_v19 = vpop.f32.mrb[152].mxu0 }
 0x23b   : > { %v6002_v39 = vmul.f32 1.442695, %v2784_v31  ;;  %v3080_v31 = vmax.f32 %v5988_v15, %v6000_v53  ;;  %7530 = vst [vmem:[#allocation114_spill] sm:$0xff] %v6020_v19 }
 0x23c   : > { %v1344_v48 = vpop.xlane.xlu0 %1343 }
 0x23d   : > { %4504 = vrcp.f32 %v1344_v48  ;;  %v6004_v48 = vmul.f32 1.442695, %v2786_v10  ;;  %v3081_v10 = vmax.f32 %v5994_v34, %v6012_v28 }
 0x23e   : > { %4506 = vpow2.f32 %v2789_v51 }
 0x23f   : > { %4508 = vpow2.f32 %v2793_v49  ;;  %v4501_v3 = vpop.eup %4500 }
 0x240   : > { %v1606_v7 = vpop.xlane.xlu0 %1605  ;;  %4510 = vpow2.f32 %v2797_v62  ;;  %v3072_v62 = vmax.f32 %v5991_v41, %v6006_v13 }
 0x241   : > { %v1347_v42 = vpop.xlane.xlu1 %1346  ;;  %v1616_v51 = vsub.f32 %v5344_v50, %v1606_v7  ;;  %v1617_v49 = vsub.f32 %v5346_v52, %v1606_v7  ;;  %4512 = vpow2.f32 %v2801_v47  ;;  %v6022_v47 = vpop.f32.mrb[153].mxu0  ;;  %v1357_v7 = vmul.f32 %v4501_v3, %v5630_v33 }
 0x242   : > { %4514 = vrcp.f32 %v1347_v42  ;;  %7531 = vst [vmem:[#allocation115_spill] sm:$0xff] %v6022_v47  ;;  %v3073_v11 = vmax.f32 %v3071_v55, %v3072_v62  ;;  %v6027_v26 = vpop.f32.mrb[154].mxu0 }
 0x243   : > { %v4503_v50 = vpop.eup %4502  ;;  %v1624_v22 = vmul.f32 1.442695, %v1616_v51  ;;  %v1626_v52 = vmul.f32 1.442695, %v1617_v49  ;;  %7532 = vst [vmem:[#allocation116_spill] sm:$0xff] %v6027_v26  ;;  %v1356_v51 = vmul.f32 %v4501_v3, %v5628_v17  ;;  %v6032_v49 = vpop.f32.mrb[155].mxu0 }
 0x244   : > { %v1612_v56 = vpop.xlane.xlu0 %1611  ;;  %v1359_v42 = vmul.f32 %v4503_v50, %v5636_v58  ;;  %v1358_v45 = vmul.f32 %v4503_v50, %v5634_v25  ;;  %v6036_v25 = vpop.f32.mrb[156].mxu0 }
 0x245   : > { %4516 = vpow2.f32 %v1624_v22  ;;  %v1609_v59 = vpop.xlane.xlu1 %1608  ;;  %v1620_v4 = vsub.f32 %v5366_v20, %v1612_v56  ;;  %v1621_v19 = vsub.f32 %v5368_v27, %v1612_v56  ;;  %v6038_v26 = vpop.f32.mrb[157].mxu0 }
 0x246   : > { %4518 = vpow2.f32 %v1626_v52  ;;  %v1618_v33 = vsub.f32 %v5355_v2, %v1609_v59  ;;  %v1619_v58 = vsub.f32 %v5357_v5, %v1609_v59  ;;  %v4168_v47 = vpack.c.bf16 %v1359_v42, %v1357_v7  ;;  %v6042_v3 = vpop.f32.mrb[158].mxu0 }
 0x247   : > { %v4505_v55 = vpop.eup %4504  ;;  %v1632_v62 = vmul.f32 1.442695, %v1620_v4  ;;  %v1634_v22 = vmul.f32 1.442695, %v1621_v19  ;;  %v4170_v50 = vpack.c.bf16 %v1358_v45, %v1356_v51  ;;  %4520 = vpow2.f32 %v2791_v14  ;;  %v6047_v45 = vpop.f32.mrb[159].mxu0 }
 0x248   : > { %v6040_v20 = vpop.eup %4506  ;;  %v1628_v27 = vmul.f32 1.442695, %v1618_v33  ;;  %v1630_v17 = vmul.f32 1.442695, %v1619_v58  ;;  %4169 = vmatprep.subr.bf16.mxu1 %v4168_v47  ;;  %v1361_v59 = vmul.f32 %v4505_v55, %v5642_v1  ;;  %v3074_v4 = vrot.slane %v3073_v11, 4  ;;  %v6055_v7 = vpop.f32.mrb[160].mxu0 }
 0x249   : > { %7533 = vst [vmem:[#allocation117_spill] sm:$0xff] %v6040_v20  ;;  %v6044_v2 = vpop.eup %4508  ;;  %4522 = vpow2.f32 %v1632_v62  ;;  %v1615_v5 = vpop.xlane.xlu1 %1614  ;;  %4171 = vmatpush1.bf16.xpose.msra.mxu1 %v4170_v50  ;;  %v3082_v19 = vmax.f32 %v3080_v31, %v3081_v10  ;;  %7536 = vst [vmem:[#allocation120_spill] sm:$0xff] %v6055_v7  ;;  %v1360_v1 = vmul.f32 %v4505_v55, %v5640_v36 }
 0x24a   : > { %7534 = vst [vmem:[#allocation118_spill] sm:$0xff] %v6044_v2  ;;  %v6049_v52 = vpop.eup %4510  ;;  %4524 = vpow2.f32 %v1628_v27  ;;  %v1622_v56 = vsub.f32 %v5394_v46, %v1615_v5  ;;  %v1623_v14 = vsub.f32 %v5399_v54, %v1615_v5  ;;  %v2805_v47 = vadd.f32 %v6044_v2, %v6040_v20  ;;  %v6060_v51 = vpop.f32.mrb[161].mxu0 }
 0x24b   : > { %7535 = vst [vmem:[#allocation119_spill] sm:$0xff] %v6049_v52  ;;  %v6057_v42 = vpop.eup %4512  ;;  %4526 = vpow2.f32 %v1630_v17  ;;  %v3075_v31 = vmax.f32 %v3073_v11, %v3074_v4  ;;  %v3083_v10 = vrot.slane %v3082_v19, 4  ;;  %7538 = vst [vmem:[#allocation122_spill] sm:$0xff] %v6060_v51 }
 0x24c   : > { %7537 = vst [vmem:[#allocation121_spill] sm:$0xff] %v6057_v42  ;;  %v4515_v33 = vpop.eup %4514  ;;  %4528 = vpow2.f32 %v1634_v22  ;;  %v1636_v58 = vmul.f32 1.442695, %v1622_v56  ;;  %v1638_v46 = vmul.f32 1.442695, %v1623_v14  ;;  %v2806_v54 = vadd.f32 %v6049_v52, %v2805_v47 }
 0x24d   : > { %v1363_v62 = vmul.f32 %v4515_v33, %v5648_v30  ;;  %v1362_v50 = vmul.f32 %v4515_v33, %v5646_v32  ;;  %4530 = vpow2.f32 %v6002_v39  ;;  %v3076_v27 = vrot.slane %v3075_v31, 2 }
 0x24e   : > { %4532 = vpow2.f32 %v1636_v58  ;;  %v6067_v36 = vadd.f32 %v6057_v42, %v2806_v54  ;;  %v3084_v11 = vmax.f32 %v3082_v19, %v3083_v10 }
 0x24f   : > { %v6069_v55 = vpop.eup %4516  ;;  %4534 = vpow2.f32 %v1638_v46  ;;  %v4172_v22 = vpack.c.bf16 %v1363_v62, %v1361_v59  ;;  %v4174_v17 = vpack.c.bf16 %v1362_v50, %v1360_v1  ;;  %v3077_v5 = vmax.f32 %v3075_v31, %v3076_v27 }
 0x250   : > { %v6071_v4 = vpop.eup %4518  ;;  %4536 = vpow2.f32 %v6004_v48  ;;  %v3085_v30 = vrot.slane %v3084_v11, 2  ;;  %v6083_v48 = vpop.f32.mrb[162].mxu0 }
 0x251   : > { %4173 = vmatprep.subr.bf16.mxu1 %v4172_v22  ;;  %v1640_v32 = vadd.f32 %v6071_v4, %v6069_v55  ;;  %4538 = vpow2.f32 %v6010_v43  ;;  %v3078_v39 = vrot.slane %v3077_v5, 1  ;;  %v6077_v56 = vpop.eup %4520  ;;  %7540 = vst [vmem:[#allocation124_spill] sm:$0xff] %v6083_v48  ;;  %v6091_v46 = vpop.f32.mrb[163].mxu0 }
 0x252   : > { %7539 = vst [vmem:[#allocation123_spill] sm:$0xff] %v6077_v56  ;;  %4175 = vmatpush1.bf16.xpose.msra.mxu1 %v4174_v17  ;;  %v3086_v19 = vmax.f32 %v3084_v11, %v3085_v30  ;;  %7541 = vst [vmem:[#allocation125_spill] sm:$0xff] %v6091_v46  ;;  %v6097_v27 = vpop.f32.mrb[164].mxu0 }
 0x253   : > { %v6079_v14 = vpop.eup %4522  ;;  %1641 = vadd.xlane.f32.xlu0 %v1640_v32  ;;  %v3079_v59 = vmax.f32 %v3077_v5, %v3078_v39  ;;  %7542 = vst [vmem:[#allocation126_spill] sm:$0xff] %v6097_v27  ;;  %v6108_v32 = vpop.f32.mrb[165].mxu0 }
 0x254   : > { %v6081_v47 = vpop.eup %4524  ;;  %v3087_v1 = vrot.slane %v3086_v19, 1  ;;  %7544 = vst [vmem:[#allocation128_spill] sm:$0xff] %v6108_v32 }
 0x255   : > { %v6085_v31 = vpop.eup %4526  ;;  %v3089_v10 = vsub.f32 %v5985_v63, %v3079_v59  ;;  %v3091_v43 = vsub.f32 %v5991_v41, %v3079_v59  ;;  %v3093_v33 = vsub.f32 %v5996_v38, %v3079_v59  ;;  %v3095_v58 = vsub.f32 %v6006_v13, %v3079_v59 }
 0x256   : > { %v6093_v54 = vpop.eup %4528  ;;  %v1643_v62 = vadd.f32 %v6085_v31, %v6081_v47  ;;  %v3088_v50 = vmax.f32 %v3086_v19, %v3087_v1 }
 0x257   : > { %v6099_v11 = vpop.eup %4530  ;;  %v1646_v63 = vadd.f32 %v6093_v54, %v6079_v14  ;;  %v3097_v41 = vmul.f32 1.442695, %v3089_v10  ;;  %v3101_v22 = vmul.f32 1.442695, %v3091_v43  ;;  %v3105_v38 = vmul.f32 1.442695, %v3093_v33 }
 0x258   : > { %7543 = vst [vmem:[#allocation127_spill] sm:$0xff] %v6099_v11  ;;  %v6103_v17 = vpop.eup %4532  ;;  %1644 = vadd.xlane.f32.xlu1 %v1643_v62  ;;  %v2814_v13 = vadd.f32 %v6099_v11, %v6077_v56  ;;  %v3109_v5 = vmul.f32 1.442695, %v3095_v58  ;;  %v3090_v30 = vsub.f32 %v5988_v15, %v3088_v50  ;;  %v3092_v19 = vsub.f32 %v5994_v34, %v3088_v50  ;;  %v6116_v10 = vpop.f32.mrb[166].mxu0 }
 0x259   : > { %v6110_v39 = vpop.eup %4534  ;;  %1647 = vadd.xlane.f32.xlu0 %v1646_v63  ;;  %1429 = vmatmul.mubr.f32.vlgmr.msra.gmra.mrb[18].mxu1 %v5269_v61  ;;  %4540 = vpow2.f32 %v3097_v41  ;;  %v3094_v59 = vsub.f32 %v6000_v53, %v3088_v50  ;;  %v3096_v1 = vsub.f32 %v6012_v28, %v3088_v50  ;;  %7545 = vst [vmem:[#allocation129_spill] sm:$0xff] %v6116_v10  ;;  %v1888_v15 = vrot.slane %v5773_v57, 4  ;;  %v6124_v58 = vpop.f32.mrb[167].mxu0 }
 0x25a   : > { %v6118_v43 = vpop.eup %4536  ;;  %1433 = vmatprep.mubr.f32.mxu1 %v5294_v12  ;;  %v1649_v33 = vadd.f32 %v6110_v39, %v6103_v17  ;;  %4542 = vpow2.f32 %v3101_v22  ;;  %v3099_v61 = vmul.f32 1.442695, %v3090_v30  ;;  %7547 = vst [vmem:[#allocation131_spill] sm:$0xff] %v6124_v58  ;;  %v1897_v53 = vrot.slane %v5789_v37, 4  ;;  %v6130_v50 = vpop.f32.mrb[168].mxu0 }
 0x25b   : > { %7546 = vst [vmem:[#allocation130_spill] sm:$0xff] %v6118_v43  ;;  %v6126_v34 = vpop.eup %4538  ;;  %v2815_v28 = vadd.f32 %v6118_v43, %v2814_v13  ;;  %4544 = vpow2.f32 %v3105_v38  ;;  %v3103_v62 = vmul.f32 1.442695, %v3092_v19  ;;  %v3107_v63 = vmul.f32 1.442695, %v3094_v59  ;;  %v6132_v12 = vpop.f32.mrb[169].mxu0 }
 0x25c   : > { %7548 = vst [vmem:[#allocation132_spill] sm:$0xff] %v6126_v34  ;;  %1650 = vadd.xlane.f32.xlu1 %v1649_v33  ;;  %v7549_v41 = vmax.f32 %v5680_v44, %v5682_v60  ;;  %4546 = vpow2.f32 %v3109_v5  ;;  %v3111_v30 = vmul.f32 1.442695, %v3096_v1  ;;  %v6141_v13 = vpop.f32.mrb[170].mxu0  ;;  %v1889_v38 = vadd.f32 %v1888_v15, %v5773_v57  ;;  %v6147_v59 = vpop.f32.mrb[0].mxu1 }
 0x25d   : > { %1434 = vmatmul.mubr.f32.gmra.mrb[20].mxu1 %v5286_v8  ;;  %v6139_v22 = vadd.f32 %v6126_v34, %v2815_v28  ;;  %4548 = vpow2.f32 %v3099_v61  ;;  %v6145_v19 = vpop.f32.mrb[171].mxu0  ;;  %v1898_v33 = vadd.f32 %v1897_v53, %v5789_v37  ;;  %v6150_v8 = vpop.f32.mrb[1].mxu1  ;;  %v7550_v5 = vmax.f32 %v5684_v0, %v5688_v6 }
 0x25e   : > { %1914 = vmax.xlane.f32.xlu0 %v7549_v41  ;;  %1438 = vmatprep.mubr.f32.mxu1 %v5299_v18  ;;  %4550 = vpow2.f32 %v3103_v62  ;;  %v1171_v1 = vpop.f32.mrb[172].mxu0  ;;  %v3380_v57 = vmax.f32 %v6141_v13, %v6147_v59  ;;  %v3389_v18 = vmax.f32 %v6145_v19, %v6150_v8  ;;  %v7551_v15 = vmax.f32 %v5690_v35, %v5694_v29 }
 0x25f   : > { %4552 = vpow2.f32 %v3107_v63  ;;  %v3379_v37 = vmax.f32 %v6130_v50, %v1171_v1  ;;  %v1173_v61 = vpop.f32.mrb[173].mxu0  ;;  %v1890_v53 = vrot.slane %v1889_v38, 2  ;;  %v1899_v63 = vrot.slane %v1898_v33, 2 }
 0x260   : > { %1917 = vmax.xlane.f32.xlu1 %v7550_v5  ;;  %4554 = vpow2.f32 %v3111_v30  ;;  %v3388_v28 = vmax.f32 %v6132_v12, %v1173_v61 }
 0x261   : > { %1439 = vmatmul.mubr.f32.gmra.mrb[22].mxu1 %v5297_v16  ;;  %v3381_v41 = vmax.f32 %v3379_v37, %v3380_v57  ;;  %v1891_v58 = vadd.f32 %v1890_v53, %v1889_v38  ;;  %v1900_v57 = vadd.f32 %v1899_v63, %v1898_v33 }
 0x262   : > { %1920 = vmax.xlane.f32.xlu0 %v7551_v15  ;;  %1443 = vmatprep.mubr.f32.mxu1 %v5308_v24  ;;  %v7554_v15 = vmax.f32 %v5698_v23, %v5700_v40  ;;  %v3390_v16 = vmax.f32 %v3388_v28, %v3389_v18 }
 0x263   : > { %v6166_v62 = vpop.eup %4540  ;;  %v3382_v10 = vrot.slane %v3381_v41, 4  ;;  %v1892_v51 = vrot.slane %v1891_v58, 1  ;;  %v1901_v63 = vrot.slane %v1900_v57, 1 }
 0x264   : > { %7552 = vst [vmem:[#allocation133_spill] sm:$0xff] %v6166_v62  ;;  %v6168_v5 = vpop.eup %4542  ;;  %1923 = vmax.xlane.f32.xlu1 %v7554_v15  ;;  %v3391_v27 = vrot.slane %v3390_v16, 4 }
 0x265   : > { %7553 = vst [vmem:[#allocation134_spill] sm:$0xff] %v6168_v5  ;;  %v6173_v30 = vpop.eup %4544  ;;  %1444 = vmatmul.mubr.f32.gmra.mrb[24].mxu1 %v5302_v21  ;;  %v3113_v24 = vadd.f32 %v6168_v5, %v6166_v62  ;;  %v3383_v48 = vmax.f32 %v3381_v41, %v3382_v10 }
 0x266   : > { %7555 = vst [vmem:[#allocation135_spill] sm:$0xff] %v6173_v30  ;;  %v6178_v32 = vpop.eup %4546  ;;  %v3392_v15 = vmax.f32 %v3390_v16, %v3391_v27 }
 0x267   : > { %7556 = vst [vmem:[#allocation136_spill] sm:$0xff] %v6178_v32  ;;  %v3114_v37 = vadd.f32 %v6173_v30, %v3113_v24  ;;  %v6181_v46 = vpop.eup %4548  ;;  %v3384_v21 = vrot.slane %v3383_v48, 2  ;;  %v1893_v24 = vadd.f32 %v1892_v51, %v1891_v58  ;;  %v1902_v30 = vadd.f32 %v1901_v63, %v1900_v57 }
 0x268   : > { %7557 = vst [vmem:[#allocation137_spill] sm:$0xff] %v6181_v46  ;;  %v6183_v18 = vpop.eup %4550  ;;  %v3393_v53 = vrot.slane %v3392_v15, 2 }
 0x269   : > { %7558 = vst [vmem:[#allocation138_spill] sm:$0xff] %v6183_v18  ;;  %v6186_v28 = vadd.f32 %v6178_v32, %v3114_v37  ;;  %v6188_v7 = vpop.eup %4552  ;;  %v3122_v38 = vadd.f32 %v6183_v18, %v6181_v46  ;;  %v3385_v10 = vmax.f32 %v3383_v48, %v3384_v21  ;;  %4556 = vrcp.f32 %v1893_v24 }
 0x26a   : > { %7560 = vst [vmem:[#allocation140_spill] sm:$0xff] %v6188_v7  ;;  %v6192_v33 = vpop.eup %4554  ;;  %v3394_v27 = vmax.f32 %v3392_v15, %v3393_v53  ;;  %4558 = vrcp.f32 %v1902_v30  ;;  %v7566_v30 = vld [vmem:[#allocation40_spill] sm:$0xff] }
 0x26b   : > { %7559 = vst [vmem:[#allocation139_spill] sm:$0xff] %v6186_v28  ;;  %7561 = vst [vmem:[#allocation141_spill] sm:$0xff] %v6192_v33  ;;  %v3123_v41 = vadd.f32 %v6188_v7, %v3122_v38  ;;  %v3386_v16 = vrot.slane %v3385_v10, 1  ;;  %v7583_v7 = vld [vmem:[#allocation47_spill] sm:$0xff] }
 0x26c   : > { %v3395_v32 = vrot.slane %v3394_v27, 1 }
 0x26d   : > { %v6196_v37 = vadd.f32 %v6192_v33, %v3123_v41  ;;  %v3387_v5 = vmax.f32 %v3385_v10, %v3386_v16  ;;  %v7582_v33 = vld [vmem:[#allocation48_spill] sm:$0xff] }
 0x26e   : > { %v3396_v62 = vmax.f32 %v3394_v27, %v3395_v32 }
 0x26f   : > { %7562 = vst [vmem:[#allocation142_spill] sm:$0xff] %v6196_v37  ;;  %v3397_v28 = vsub.f32 %v6130_v50, %v3387_v5  ;;  %v3399_v18 = vsub.f32 %v6141_v13, %v3387_v5  ;;  %v3401_v46 = vsub.f32 %v1171_v1, %v3387_v5  ;;  %v3403_v48 = vsub.f32 %v6147_v59, %v3387_v5 }
 0x270   : > { %v3398_v21 = vsub.f32 %v6132_v12, %v3396_v62  ;;  %v3400_v15 = vsub.f32 %v6145_v19, %v3396_v62  ;;  %v3402_v38 = vsub.f32 %v1173_v61, %v3396_v62  ;;  %v3404_v57 = vsub.f32 %v6150_v8, %v3396_v62  ;;  %v7564_v61 = vld [vmem:[#allocation49_spill] sm:$0xff] }
 0x271   : > { %v3405_v51 = vmul.f32 1.442695, %v3397_v28  ;;  %v3409_v58 = vmul.f32 1.442695, %v3399_v18  ;;  %v3413_v53 = vmul.f32 1.442695, %v3401_v46 }
 0x272   : > { %v3417_v32 = vmul.f32 1.442695, %v3403_v48  ;;  %v3407_v50 = vmul.f32 1.442695, %v3398_v21  ;;  %v3411_v13 = vmul.f32 1.442695, %v3400_v15 }
 0x273   : > { %4560 = vpow2.f32 %v3405_v51  ;;  %v3415_v1 = vmul.f32 1.442695, %v3402_v38  ;;  %v3419_v59 = vmul.f32 1.442695, %v3404_v57  ;;  %v4557_v12 = vpop.eup %4556  ;;  %v7568_v28 = vld [vmem:[#allocation42_spill] sm:$0xff]  ;;  %v7570_v21 = vld [vmem:[#allocation41_spill] sm:$0xff] }
 0x274   : > { %4562 = vpow2.f32 %v3409_v58  ;;  %v4559_v19 = vpop.eup %4558  ;;  %v6215_v18 = vmul.f32 %v4557_v12, %v7566_v30  ;;  %v6218_v63 = vmul.f32 %v4557_v12, %v7568_v28  ;;  %v7571_v15 = vld [vmem:[#allocation39_spill] sm:$0xff]  ;;  %v7580_v51 = vld [vmem:[#allocation46_spill] sm:$0xff] }
 0x275   : > { %4564 = vpow2.f32 %v3413_v53  ;;  %v6209_v8 = vmul.f32 %v4559_v19, %v5761_v9  ;;  %v6212_v62 = vmul.f32 %v4559_v19, %v7564_v61  ;;  %v7574_v30 = vld [vmem:[#allocation51_spill] sm:$0xff]  ;;  %v7576_v9 = vld [vmem:[#allocation53_spill] sm:$0xff] }
 0x276   : > { %4566 = vpow2.f32 %v3417_v32  ;;  %7567 = vst [vmem:[#allocation40_spill] sm:$0xff] %v6215_v18  ;;  %7569 = vst [vmem:[#allocation42_spill] sm:$0xff] %v6218_v63  ;;  %v6231_v28 = vmul.f32 %v4559_v19, %v7574_v30  ;;  %v6234_v27 = vmul.f32 %v4559_v19, %v7576_v9  ;;  %v7578_v18 = vld [vmem:[#allocation44_spill] sm:$0xff] }
 0x277   : > { %4568 = vpow2.f32 %v3407_v50  ;;  %7563 = vst [vmem:[#allocation143_spill] sm:$0xff] %v6209_v8  ;;  %7565 = vst [vmem:[#allocation49_spill] sm:$0xff] %v6212_v62  ;;  %v6237_v63 = vmul.f32 %v4557_v12, %v7578_v18  ;;  %v6248_v18 = vpop.f32.mrb[2].mxu1 }
 0x278   : > { %4570 = vpow2.f32 %v3411_v13  ;;  %7575 = vst [vmem:[#allocation41_spill] sm:$0xff] %v6231_v28  ;;  %7577 = vst [vmem:[#allocation39_spill] sm:$0xff] %v6234_v27  ;;  %v6252_v42 = vpop.f32.mrb[3].mxu1 }
 0x279   : > { %4572 = vpow2.f32 %v3415_v1  ;;  %v7572_v1 = vld [vmem:[#allocation45_spill] sm:$0xff] }
 0x27a   : > { %4574 = vpow2.f32 %v3419_v59  ;;  %v7573_v59 = vld [vmem:[#allocation43_spill] sm:$0xff]  ;;  %7579 = vst [vmem:[#allocation45_spill] sm:$0xff] %v6237_v63  ;;  %v6256_v63 = vpop.f32.mrb[4].mxu1 }
 0x27d   : > { %v6204_v5 = vpop.eup %4560 }
 0x27e   : > { %v6206_v46 = vpop.eup %4562 }
 0x27f   : > { %v3421_v10 = vadd.f32 %v6206_v46, %v6204_v5  ;;  %v4565_v41 = vpop.eup %4564 }
 0x280   : > { %v4567_v16 = vpop.eup %4566 }
 0x281   : > { %v3422_v24 = vadd.f32 %v4565_v41, %v3421_v10  ;;  %v4569_v48 = vpop.eup %4568 }
 0x282   : > { %v4571_v58 = vpop.eup %4570 }
 0x283   : > { %v3423_v38 = vadd.f32 %v4567_v16, %v3422_v24  ;;  %v3430_v53 = vadd.f32 %v4571_v58, %v4569_v48  ;;  %v4573_v57 = vpop.eup %4572  ;;  %v6240_v24 = vmul.f32 %v4557_v12, %v7580_v51  ;;  %v7584_v12 = vld [vmem:[#allocation52_spill] sm:$0xff]  ;;  %v7585_v51 = vld [vmem:[#allocation50_spill] sm:$0xff] }
 0x284   : > { %v4575_v50 = vpop.eup %4574 }
 0x285   : > { %v3424_v32 = vrot.slane %v3423_v38, 4  ;;  %v3431_v13 = vadd.f32 %v4573_v57, %v3430_v53  ;;  %7581 = vst [vmem:[#allocation43_spill] sm:$0xff] %v6240_v24 }
 0x287   : > { %v3425_v10 = vadd.f32 %v3424_v32, %v3423_v38  ;;  %v3432_v8 = vadd.f32 %v4575_v50, %v3431_v13 }
 0x289   : > { %v3426_v62 = vrot.slane %v3425_v10, 2  ;;  %v3433_v30 = vrot.slane %v3432_v8, 4 }
 0x28b   : > { %v3427_v9 = vadd.f32 %v3426_v62, %v3425_v10  ;;  %v3434_v38 = vadd.f32 %v3433_v30, %v3432_v8  ;;  %v6258_v62 = vpop.f32.mrb[5].mxu1 }
 0x28c   : > { %v6260_v8 = vpop.f32.mrb[6].mxu1 }
 0x28d   : > { %v3428_v32 = vrot.slane %v3427_v9, 1  ;;  %v3435_v37 = vrot.slane %v3434_v38, 2  ;;  %7586 = vst [vmem:[#allocation51_spill] sm:$0xff] %v6260_v8  ;;  %v6262_v30 = vpop.f32.mrb[7].mxu1 }
 0x28e   : > { %7587 = vst [vmem:[#allocation53_spill] sm:$0xff] %v6262_v30  ;;  %v6266_v24 = vpop.f32.mrb[8].mxu1 }
 0x28f   : > { %v3429_v53 = vadd.f32 %v3428_v32, %v3427_v9  ;;  %v3436_v28 = vadd.f32 %v3435_v37, %v3434_v38  ;;  %7588 = vst [vmem:[#allocation44_spill] sm:$0xff] %v6266_v24  ;;  %v6268_v37 = vpop.f32.mrb[9].mxu1 }
 0x290   : > { %7589 = vst [vmem:[#allocation46_spill] sm:$0xff] %v6268_v37  ;;  %v6270_v9 = vpop.f32.mrb[10].mxu1 }
 0x291   : > { %4576 = vrcp.f32 %v3429_v53  ;;  %v3437_v19 = vrot.slane %v3436_v28, 1  ;;  %7590 = vst [vmem:[#allocation48_spill] sm:$0xff] %v6270_v9  ;;  %v6272_v53 = vpop.f32.mrb[11].mxu1 }
 0x292   : > { %7591 = vst [vmem:[#allocation47_spill] sm:$0xff] %v6272_v53  ;;  %v6276_v32 = vpop.f32.mrb[12].mxu1 }
 0x293   : > { %v3438_v10 = vadd.f32 %v3437_v19, %v3436_v28  ;;  %7592 = vst [vmem:[#allocation52_spill] sm:$0xff] %v6276_v32  ;;  %v6278_v28 = vpop.f32.mrb[13].mxu1 }
 0x294   : > { %7593 = vst [vmem:[#allocation50_spill] sm:$0xff] %v6278_v28  ;;  %v6280_v61 = vpop.f32.mrb[14].mxu1 }
 0x295   : > { %4578 = vrcp.f32 %v3438_v10  ;;  %7594 = vst [vmem:[#allocation144_spill] sm:$0xff] %v6280_v61  ;;  %v6282_v13 = vpop.f32.mrb[15].mxu1 }
 0x296   : > { %7595 = vst [vmem:[#allocation145_spill] sm:$0xff] %v6282_v13  ;;  %v6286_v27 = vpop.f32.mrb[16].mxu1 }
 0x297   : > { %7596 = vst [vmem:[#allocation146_spill] sm:$0xff] %v6286_v27  ;;  %v6292_v52 = vpop.f32.mrb[17].mxu1 }
 0x298   : > { %7599 = vst [vmem:[#allocation149_spill] sm:$0xff] %v6292_v52 }
 0x29b   : > { %v4577_v19 = vpop.eup %4576 }
 0x29c   : > { %v6288_v9 = vmul.f32 %v4577_v19, %v4565_v41  ;;  %v6290_v53 = vmul.f32 %v4577_v19, %v4567_v16  ;;  %v6307_v41 = vmul.f32 %v4577_v19, %v6204_v5  ;;  %v6310_v16 = vmul.f32 %v4577_v19, %v6206_v46 }
 0x29e   : > { %7597 = vst [vmem:[#allocation147_spill] sm:$0xff] %v6288_v9  ;;  %7598 = vst [vmem:[#allocation148_spill] sm:$0xff] %v6290_v53 }
 0x29f   : > { %v4579_v32 = vpop.eup %4578  ;;  %7604 = vst [vmem:[#allocation154_spill] sm:$0xff] %v6307_v41  ;;  %7605 = vst [vmem:[#allocation155_spill] sm:$0xff] %v6310_v16  ;;  %v7644_v16 = vld [vmem:[#allocation67_spill] sm:$0xff] }
 0x2a0   : > { %v6296_v28 = vmul.f32 %v4579_v32, %v4573_v57  ;;  %v6298_v61 = vmul.f32 %v4579_v32, %v4575_v50  ;;  %v6302_v10 = vmul.f32 %v4579_v32, %v4569_v48  ;;  %v6304_v27 = vmul.f32 %v4579_v32, %v4571_v58 }
 0x2a1   : > { %v7385_v50 = vmov 0.0|0.0   ;;  %v7606_v48 = vmov 0.0  }
 0x2a2   : > { %7600 = vst [vmem:[#allocation150_spill] sm:$0xff] %v6296_v28  ;;  %7601 = vst [vmem:[#allocation151_spill] sm:$0xff] %v6298_v61  ;;  %4176 = vmatprep.subr.bf16.mxu1 %v7385_v50  ;;  %4088 = vmatprep.mubr.msk.f32.mxu1 %vm4815_vm2, %v7606_v48 }
 0x2a3   : > { %7602 = vst [vmem:[#allocation152_spill] sm:$0xff] %v6302_v10  ;;  %7603 = vst [vmem:[#allocation153_spill] sm:$0xff] %v6304_v27  ;;  %v7632_v10 = vld [vmem:[#allocation73_spill] sm:$0xff]  ;;  %v7634_v27 = vld [vmem:[#allocation95_spill] sm:$0xff] }
 0x2e0   : > { %v1642_v58 = vpop.xlane.xlu0 %1641 }
 0x2e1   : > { %4580 = vrcp.f32 %v1642_v58 }
 0x2e5   : > { %v1645_v5 = vpop.xlane.xlu1 %1644 }
 0x2e6   : > { %v1648_v32 = vpop.xlane.xlu0 %1647  ;;  %4582 = vrcp.f32 %v1645_v5 }
 0x2e7   : > { %4584 = vrcp.f32 %v1648_v32 }
 0x2e9   : > { %v1651_v46 = vpop.xlane.xlu1 %1650 }
 0x2ea   : > { %4586 = vrcp.f32 %v1651_v46 }
 0x2eb   : > { %v1915_v19 = vpop.xlane.xlu0 %1914  ;;  %v4581_v38 = vpop.eup %4580 }
 0x2ec   : > { %v1925_v13 = vsub.f32 %v5680_v44, %v1915_v19  ;;  %v1926_v57 = vsub.f32 %v5682_v60, %v1915_v19  ;;  %v6326_v46 = vmul.f32 %v4581_v38, %v6071_v4 }
 0x2ed   : > { %v1918_v53 = vpop.xlane.xlu1 %1917 }
 0x2ee   : > { %v1933_v9 = vmul.f32 1.442695, %v1925_v13  ;;  %v1935_v50 = vmul.f32 1.442695, %v1926_v57  ;;  %v1927_v28 = vsub.f32 %v5684_v0, %v1918_v53  ;;  %v1928_v61 = vsub.f32 %v5688_v6, %v1918_v53 }
 0x2ef   : > { %v1921_v58 = vpop.xlane.xlu0 %1920  ;;  %v6329_v13 = vmul.f32 %v4581_v38, %v6069_v55 }
 0x2f0   : > { %4588 = vpow2.f32 %v1933_v9  ;;  %v1929_v5 = vsub.f32 %v5690_v35, %v1921_v58  ;;  %v1930_v32 = vsub.f32 %v5694_v29, %v1921_v58  ;;  %v4583_v44 = vpop.eup %4582  ;;  %v1937_v60 = vmul.f32 1.442695, %v1927_v28 }
 0x2f1   : > { %4590 = vpow2.f32 %v1935_v50  ;;  %v1939_v19 = vmul.f32 1.442695, %v1928_v61  ;;  %v4585_v57 = vpop.eup %4584  ;;  %v1924_v6 = vpop.xlane.xlu1 %1923  ;;  %v1663_v9 = vmul.f32 %v4583_v44, %v6085_v31  ;;  %v1662_v35 = vmul.f32 %v4583_v44, %v6081_v47 }
 0x2f2   : > { %v1941_v0 = vmul.f32 1.442695, %v1929_v5  ;;  %v1943_v41 = vmul.f32 1.442695, %v1930_v32  ;;  %4592 = vpow2.f32 %v1937_v60  ;;  %v1931_v29 = vsub.f32 %v5698_v23, %v1924_v6 }
 0x2f3   : > { %v1932_v4 = vsub.f32 %v5700_v40, %v1924_v6  ;;  %4594 = vpow2.f32 %v1939_v19  ;;  %v4182_v53 = vpack.c.bf16 %v1663_v9, %v6326_v46  ;;  %v4184_v61 = vpack.c.bf16 %v1662_v35, %v6329_v13  ;;  %v1753_v35 = vld [vmem:[%s7289_s2] sm:$0xf] }
 0x2f4   : > { %v4587_v55 = vpop.eup %4586  ;;  %4596 = vpow2.f32 %v1941_v0  ;;  %v1945_v38 = vmul.f32 1.442695, %v1931_v29  ;;  %v1665_v50 = vmul.f32 %v4585_v57, %v6093_v54  ;;  %v1664_v47 = vmul.f32 %v4585_v57, %v6079_v14 }
 0x2f5   : > { %v1947_v28 = vmul.f32 1.442695, %v1932_v4  ;;  %4598 = vpow2.f32 %v1943_v41  ;;  %v1667_v31 = vmul.f32 %v4587_v55, %v6110_v39  ;;  %v1666_v23 = vmul.f32 %v4587_v55, %v6103_v17 }
 0x2f6   : > { %4600 = vpow2.f32 %v1945_v38  ;;  %v7607_v57 = vmax.f32 %v7571_v15, %v7570_v21  ;;  %v7608_v0 = vmax.f32 %v7573_v59, %v7572_v1  ;;  %v7609_v6 = vmax.f32 %v7583_v7, %v7582_v33 }
 0x2f7   : > { %4602 = vpow2.f32 %v1947_v28  ;;  %v4186_v40 = vpack.c.bf16 %v1667_v31, %v1665_v50  ;;  %v4188_v58 = vpack.c.bf16 %v1666_v23, %v1664_v47  ;;  %v7610_v9 = vmax.f32 %v7585_v51, %v7584_v12 }
 0x2f8   : > { %v7611_v31 = vmov 0.0|0.0  }
 0x2fa   : > { %v6341_v5 = vpop.eup %4588 }
 0x2fb   : > { %v6343_v32 = vpop.eup %4590 }
 0x2fc   : > { %v1949_v46 = vadd.f32 %v6343_v32, %v6341_v5  ;;  %v6347_v44 = vpop.eup %4592 }
 0x2fd   : > { %v6349_v54 = vpop.eup %4594 }
 0x2fe   : > { %1950 = vadd.xlane.f32.xlu0 %v1949_v46  ;;  %v6351_v39 = vpop.eup %4596  ;;  %v1952_v14 = vadd.f32 %v6349_v54, %v6347_v44 }
 0x2ff   : > { %v6355_v17 = vpop.eup %4598 }
 0x300   : > { %v6357_v41 = vpop.eup %4600  ;;  %v1955_v60 = vadd.f32 %v6355_v17, %v6351_v39  ;;  %1953 = vadd.xlane.f32.xlu1 %v1952_v14 }
 0x301   : > { %v6361_v19 = vpop.eup %4602 }
 0x302   : > { %1956 = vadd.xlane.f32.xlu0 %v1955_v60  ;;  %v1958_v13 = vadd.f32 %v6361_v19, %v6357_v41  ;;  %v1449_v60 = vld [vmem:[%s7289_s2] sm:$0xf] }
 0x304   : > { %1959 = vadd.xlane.f32.xlu1 %v1958_v13  ;;  %v7612_v13 = vld [vmem:[#allocation24_spill] sm:$0xff] }
 0x308   : > { %2223 = vmax.xlane.f32.xlu1 %v7607_v57  ;;  %v7613_v57 = vld [vmem:[#allocation63_spill] sm:$0xff] }
 0x30c   : > { %2226 = vmax.xlane.f32.xlu1 %v7608_v0  ;;  %v7614_v0 = vld [vmem:[#allocation62_spill] sm:$0xff] }
 0x310   : > { %2229 = vmax.xlane.f32.xlu1 %v7609_v6  ;;  %v7629_v6 = vld [vmem:[#allocation68_spill] sm:$0xff] }
 0x314   : > { %2232 = vmax.xlane.f32.xlu1 %v7610_v9  ;;  %v7615_v9 = vld [vmem:[#allocation23_spill] sm:$0xff] }
 0x318   : > { %1755 = vrot.lane.b32.xlu0 %v1753_v35, %s4816_s8  ;;  %v7616_v35 = vld [vmem:[#allocation76_spill] sm:$0xff] }
 0x32c   : > { %v1430_v29 = vpop.f32.mrb[18].mxu1 }
 0x32d   : > { %v1432_v4 = vpop.f32.mrb[19].mxu1 }
 0x32e   : > { %v7617_v4 = vld [vmem:[#allocation26_spill] sm:$0xff] }
 0x330   : > { %v1435_v55 = vpop.f32.mrb[20].mxu1 }
 0x331   : > { %v4177_v38 = vpack.c.bf16 %v1435_v55, %v1430_v29  ;;  %v1437_v28 = vpop.f32.mrb[21].mxu1  ;;  %v2197_v29 = vrot.slane %v7616_v35, 4  ;;  %v7618_v55 = vld [vmem:[#allocation86_spill] sm:$0xff] }
 0x333   : > { %4178 = vmatpush3.bf16.msra.mxu1 %v4177_v38  ;;  %v7619_v38 = vld [vmem:[#allocation25_spill] sm:$0xff]  ;;  %v2198_v28 = vadd.f32 %v2197_v29, %v7616_v35 }
 0x334   : > { %v1440_v50 = vpop.f32.mrb[22].mxu1  ;;  %4179 = vmatprep.subr.bf16.mxu1 %v7611_v31 }
 0x335   : > { %v1442_v47 = vpop.f32.mrb[23].mxu1 }
 0x336   : > { %v7622_v47 = vld [vmem:[#allocation30_spill] sm:$0xff] }
 0x338   : > { %v1445_v23 = vpop.f32.mrb[24].mxu1 }
 0x339   : > { %v4180_v46 = vpack.c.bf16 %v1445_v23, %v1440_v50  ;;  %v1447_v14 = vpop.f32.mrb[25].mxu1  ;;  %v7621_v50 = vld [vmem:[#allocation27_spill] sm:$0xff] }
 0x33b   : > { %4181 = vmatpush3.bf16.msra.mxu1 %v4180_v46  ;;  %v7623_v46 = vld [vmem:[#allocation29_spill] sm:$0xff] }
 0x33c   : > { %4183 = vmatprep.subr.bf16.mxu1 %v4182_v53  ;;  %v2206_v53 = vrot.slane %v7618_v55, 4 }
 0x33e   : > { %4089 = vmatmul.mubr.msk.f32.vlgmr.msra.gmra.mrb[26].mxu1 %vm1450_vm3, %v1449_v60 }
 0x33f   : > { %1732 = vmatprep.mubr.f32.mxu1 %v7612_v13 }
 0x344   : > { %4185 = vmatpush1.bf16.xpose.msra.mxu1 %v4184_v61  ;;  %v7620_v61 = vld [vmem:[#allocation28_spill] sm:$0xff] }
 0x345   : > { %4187 = vmatprep.subr.bf16.mxu1 %v4186_v40  ;;  %v2207_v40 = vadd.f32 %v2206_v53, %v7618_v55  ;;  %v7626_v53 = vld [vmem:[#allocation89_spill] sm:$0xff] }
 0x347   : > { %v2208_v23 = vrot.slane %v2207_v40, 2 }
 0x349   : > { %v2209_v60 = vadd.f32 %v2208_v23, %v2207_v40  ;;  %v7633_v40 = vld [vmem:[#allocation71_spill] sm:$0xff]  ;;  %v7646_v23 = vld [vmem:[#allocation80_spill] sm:$0xff] }
 0x34c   : > { %4189 = vmatpush1.bf16.xpose.msra.mxu1 %v4188_v58  ;;  %v2199_v58 = vrot.slane %v2198_v28, 2 }
 0x34d   : > { %4190 = vmatprep.subr.bf16.mxu1 %v7611_v31 }
 0x34e   : > { %v2200_v14 = vadd.f32 %v2199_v58, %v2198_v28  ;;  %v7630_v28 = vld [vmem:[#allocation91_spill] sm:$0xff]  ;;  %v7631_v58 = vld [vmem:[#allocation90_spill] sm:$0xff] }
 0x350   : > { %v2201_v13 = vrot.slane %v2200_v14, 1 }
 0x352   : > { %v2202_v35 = vadd.f32 %v2201_v13, %v2200_v14  ;;  %v7635_v14 = vld [vmem:[#allocation93_spill] sm:$0xff]  ;;  %v7636_v13 = vld [vmem:[#allocation99_spill] sm:$0xff] }
 0x353   : > { %1733 = vmatmul.mubr.f32.vlgmr.msra.gmra.mrb[28].mxu1 %v7615_v9  ;;  %v2210_v9 = vrot.slane %v2209_v60, 1 }
 0x354   : > { %1737 = vmatprep.mubr.f32.mxu1 %v7617_v4  ;;  %v7624_v4 = vld [vmem:[#allocation66_spill] sm:$0xff]  ;;  %4604 = vrcp.f32 %v2202_v35 }
 0x355   : > { %v2211_v29 = vadd.f32 %v2210_v9, %v2209_v60  ;;  %v7637_v9 = vld [vmem:[#allocation97_spill] sm:$0xff] }
 0x357   : > { %1738 = vmatmul.mubr.f32.gmra.mrb[30].mxu1 %v7619_v38  ;;  %v7625_v38 = vld [vmem:[#allocation64_spill] sm:$0xff]  ;;  %4606 = vrcp.f32 %v2211_v29  ;;  %v7640_v29 = vld [vmem:[#allocation78_spill] sm:$0xff] }
 0x358   : > { %1742 = vmatprep.mubr.f32.mxu1 %v7620_v61  ;;  %v7627_v61 = vld [vmem:[#allocation88_spill] sm:$0xff] }
 0x35b   : > { %1743 = vmatmul.mubr.f32.gmra.mrb[32].mxu1 %v7621_v50  ;;  %v7638_v50 = vld [vmem:[#allocation74_spill] sm:$0xff] }
 0x35c   : > { %1747 = vmatprep.mubr.f32.mxu1 %v7622_v47  ;;  %v7628_v47 = vld [vmem:[#allocation69_spill] sm:$0xff] }
 0x35e   : > { %v4605_v52 = vpop.eup %4604 }
 0x35f   : > { %1748 = vmatmul.mubr.f32.gmra.mrb[34].mxu1 %v7623_v46  ;;  %v7642_v46 = vld [vmem:[#allocation65_spill] sm:$0xff]  ;;  %v6427_v20 = vmul.f32 %v4605_v52, %v7644_v16 }
 0x360   : > { %4099 = vmatprep.mubr.msk.f32.mxu1 %vm4815_vm2, %v7606_v48  ;;  %v6424_v2 = vmul.f32 %v4605_v52, %v7642_v46  ;;  %v7652_v46 = vld [vmem:[#allocation72_spill] sm:$0xff] }
 0x361   : > { %v4607_v34 = vpop.eup %4606  ;;  %7645 = vst [vmem:[#allocation23_spill] sm:$0xff] %v6427_v20  ;;  %v6443_v24 = vmul.f32 %v4605_v52, %v7652_v46 }
 0x362   : > { %v6418_v35 = vmul.f32 %v4607_v34, %v7638_v50  ;;  %v6421_v43 = vmul.f32 %v4607_v34, %v7640_v29  ;;  %7643 = vst [vmem:[#allocation62_spill] sm:$0xff] %v6424_v2  ;;  %v6434_v11 = vmul.f32 %v4607_v34, %v7646_v23  ;;  %v7648_v50 = vld [vmem:[#allocation82_spill] sm:$0xff] }
 0x363   : > { %v6437_v56 = vmul.f32 %v4607_v34, %v7648_v50  ;;  %v7650_v29 = vld [vmem:[#allocation70_spill] sm:$0xff]  ;;  %7653 = vst [vmem:[#allocation25_spill] sm:$0xff] %v6443_v24 }
 0x364   : > { %7639 = vst [vmem:[#allocation24_spill] sm:$0xff] %v6418_v35  ;;  %7641 = vst [vmem:[#allocation63_spill] sm:$0xff] %v6421_v43  ;;  %v6440_v37 = vmul.f32 %v4605_v52, %v7650_v29 }
 0x365   : > { %7647 = vst [vmem:[#allocation76_spill] sm:$0xff] %v6434_v11  ;;  %7649 = vst [vmem:[#allocation26_spill] sm:$0xff] %v6437_v56 }
 0x366   : > { %7651 = vst [vmem:[#allocation86_spill] sm:$0xff] %v6440_v37 }
 0x38d   : > { %v6449_v35 = vpop.xlane.xlu1 %1953 }
 0x391   : > { %v6451_v55 = vpop.xlane.xlu1 %1959 }
 0x395   : > { %v2224_v23 = vpop.xlane.xlu1 %2223 }
 0x396   : > { %v2234_v34 = vsub.f32 %v7571_v15, %v2224_v23  ;;  %v2235_v50 = vsub.f32 %v7570_v21, %v2224_v23 }
 0x398   : > { %v2242_v29 = vmul.f32 1.442695, %v2234_v34  ;;  %v2244_v2 = vmul.f32 1.442695, %v2235_v50 }
 0x399   : > { %v2227_v20 = vpop.xlane.xlu1 %2226 }
 0x39a   : > { %4608 = vpow2.f32 %v2242_v29  ;;  %v2236_v52 = vsub.f32 %v7573_v59, %v2227_v20  ;;  %v2237_v46 = vsub.f32 %v7572_v1, %v2227_v20 }
 0x39b   : > { %4610 = vpow2.f32 %v2244_v2 }
 0x39c   : > { %v2246_v16 = vmul.f32 1.442695, %v2236_v52  ;;  %v2248_v60 = vmul.f32 1.442695, %v2237_v46  ;;  %v7654_v52 = vmax.f32 %v7625_v38, %v7624_v4  ;;  %v7655_v46 = vmax.f32 %v7629_v6, %v7628_v47 }
 0x39d   : > { %v2230_v37 = vpop.xlane.xlu1 %2229 }
 0x39e   : > { %4612 = vpow2.f32 %v2246_v16  ;;  %v2238_v24 = vsub.f32 %v7583_v7, %v2230_v37  ;;  %v2239_v11 = vsub.f32 %v7582_v33, %v2230_v37 }
 0x39f   : > { %4614 = vpow2.f32 %v2248_v60 }
 0x3a0   : > { %v2250_v15 = vmul.f32 1.442695, %v2238_v24  ;;  %v2252_v21 = vmul.f32 1.442695, %v2239_v11 }
 0x3a1   : > { %v2233_v23 = vpop.xlane.xlu1 %2232 }
 0x3a2   : > { %4616 = vpow2.f32 %v2250_v15  ;;  %v2240_v34 = vsub.f32 %v7585_v51, %v2233_v23  ;;  %v2241_v59 = vsub.f32 %v7584_v12, %v2233_v23  ;;  %v7656_v15 = vmax.f32 %v7633_v40, %v7632_v10 }
 0x3a3   : > { %4618 = vpow2.f32 %v2252_v21  ;;  %v2062_v21 = vld [vmem:[%s7289_s2] sm:$0xf]  ;;  %v7657_v23 = vmax.f32 %v7614_v0, %v7613_v57 }
 0x3a4   : > { %v6461_v20 = vpop.eup %4608  ;;  %v2254_v2 = vmul.f32 1.442695, %v2240_v34  ;;  %v2256_v1 = vmul.f32 1.442695, %v2241_v59  ;;  %v7658_v34 = vmax.f32 %v7627_v61, %v7626_v53  ;;  %v7659_v59 = vmax.f32 %v7631_v58, %v7630_v28 }
 0x3a5   : > { %v6463_v50 = vpop.eup %4610 }
 0x3a6   : > { %4620 = vpow2.f32 %v2254_v2  ;;  %v2258_v7 = vadd.f32 %v6463_v50, %v6461_v20  ;;  %v7660_v2 = vmax.f32 %v7635_v14, %v7634_v27 }
 0x3a7   : > { %4622 = vpow2.f32 %v2256_v1  ;;  %v7661_v1 = vmax.f32 %v7637_v9, %v7636_v13 }
 0x3a8   : > { %v6467_v33 = vpop.eup %4612  ;;  %2259 = vadd.xlane.f32.xlu1 %v2258_v7  ;;  %4624 = vrcp.f32 %v6449_v35 }
 0x3a9   : > { %v6469_v11 = vpop.eup %4614 }
 0x3aa   : > { %v2261_v24 = vadd.f32 %v6469_v11, %v6467_v33 }
 0x3ac   : > { %v6473_v12 = vpop.eup %4616  ;;  %2262 = vadd.xlane.f32.xlu1 %v2261_v24 }
 0x3ad   : > { %v6475_v51 = vpop.eup %4618 }
 0x3ae   : > { %v2264_v37 = vadd.f32 %v6475_v51, %v6473_v12 }
 0x3b0   : > { %v6479_v60 = vpop.eup %4620  ;;  %2265 = vadd.xlane.f32.xlu0 %v2264_v37  ;;  %v7662_v37 = vld [vmem:[#allocation115_spill] sm:$0xff] }
 0x3b1   : > { %v6481_v16 = vpop.eup %4622 }
 0x3b2   : > { %v2267_v29 = vadd.f32 %v6481_v16, %v6479_v60 }
 0x3b4   : > { %2268 = vadd.xlane.f32.xlu1 %v2267_v29  ;;  %2535 = vmax.xlane.f32.xlu0 %v7654_v52  ;;  %v7663_v29 = vld [vmem:[#allocation114_spill] sm:$0xff]  ;;  %v4625_v52 = vpop.eup %4624 }
 0x3b8   : > { %2538 = vmax.xlane.f32.xlu0 %v7655_v46  ;;  %v7664_v46 = vld [vmem:[#allocation116_spill] sm:$0xff] }
 0x3bc   : > { %2541 = vmax.xlane.f32.xlu0 %v7656_v15 }
 0x3c5   : > { %2064 = vrot.lane.b32.xlu1 %v2062_v21, %s4817_s13 }
 0x3e9   : > { %2532 = vmax.xlane.f32.xlu1 %v7657_v23  ;;  %v1951_v23 = vpop.xlane.xlu0 %1950 }
 0x3ea   : > { %4626 = vrcp.f32 %v1951_v23  ;;  %v1972_v23 = vmul.f32 %v4625_v52, %v6349_v54 }
 0x3eb   : > { %4628 = vrcp.f32 %v6451_v55 }
 0x3ed   : > { %2834 = vmax.xlane.f32.xlu1 %v7658_v34 }
 0x3f1   : > { %2837 = vmax.xlane.f32.xlu1 %v7659_v59 }
 0x3f4   : > { %v4627_v21 = vpop.eup %4626 }
 0x3f5   : > { %2840 = vmax.xlane.f32.xlu1 %v7660_v2  ;;  %v1970_v34 = vmul.f32 %v4627_v21, %v6343_v32  ;;  %v4629_v55 = vpop.eup %4628 }
 0x3f6   : > { %v1976_v54 = vmul.f32 %v4629_v55, %v6361_v19 }
 0x3f7   : > { %v4196_v8 = vpack.c.bf16 %v1972_v23, %v1970_v34 }
 0x3f9   : > { %2843 = vmax.xlane.f32.xlu1 %v7661_v1 }
 0x411   : > { %v1520_v7 = vpop.f32.mrb[26].mxu1 }
 0x412   : > { %1533 = vst.msk [vmem:[#allocation3] sm:$0xf] %vm1532_vm4, %v1520_v7  ;;  %v4090_v24 = vpop.f32.mrb[27].mxu1  ;;  %v1957_v7 = vpop.xlane.xlu0 %1956 }
 0x413   : > { %4630 = vrcp.f32 %v1957_v7  ;;  %v1971_v7 = vmul.f32 %v4625_v52, %v6347_v44 }
 0x426   : > { %v1734_v59 = vpop.f32.mrb[28].mxu1 }
 0x427   : > { %v1736_v2 = vpop.f32.mrb[29].mxu1 }
 0x42a   : > { %v1739_v1 = vpop.f32.mrb[30].mxu1 }
 0x42b   : > { %v4191_v24 = vpack.c.bf16 %v1739_v1, %v1734_v59  ;;  %v1741_v56 = vpop.f32.mrb[31].mxu1  ;;  %v4631_v1 = vpop.eup %4630 }
 0x42c   : > { %v1756_v56 = vpop.permute.xlu0 %1755  ;;  %v1973_v52 = vmul.f32 %v4631_v1, %v6351_v39 }
 0x42d   : > { %4192 = vmatpush3.bf16.msra.mxu1 %v4191_v24 }
 0x42e   : > { %v1744_v15 = vpop.f32.mrb[32].mxu1  ;;  %4193 = vmatprep.subr.bf16.mxu1 %v7611_v31 }
 0x42f   : > { %v1746_v35 = vpop.f32.mrb[33].mxu1 }
 0x430   : > { %v7665_v35 = vld [vmem:[#allocation32_spill] sm:$0xff] }
 0x432   : > { %v1749_v43 = vpop.f32.mrb[34].mxu1 }
 0x433   : > { %v4194_v2 = vpack.c.bf16 %v1749_v43, %v1744_v15  ;;  %v1751_v30 = vpop.f32.mrb[35].mxu1  ;;  %v1969_v43 = vmul.f32 %v4627_v21, %v6341_v5 }
 0x434   : > { %v1974_v30 = vmul.f32 %v4631_v1, %v6355_v17 }
 0x435   : > { %v2260_v59 = vpop.xlane.xlu1 %2259  ;;  %4195 = vmatpush3.bf16.msra.mxu1 %v4194_v2  ;;  %v4198_v32 = vpack.c.bf16 %v1971_v7, %v1969_v43  ;;  %v7667_v7 = vld [vmem:[#allocation104_spill] sm:$0xff] }
 0x436   : > { %4197 = vmatprep.subr.bf16.mxu1 %v4196_v8  ;;  %4632 = vrcp.f32 %v2260_v59  ;;  %v4200_v34 = vpack.c.bf16 %v1976_v54, %v1974_v30  ;;  %v1975_v8 = vmul.f32 %v4629_v55, %v6357_v41  ;;  %v7666_v55 = vld [vmem:[#allocation31_spill] sm:$0xff]  ;;  %v7669_v54 = vld [vmem:[#allocation112_spill] sm:$0xff] }
 0x437   : > { %v2515_v43 = vrot.slane %v7669_v54, 4 }
 0x438   : > { %4100 = vmatmul.mubr.msk.f32.vlgmr.msra.gmra.mrb[36].mxu1 %vm1450_vm3, %v1756_v56  ;;  %v4202_v19 = vpack.c.bf16 %v1975_v8, %v1973_v52  ;;  %v7673_v8 = vld [vmem:[#allocation38_spill] sm:$0xff] }
 0x439   : > { %v2263_v24 = vpop.xlane.xlu1 %2262  ;;  %2041 = vmatprep.mubr.f32.mxu1 %v7665_v35  ;;  %v7668_v35 = vld [vmem:[#allocation34_spill] sm:$0xff] }
 0x43a   : > { %4634 = vrcp.f32 %v2263_v24  ;;  %v2506_v24 = vrot.slane %v7667_v7, 4 }
 0x43d   : > { %v2266_v15 = vpop.xlane.xlu0 %2265 }
 0x43e   : > { %4199 = vmatpush1.bf16.xpose.msra.mxu1 %v4198_v32  ;;  %4636 = vrcp.f32 %v2266_v15  ;;  %v7671_v32 = vld [vmem:[#allocation36_spill] sm:$0xff]  ;;  %v7672_v15 = vld [vmem:[#allocation35_spill] sm:$0xff] }
 0x43f   : > { %4201 = vmatprep.subr.bf16.mxu1 %v4200_v34 }
 0x440   : > { %v4633_v44 = vpop.eup %4632 }
 0x441   : > { %v2269_v23 = vpop.xlane.xlu1 %2268  ;;  %v6536_v59 = vmul.f32 %v4633_v44, %v6463_v50  ;;  %v6542_v17 = vmul.f32 %v4633_v44, %v6461_v20  ;;  %v7674_v44 = vld [vmem:[#allocation37_spill] sm:$0xff] }
 0x442   : > { %4638 = vrcp.f32 %v2269_v23 }
 0x444   : > { %v4635_v2 = vpop.eup %4634 }
 0x445   : > { %v6539_v5 = vmul.f32 %v4635_v2, %v6469_v11  ;;  %v6545_v21 = vmul.f32 %v4635_v2, %v6467_v33 }
 0x446   : > { %4203 = vmatpush1.bf16.xpose.msra.mxu1 %v4202_v19 }
 0x447   : > { %4204 = vmatprep.subr.bf16.mxu1 %v7611_v31 }
 0x448   : > { %v4637_v50 = vpop.eup %4636 }
 0x449   : > { %v6554_v11 = vmul.f32 %v4637_v50, %v6475_v51  ;;  %v6560_v33 = vmul.f32 %v4637_v50, %v6473_v12  ;;  %v2507_v12 = vadd.f32 %v2506_v24, %v7667_v7  ;;  %v2536_v7 = vpop.xlane.xlu0 %2535 }
 0x44a   : > { %v2545_v24 = vsub.f32 %v7625_v38, %v2536_v7  ;;  %v7679_v38 = vld [vmem:[#allocation94_spill] sm:$0xff] }
 0x44b   : > { %v2508_v34 = vrot.slane %v2507_v12, 2 }
 0x44c   : > { %v4639_v56 = vpop.eup %4638 }
 0x44d   : > { %2042 = vmatmul.mubr.f32.vlgmr.msra.gmra.mrb[38].mxu1 %v7666_v55  ;;  %v6557_v20 = vmul.f32 %v4639_v56, %v6481_v16  ;;  %v6563_v1 = vmul.f32 %v4639_v56, %v6479_v60  ;;  %v7670_v16 = vld [vmem:[#allocation33_spill] sm:$0xff]  ;;  %v2516_v60 = vadd.f32 %v2515_v43, %v7669_v54  ;;  %v2509_v52 = vadd.f32 %v2508_v34, %v2507_v12  ;;  %v6582_v43 = vpop.permute.xlu1 %2064 }
 0x44e   : > { %2046 = vmatprep.mubr.f32.mxu1 %v7668_v35  ;;  %v2539_v35 = vpop.xlane.xlu0 %2538  ;;  %v2546_v12 = vsub.f32 %v7624_v4, %v2536_v7 }
 0x44f   : > { %v2517_v23 = vrot.slane %v2516_v60, 2  ;;  %v2510_v19 = vrot.slane %v2509_v52, 1 }
 0x451   : > { %2047 = vmatmul.mubr.f32.gmra.mrb[40].mxu1 %v7670_v16  ;;  %v2518_v2 = vadd.f32 %v2517_v23, %v2516_v60  ;;  %v2511_v56 = vadd.f32 %v2510_v19, %v2509_v52  ;;  %v7675_v60 = vld [vmem:[#allocation101_spill] sm:$0xff]  ;;  %v2557_v19 = vmul.f32 1.442695, %v2546_v12 }
 0x452   : > { %2051 = vmatprep.mubr.f32.mxu1 %v7671_v32  ;;  %v2547_v32 = vsub.f32 %v7629_v6, %v2539_v35 }
 0x453   : > { %v2519_v50 = vrot.slane %v2518_v2, 1  ;;  %4640 = vrcp.f32 %v2511_v56  ;;  %v2548_v56 = vsub.f32 %v7628_v47, %v2539_v35 }
 0x454   : > { %v2559_v4 = vmul.f32 1.442695, %v2547_v32 }
 0x455   : > { %2052 = vmatmul.mubr.f32.gmra.mrb[42].mxu1 %v7672_v15  ;;  %v2520_v55 = vadd.f32 %v2519_v50, %v2518_v2  ;;  %v2555_v15 = vmul.f32 1.442695, %v2545_v24  ;;  %v2561_v47 = vmul.f32 1.442695, %v2548_v56 }
 0x456   : > { %2056 = vmatprep.mubr.f32.mxu1 %v7673_v8  ;;  %v7676_v8 = vld [vmem:[#allocation103_spill] sm:$0xff] }
 0x457   : > { %4642 = vrcp.f32 %v2520_v55  ;;  %v2542_v55 = vpop.xlane.xlu0 %2541 }
 0x458   : > { %4644 = vpow2.f32 %v2555_v15  ;;  %v2549_v12 = vsub.f32 %v7633_v40, %v2542_v55  ;;  %v2550_v35 = vsub.f32 %v7632_v10, %v2542_v55 }
 0x459   : > { %2057 = vmatmul.mubr.f32.gmra.mrb[44].mxu1 %v7674_v44  ;;  %v7677_v44 = vld [vmem:[#allocation92_spill] sm:$0xff]  ;;  %4646 = vpow2.f32 %v2557_v19 }
 0x45a   : > { %4110 = vmatprep.mubr.msk.f32.mxu1 %vm4815_vm2, %v7606_v48  ;;  %4648 = vpow2.f32 %v2559_v4  ;;  %v7684_v19 = vld [vmem:[#allocation96_spill] sm:$0xff]  ;;  %v2563_v56 = vmul.f32 1.442695, %v2549_v12  ;;  %v2565_v55 = vmul.f32 1.442695, %v2550_v35 }
 0x45d   : > { %v4641_v54 = vpop.eup %4640 }
 0x45e   : > { %v6593_v52 = vmul.f32 %v4641_v54, %v7677_v44  ;;  %v6596_v2 = vmul.f32 %v4641_v54, %v7679_v38 }
 0x460   : > { %7678 = vst [vmem:[#allocation28_spill] sm:$0xff] %v6593_v52 }
 0x461   : > { %v4643_v16 = vpop.eup %4642 }
 0x462   : > { %v6587_v34 = vmul.f32 %v4643_v16, %v7675_v60  ;;  %v6590_v23 = vmul.f32 %v4643_v16, %v7676_v8 }
 0x476   : > { %v2533_v50 = vpop.xlane.xlu1 %2532 }
 0x477   : > { %v2543_v24 = vsub.f32 %v7614_v0, %v2533_v50  ;;  %v2544_v60 = vsub.f32 %v7613_v57, %v2533_v50  ;;  %v7680_v0 = vld [vmem:[#allocation106_spill] sm:$0xff]  ;;  %v7682_v57 = vld [vmem:[#allocation108_spill] sm:$0xff]  ;;  %v6616_v50 = vmul.f32 %v4641_v54, %v7684_v19 }
 0x478   : > { %v6610_v6 = vmul.f32 %v4643_v16, %v7680_v0  ;;  %v6613_v15 = vmul.f32 %v4643_v16, %v7682_v57 }
 0x479   : > { %v2551_v8 = vmul.f32 1.442695, %v2543_v24  ;;  %v2553_v44 = vmul.f32 1.442695, %v2544_v60  ;;  %7685 = vst [vmem:[#allocation29_spill] sm:$0xff] %v6616_v50  ;;  %v7686_v24 = vld [vmem:[#allocation98_spill] sm:$0xff] }
 0x47a   : > { %v2835_v38 = vpop.xlane.xlu1 %2834  ;;  %7681 = vst [vmem:[#allocation27_spill] sm:$0xff] %v6610_v6  ;;  %7683 = vst [vmem:[#allocation30_spill] sm:$0xff] %v6613_v15  ;;  %v6619_v10 = vmul.f32 %v4641_v54, %v7686_v24  ;;  %v6627_v54 = vpop.eup %4644 }
 0x47b   : > { %4650 = vpow2.f32 %v2551_v8  ;;  %v2845_v32 = vsub.f32 %v7627_v61, %v2835_v38  ;;  %v2846_v7 = vsub.f32 %v7626_v53, %v2835_v38  ;;  %v6629_v38 = vpop.eup %4646 }
 0x47c   : > { %4652 = vpow2.f32 %v2553_v44  ;;  %7687 = vst [vmem:[#allocation66_spill] sm:$0xff] %v6619_v10  ;;  %v2570_v24 = vadd.f32 %v6629_v38, %v6627_v54 }
 0x47d   : > { %v2853_v40 = vmul.f32 1.442695, %v2845_v32  ;;  %v2855_v4 = vmul.f32 1.442695, %v2846_v7  ;;  %4654 = vpow2.f32 %v2561_v47  ;;  %v6631_v47 = vpop.eup %4648 }
 0x47e   : > { %v2838_v61 = vpop.xlane.xlu1 %2837 }
 0x47f   : > { %4656 = vpow2.f32 %v2853_v40  ;;  %v2847_v60 = vsub.f32 %v7631_v58, %v2838_v61  ;;  %v2848_v16 = vsub.f32 %v7630_v28, %v2838_v61 }
 0x480   : > { %4658 = vpow2.f32 %v2855_v4 }
 0x481   : > { %v2857_v7 = vmul.f32 1.442695, %v2847_v60  ;;  %v2859_v44 = vmul.f32 1.442695, %v2848_v16  ;;  %4660 = vpow2.f32 %v2563_v56 }
 0x482   : > { %4662 = vpow2.f32 %v2565_v55  ;;  %v2841_v12 = vpop.xlane.xlu1 %2840 }
 0x483   : > { %4664 = vpow2.f32 %v2857_v7 }
 0x484   : > { %4666 = vpow2.f32 %v2859_v44 }
 0x485   : > { %v6633_v58 = vpop.eup %4650 }
 0x486   : > { %v6635_v28 = vpop.eup %4652  ;;  %v2844_v35 = vpop.xlane.xlu1 %2843 }
 0x487   : > { %v2851_v32 = vsub.f32 %v7637_v9, %v2844_v35  ;;  %v2852_v0 = vsub.f32 %v7636_v13, %v2844_v35  ;;  %v2567_v57 = vadd.f32 %v6635_v28, %v6633_v58  ;;  %v6641_v19 = vpop.eup %4654 }
 0x488   : > { %v2573_v16 = vadd.f32 %v6641_v19, %v6631_v47 }
 0x489   : > { %v6643_v40 = vpop.eup %4656  ;;  %v2865_v4 = vmul.f32 1.442695, %v2851_v32  ;;  %v2867_v56 = vmul.f32 1.442695, %v2852_v0  ;;  %2568 = vadd.xlane.f32.xlu0 %v2567_v57 }
 0x48a   : > { %v6647_v61 = vpop.eup %4658 }
 0x48b   : > { %v6649_v55 = vpop.eup %4660  ;;  %4668 = vpow2.f32 %v2865_v4  ;;  %v2869_v13 = vadd.f32 %v6647_v61, %v6643_v40  ;;  %v7688_v4 = vmax.f32 %v7663_v29, %v7662_v37 }
 0x48c   : > { %v6653_v9 = vpop.eup %4662  ;;  %4670 = vpow2.f32 %v2867_v56  ;;  %v7689_v56 = vmax.f32 %v7664_v46, %v6032_v49 }
 0x48d   : > { %v6655_v60 = vpop.eup %4664  ;;  %2571 = vadd.xlane.f32.xlu0 %v2570_v24  ;;  %2870 = vadd.xlane.f32.xlu1 %v2869_v13  ;;  %v2576_v35 = vadd.f32 %v6653_v9, %v6649_v55  ;;  %v7690_v24 = vmax.f32 %v6036_v25, %v6038_v26  ;;  %v2371_v13 = vld [vmem:[%s7289_s2] sm:$0xf] }
 0x48e   : > { %v6659_v7 = vpop.eup %4666 }
 0x48f   : > { %v2872_v44 = vadd.f32 %v6659_v7, %v6655_v60 }
 0x491   : > { %2574 = vadd.xlane.f32.xlu0 %v2573_v16  ;;  %2873 = vadd.xlane.f32.xlu1 %v2872_v44  ;;  %v7691_v16 = vmax.f32 %v6042_v3, %v6047_v45  ;;  %v2849_v44 = vsub.f32 %v7635_v14, %v2841_v12 }
 0x495   : > { %v6665_v32 = vpop.eup %4668  ;;  %2577 = vadd.xlane.f32.xlu0 %v2576_v35  ;;  %v2850_v35 = vsub.f32 %v7634_v27, %v2841_v12 }
 0x496   : > { %v6667_v0 = vpop.eup %4670 }
 0x497   : > { %v2878_v57 = vadd.f32 %v6667_v0, %v6665_v32 }
 0x499   : > { %2879 = vadd.xlane.f32.xlu1 %v2878_v57  ;;  %v2861_v57 = vmul.f32 1.442695, %v2849_v44 }
 0x49b   : > { %4672 = vpow2.f32 %v2861_v57 }
 0x49d   : > { %3142 = vmax.xlane.f32.xlu1 %v7688_v4  ;;  %v2863_v4 = vmul.f32 1.442695, %v2850_v35 }
 0x49f   : > { %4674 = vpow2.f32 %v2863_v4 }
 0x4a1   : > { %3145 = vmax.xlane.f32.xlu1 %v7689_v56 }
 0x4a5   : > { %3148 = vmax.xlane.f32.xlu1 %v7690_v24  ;;  %v6689_v56 = vpop.eup %4672 }
 0x4a9   : > { %3151 = vmax.xlane.f32.xlu1 %v7691_v16  ;;  %v6691_v24 = vpop.eup %4674 }
 0x4aa   : > { %v2875_v8 = vadd.f32 %v6691_v24, %v6689_v56 }
 0x4ab   : > { %2373 = vrot.lane.b32.xlu0 %v2371_v13, %s4818_s22 }
 0x4ca   : > { %2876 = vadd.xlane.f32.xlu0 %v2875_v8 }
 0x50b   : > { %v6695_v16 = vpop.f32.mrb[36].mxu1 }
 0x50c   : > { %v4101_v53 = vpop.f32.mrb[37].mxu1 }
 0x516   : > { %v2569_v13 = vpop.xlane.xlu0 %2568 }
 0x517   : > { %4676 = vrcp.f32 %v2569_v13 }
 0x51a   : > { %v2572_v14 = vpop.xlane.xlu0 %2571  ;;  %v6697_v51 = vpop.xlane.xlu1 %2870 }
 0x51b   : > { %4678 = vrcp.f32 %v2572_v14 }
 0x51e   : > { %v2575_v27 = vpop.xlane.xlu0 %2574  ;;  %v6699_v12 = vpop.xlane.xlu1 %2873 }
 0x51f   : > { %4680 = vrcp.f32 %v2575_v27 }
 0x520   : > { %v2043_v44 = vpop.f32.mrb[38].mxu1 }
 0x521   : > { %v2045_v35 = vpop.f32.mrb[39].mxu1  ;;  %v4677_v4 = vpop.eup %4676 }
 0x522   : > { %v2578_v57 = vpop.xlane.xlu0 %2577  ;;  %v6704_v13 = vmul.f32 %v4677_v4, %v6635_v28  ;;  %v6710_v50 = vmul.f32 %v4677_v4, %v6633_v58 }
 0x523   : > { %4682 = vrcp.f32 %v2578_v57 }
 0x524   : > { %v2048_v30 = vpop.f32.mrb[40].mxu1 }
 0x525   : > { %v4679_v8 = vpop.eup %4678  ;;  %v4205_v41 = vpack.c.bf16 %v2048_v30, %v2043_v44  ;;  %v2050_v39 = vpop.f32.mrb[41].mxu1 }
 0x526   : > { %v6701_v53 = vpop.xlane.xlu1 %2879  ;;  %v6707_v14 = vmul.f32 %v4679_v8, %v6629_v38  ;;  %v6713_v27 = vmul.f32 %v4679_v8, %v6627_v54 }
 0x527   : > { %4206 = vmatpush3.bf16.msra.mxu1 %v4205_v41 }
 0x528   : > { %v2053_v35 = vpop.f32.mrb[42].mxu1  ;;  %4207 = vmatprep.subr.bf16.mxu1 %v7611_v31  ;;  %v4226_v30 = vpack.c.bf16 %v6713_v27, %v6710_v50  ;;  %v7728_v50 = vld [vmem:[#allocation79_spill] sm:$0xff] }
 0x529   : > { %v2055_v28 = vpop.f32.mrb[43].mxu1  ;;  %v4681_v38 = vpop.eup %4680 }
 0x52a   : > { %v3143_v44 = vpop.xlane.xlu1 %3142  ;;  %v6723_v52 = vmul.f32 %v4681_v38, %v6641_v19  ;;  %v6729_v28 = vmul.f32 %v4681_v38, %v6631_v47 }
 0x52b   : > { %v3153_v57 = vsub.f32 %v7663_v29, %v3143_v44  ;;  %v3154_v58 = vsub.f32 %v7662_v37, %v3143_v44 }
 0x52c   : > { %v2058_v4 = vpop.f32.mrb[44].mxu1 }
 0x52d   : > { %v4683_v54 = vpop.eup %4682  ;;  %v3161_v8 = vmul.f32 1.442695, %v3153_v57  ;;  %v3163_v41 = vmul.f32 1.442695, %v3154_v58  ;;  %v4208_v10 = vpack.c.bf16 %v2058_v4, %v2053_v35  ;;  %v2060_v6 = vpop.f32.mrb[45].mxu1  ;;  %v7695_v4 = vpack.c.bf16 %v6557_v20, %v6554_v11 }
 0x52e   : > { %v3146_v15 = vpop.xlane.xlu1 %3145  ;;  %v6726_v39 = vmul.f32 %v4683_v54, %v6653_v9  ;;  %v6732_v29 = vmul.f32 %v4683_v54, %v6649_v55  ;;  %v7692_v6 = vpack.c.bf16 %v6539_v5, %v6536_v59 }
 0x52f   : > { %4684 = vpow2.f32 %v3161_v8  ;;  %v3155_v37 = vsub.f32 %v7664_v46, %v3146_v15  ;;  %v3156_v44 = vsub.f32 %v6032_v49, %v3146_v15  ;;  %4209 = vmatpush3.bf16.msra.mxu1 %v4208_v10  ;;  %v7693_v15 = vld [vmem:[#allocation55_spill] sm:$0xff]  ;;  %v7696_v8 = vpack.c.bf16 %v6563_v1, %v6560_v33  ;;  %v7697_v33 = vld [vmem:[#allocation54_spill] sm:$0xff] }
 0x530   : > { %4686 = vpow2.f32 %v3163_v41  ;;  %4211 = vmatprep.subr.bf16.mxu1 %v7692_v6  ;;  %v2808_v1 = vrot.slane %v6067_v36, 4 }
 0x531   : > { %v3165_v9 = vmul.f32 1.442695, %v3155_v37  ;;  %v3167_v55 = vmul.f32 1.442695, %v3156_v44 }
 0x532   : > { %v3149_v35 = vpop.xlane.xlu1 %3148  ;;  %4111 = vmatmul.mubr.msk.f32.vlgmr.msra.gmra.mrb[46].mxu1 %vm1450_vm3, %v6582_v43  ;;  %v7694_v43 = vpack.c.bf16 %v6545_v21, %v6542_v17 }
 0x533   : > { %4688 = vpow2.f32 %v3165_v9  ;;  %v3157_v49 = vsub.f32 %v6036_v25, %v3149_v35  ;;  %v3158_v46 = vsub.f32 %v6038_v26, %v3149_v35  ;;  %2350 = vmatprep.mubr.f32.mxu1 %v7693_v15  ;;  %v7698_v9 = vld [vmem:[#allocation57_spill] sm:$0xff]  ;;  %v7699_v35 = vld [vmem:[#allocation56_spill] sm:$0xff] }
 0x534   : > { %4690 = vpow2.f32 %v3167_v55  ;;  %v2817_v55 = vrot.slane %v6139_v22, 4 }
 0x535   : > { %v3169_v59 = vmul.f32 1.442695, %v3157_v49  ;;  %v3171_v5 = vmul.f32 1.442695, %v3158_v46  ;;  %v2809_v49 = vadd.f32 %v2808_v1, %v6067_v36  ;;  %v7700_v46 = vld [vmem:[#allocation59_spill] sm:$0xff] }
 0x536   : > { %v3152_v10 = vpop.xlane.xlu1 %3151  ;;  %v2818_v15 = vadd.f32 %v2817_v55, %v6139_v22  ;;  %v2982_v36 = vld [vmem:[%s7289_s2 + $0x4] sm:$0xf] }
 0x537   : > { %4692 = vpow2.f32 %v3169_v59  ;;  %v3159_v38 = vsub.f32 %v6042_v3, %v3152_v10  ;;  %v3160_v57 = vsub.f32 %v6047_v45, %v3152_v10  ;;  %v7701_v59 = vmax.f32 %v6248_v18, %v6252_v42 }
 0x538   : > { %4694 = vpow2.f32 %v3171_v5  ;;  %4213 = vmatpush1.bf16.xpose.msra.mxu1 %v7694_v43  ;;  %v7702_v5 = vld [vmem:[#allocation58_spill] sm:$0xff]  ;;  %v2810_v10 = vrot.slane %v2809_v49, 2  ;;  %v7704_v43 = vmax.f32 %v6256_v63, %v6258_v62 }
 0x539   : > { %v6753_v58 = vpop.eup %4684  ;;  %v3173_v25 = vmul.f32 1.442695, %v3159_v38  ;;  %v3175_v26 = vmul.f32 1.442695, %v3160_v57  ;;  %4215 = vmatprep.subr.bf16.mxu1 %v7695_v4  ;;  %v7703_v38 = vld [vmem:[#allocation61_spill] sm:$0xff]  ;;  %v2819_v57 = vrot.slane %v2818_v15, 2 }
 0x53a   : > { %v6758_v54 = vpop.eup %4686  ;;  %v2811_v22 = vadd.f32 %v2810_v10, %v2809_v49  ;;  %v7706_v4 = vld [vmem:[#allocation51_spill] sm:$0xff]  ;;  %v7714_v10 = vld [vmem:[#allocation117_spill] sm:$0xff] }
 0x53b   : > { %4696 = vpow2.f32 %v3173_v25  ;;  %v3177_v3 = vadd.f32 %v6758_v54, %v6753_v58  ;;  %v7705_v25 = vld [vmem:[#allocation60_spill] sm:$0xff] }
 0x53c   : > { %4698 = vpow2.f32 %v3175_v26  ;;  %v2820_v26 = vadd.f32 %v2819_v57, %v2818_v15  ;;  %v7715_v57 = vld [vmem:[#allocation118_spill] sm:$0xff] }
 0x53d   : > { %v6762_v45 = vpop.eup %4688  ;;  %3178 = vadd.xlane.f32.xlu1 %v3177_v3  ;;  %v7707_v3 = vld [vmem:[#allocation53_spill] sm:$0xff] }
 0x53e   : > { %v6764_v17 = vpop.eup %4690 }
 0x53f   : > { %v3180_v21 = vadd.f32 %v6764_v17, %v6762_v45 }
 0x540   : > { %4217 = vmatpush1.bf16.xpose.msra.mxu1 %v7696_v8  ;;  %v2812_v8 = vrot.slane %v2811_v22, 1 }
 0x541   : > { %v6771_v11 = vpop.eup %4692  ;;  %3181 = vadd.xlane.f32.xlu1 %v3180_v21  ;;  %4218 = vmatprep.subr.bf16.mxu1 %v7611_v31  ;;  %v7708_v21 = vmax.f32 %v7706_v4, %v7707_v3 }
 0x542   : > { %v6774_v20 = vpop.eup %4694 }
 0x543   : > { %v3183_v41 = vadd.f32 %v6774_v20, %v6771_v11 }
 0x545   : > { %v6778_v37 = vpop.eup %4696  ;;  %3184 = vadd.xlane.f32.xlu1 %v3183_v41  ;;  %v2821_v41 = vrot.slane %v2820_v26, 1 }
 0x546   : > { %v6780_v44 = vpop.eup %4698 }
 0x547   : > { %v3186_v6 = vadd.f32 %v6780_v44, %v6778_v37  ;;  %2351 = vmatmul.mubr.f32.vlgmr.msra.gmra.mrb[48].mxu1 %v7697_v33  ;;  %v7710_v33 = vld [vmem:[#allocation46_spill] sm:$0xff]  ;;  %v2822_v55 = vadd.f32 %v2821_v41, %v2820_v26  ;;  %v7718_v41 = vld [vmem:[#allocation119_spill] sm:$0xff] }
 0x548   : > { %2355 = vmatprep.mubr.f32.mxu1 %v7698_v9  ;;  %v2813_v9 = vadd.f32 %v2812_v8, %v2811_v22  ;;  %v7716_v22 = vld [vmem:[#allocation130_spill] sm:$0xff] }
 0x549   : > { %3187 = vadd.xlane.f32.xlu0 %v3186_v6  ;;  %v7709_v6 = vld [vmem:[#allocation44_spill] sm:$0xff] }
 0x54a   : > { %v7711_v1 = vmax.f32 %v7709_v6, %v7710_v33  ;;  %4700 = vrcp.f32 %v2813_v9  ;;  %v7719_v9 = vld [vmem:[#allocation121_spill] sm:$0xff] }
 0x54b   : > { %2356 = vmatmul.mubr.f32.gmra.mrb[50].mxu1 %v7699_v35  ;;  %4702 = vrcp.f32 %v2822_v55 }
 0x54c   : > { %2360 = vmatprep.mubr.f32.mxu1 %v7700_v46  ;;  %v7712_v46 = vld [vmem:[#allocation123_spill] sm:$0xff]  ;;  %4704 = vrcp.f32 %v6697_v51 }
 0x54d   : > { %3450 = vmax.xlane.f32.xlu0 %v7701_v59  ;;  %v7713_v59 = vld [vmem:[#allocation127_spill] sm:$0xff]  ;;  %4706 = vrcp.f32 %v6699_v12 }
 0x54f   : > { %2361 = vmatmul.mubr.f32.gmra.mrb[52].mxu1 %v7702_v5 }
 0x550   : > { %2365 = vmatprep.mubr.f32.mxu1 %v7703_v38 }
 0x551   : > { %3453 = vmax.xlane.f32.xlu0 %v7704_v43 }
 0x553   : > { %2366 = vmatmul.mubr.f32.gmra.mrb[54].mxu1 %v7705_v25 }
 0x554   : > { %4121 = vmatprep.mubr.msk.f32.mxu1 %vm4815_vm2, %v7606_v48  ;;  %v4701_v35 = vpop.eup %4700 }
 0x555   : > { %3456 = vmax.xlane.f32.xlu0 %v7708_v21  ;;  %v4703_v49 = vpop.eup %4702  ;;  %v6820_v38 = vmul.f32 %v4701_v35, %v7714_v10  ;;  %v6823_v43 = vmul.f32 %v4701_v35, %v7715_v57  ;;  %v7717_v21 = vld [vmem:[#allocation132_spill] sm:$0xff]  ;;  %v6841_v55 = vmul.f32 %v4701_v35, %v7719_v9 }
 0x556   : > { %2984 = vrot.lane.b32.xlu1 %v2982_v36, %s4816_s8  ;;  %v6814_v15 = vmul.f32 %v4703_v49, %v7712_v46  ;;  %v6817_v5 = vmul.f32 %v4703_v49, %v7713_v59  ;;  %v6832_v26 = vmul.f32 %v4703_v49, %v7716_v22  ;;  %v6835_v8 = vmul.f32 %v4703_v49, %v7717_v21  ;;  %v4705_v46 = vpop.eup %4704 }
 0x557   : > { %v4707_v59 = vpop.eup %4706  ;;  %v6848_v10 = vmul.f32 %v4705_v46, %v6647_v61  ;;  %v6854_v57 = vmul.f32 %v4705_v46, %v6643_v40 }
 0x558   : > { %v6851_v49 = vmul.f32 %v4707_v59, %v6659_v7 }
 0x559   : > { %3459 = vmax.xlane.f32.xlu0 %v7711_v1  ;;  %v6838_v1 = vmul.f32 %v4701_v35, %v7718_v41  ;;  %v6857_v35 = vmul.f32 %v4707_v59, %v6655_v60  ;;  %v6863_v41 = vpop.permute.xlu0 %2373 }
 0x55d   : > { %v6865_v9 = vpop.xlane.xlu0 %2876 }
 0x5d6   : > { %v6867_v61 = vpop.xlane.xlu0 %3187 }
 0x5da   : > { %v3451_v7 = vpop.xlane.xlu0 %3450 }
 0x5db   : > { %v3461_v12 = vsub.f32 %v6248_v18, %v3451_v7  ;;  %v3462_v40 = vsub.f32 %v6252_v42, %v3451_v7 }
 0x5dd   : > { %v3469_v46 = vmul.f32 1.442695, %v3461_v12  ;;  %v3471_v60 = vmul.f32 1.442695, %v3462_v40 }
 0x5de   : > { %v3454_v59 = vpop.xlane.xlu0 %3453 }
 0x5df   : > { %4708 = vpow2.f32 %v3469_v46  ;;  %v3463_v51 = vsub.f32 %v6256_v63, %v3454_v59  ;;  %v3464_v36 = vsub.f32 %v6258_v62, %v3454_v59 }
 0x5e0   : > { %4710 = vpow2.f32 %v3471_v60 }
 0x5e1   : > { %v3473_v25 = vmul.f32 1.442695, %v3463_v51  ;;  %v3475_v21 = vmul.f32 1.442695, %v3464_v36 }
 0x5e2   : > { %v3457_v22 = vpop.xlane.xlu0 %3456 }
 0x5e3   : > { %4712 = vpow2.f32 %v3473_v25  ;;  %v3465_v47 = vsub.f32 %v7706_v4, %v3457_v22  ;;  %v3466_v19 = vsub.f32 %v7707_v3, %v3457_v22 }
 0x5e4   : > { %4714 = vpow2.f32 %v3475_v21 }
 0x5e5   : > { %v3477_v18 = vmul.f32 1.442695, %v3465_v47  ;;  %v3479_v42 = vmul.f32 1.442695, %v3466_v19 }
 0x5e6   : > { %v3460_v12 = vpop.xlane.xlu0 %3459 }
 0x5e7   : > { %4716 = vpow2.f32 %v3477_v18  ;;  %v3467_v7 = vsub.f32 %v7709_v6, %v3460_v12  ;;  %v3468_v63 = vsub.f32 %v7710_v33, %v3460_v12  ;;  %v3290_v18 = vld [vmem:[%s7289_s2 + $0x4] sm:$0xf] }
 0x5e8   : > { %4718 = vpow2.f32 %v3479_v42  ;;  %v3598_v42 = vld [vmem:[%s7289_s2 + $0x4] sm:$0xf] }
 0x5e9   : > { %v6877_v62 = vpop.eup %4708  ;;  %v3481_v51 = vmul.f32 1.442695, %v3467_v7  ;;  %v3483_v36 = vmul.f32 1.442695, %v3468_v63 }
 0x5ea   : > { %v6879_v40 = vpop.eup %4710 }
 0x5eb   : > { %4720 = vpow2.f32 %v3481_v51  ;;  %v3485_v4 = vadd.f32 %v6879_v40, %v6877_v62 }
 0x5ec   : > { %4722 = vpow2.f32 %v3483_v36 }
 0x5ed   : > { %v6883_v47 = vpop.eup %4712  ;;  %3486 = vadd.xlane.f32.xlu0 %v3485_v4 }
 0x5ee   : > { %v6885_v19 = vpop.eup %4714 }
 0x5ef   : > { %v3488_v3 = vadd.f32 %v6885_v19, %v6883_v47 }
 0x5f1   : > { %v6889_v6 = vpop.eup %4716  ;;  %3489 = vadd.xlane.f32.xlu1 %v3488_v3 }
 0x5f2   : > { %v6891_v33 = vpop.eup %4718 }
 0x5f3   : > { %v3491_v25 = vadd.f32 %v6891_v33, %v6889_v6 }
 0x5f5   : > { %v6895_v22 = vpop.eup %4720  ;;  %3492 = vadd.xlane.f32.xlu0 %v3491_v25 }
 0x5f6   : > { %v6897_v21 = vpop.eup %4722 }
 0x5f7   : > { %v3494_v46 = vadd.f32 %v6897_v21, %v6895_v22 }
 0x5f9   : > { %3495 = vadd.xlane.f32.xlu0 %v3494_v46 }
 0x602   : > { %1838 = vrot.lane.b32.xlu1 %v6695_v16, %s4818_s22 }
 0x605   : > { %v2134_v60 = vpop.f32.mrb[46].mxu1 }
 0x606   : > { %v4112_v59 = vpop.f32.mrb[47].mxu1 }
 0x607   : > { %v7720_v59 = vpack.c.bf16 %v6707_v14, %v6704_v13  ;;  %v7724_v13 = vld [vmem:[#allocation75_spill] sm:$0xff] }
 0x608   : > { %v7725_v14 = vld [vmem:[#allocation139_spill] sm:$0xff] }
 0x60f   : > { %3292 = vrot.lane.b32.xlu0 %v3290_v18, %s4817_s13  ;;  %v7722_v18 = vpack.c.bf16 %v6726_v39, %v6723_v52  ;;  %v7729_v52 = vld [vmem:[#allocation84_spill] sm:$0xff] }
 0x613   : > { %3600 = vrot.lane.b32.xlu0 %v3598_v42, %s4818_s22  ;;  %v7723_v42 = vpack.c.bf16 %v6732_v29, %v6729_v28  ;;  %v7731_v29 = vld [vmem:[#allocation87_spill] sm:$0xff] }
 0x617   : > { %2147 = vrot.lane.b32.xlu0 %v2134_v60, %s4817_s13  ;;  %v7721_v60 = vld [vmem:[#allocation77_spill] sm:$0xff] }
 0x61a   : > { %v2352_v12 = vpop.f32.mrb[48].mxu1 }
 0x61b   : > { %v2354_v7 = vpop.f32.mrb[49].mxu1 }
 0x61c   : > { %v7727_v7 = vld [vmem:[#allocation142_spill] sm:$0xff] }
 0x61e   : > { %v2357_v63 = vpop.f32.mrb[50].mxu1 }
 0x61f   : > { %v4219_v16 = vpack.c.bf16 %v2357_v63, %v2352_v12  ;;  %v2359_v51 = vpop.f32.mrb[51].mxu1  ;;  %v7726_v12 = vld [vmem:[#allocation81_spill] sm:$0xff]  ;;  %v3125_v63 = vrot.slane %v7727_v7, 4 }
 0x620   : > { %v7732_v51 = vld [vmem:[#allocation85_spill] sm:$0xff] }
 0x621   : > { %4220 = vmatpush3.bf16.msra.mxu1 %v4219_v16  ;;  %v3126_v39 = vadd.f32 %v3125_v63, %v7727_v7  ;;  %v7735_v7 = vld [vmem:[#allocation133_spill] sm:$0xff] }
 0x622   : > { %v2362_v36 = vpop.f32.mrb[52].mxu1  ;;  %4221 = vmatprep.subr.bf16.mxu1 %v7611_v31 }
 0x623   : > { %v2364_v4 = vpop.f32.mrb[53].mxu1  ;;  %v3127_v16 = vrot.slane %v3126_v39, 2 }
 0x625   : > { %v3128_v4 = vadd.f32 %v3127_v16, %v3126_v39 }
 0x626   : > { %v2367_v3 = vpop.f32.mrb[54].mxu1 }
 0x627   : > { %v4222_v25 = vpack.c.bf16 %v2367_v3, %v2362_v36  ;;  %v2369_v46 = vpop.f32.mrb[55].mxu1 }
 0x629   : > { %4223 = vmatpush3.bf16.msra.mxu1 %v4222_v25  ;;  %v3129_v25 = vrot.slane %v3128_v4, 1 }
 0x62a   : > { %4225 = vmatprep.subr.bf16.mxu1 %v7720_v59 }
 0x62b   : > { %v3130_v59 = vadd.f32 %v3129_v25, %v3128_v4  ;;  %v7739_v4 = vld [vmem:[#allocation135_spill] sm:$0xff]  ;;  %v7740_v25 = vld [vmem:[#allocation136_spill] sm:$0xff] }
 0x62c   : > { %4122 = vmatmul.mubr.msk.f32.vlgmr.msra.gmra.mrb[56].mxu1 %vm1450_vm3, %v6863_v41  ;;  %v3116_v41 = vrot.slane %v7725_v14, 4 }
 0x62d   : > { %2659 = vmatprep.mubr.f32.mxu1 %v7721_v60  ;;  %v3179_v60 = vpop.xlane.xlu1 %3178 }
 0x62e   : > { %v3117_v27 = vadd.f32 %v3116_v41, %v7725_v14  ;;  %v7734_v41 = vld [vmem:[#allocation138_spill] sm:$0xff] }
 0x630   : > { %v3118_v28 = vrot.slane %v3117_v27, 2 }
 0x632   : > { %4227 = vmatpush1.bf16.xpose.msra.mxu1 %v4226_v30  ;;  %v7730_v30 = vld [vmem:[#allocation83_spill] sm:$0xff]  ;;  %v3119_v36 = vadd.f32 %v3118_v28, %v3117_v27 }
 0x633   : > { %4229 = vmatprep.subr.bf16.mxu1 %v7722_v18 }
 0x634   : > { %v3120_v3 = vrot.slane %v3119_v36, 1 }
 0x636   : > { %v3121_v46 = vadd.f32 %v3120_v3, %v3119_v36 }
 0x638   : > { %4724 = vrcp.f32 %v3121_v46 }
 0x639   : > { %4726 = vrcp.f32 %v3130_v59 }
 0x63a   : > { %4231 = vmatpush1.bf16.xpose.msra.mxu1 %v7723_v42  ;;  %4728 = vrcp.f32 %v3179_v60 }
 0x63b   : > { %4232 = vmatprep.subr.bf16.mxu1 %v7611_v31 }
 0x641   : > { %2660 = vmatmul.mubr.f32.vlgmr.msra.gmra.mrb[58].mxu1 %v7724_v13  ;;  %v7733_v13 = vld [vmem:[#allocation137_spill] sm:$0xff] }
 0x642   : > { %2664 = vmatprep.mubr.f32.mxu1 %v7726_v12  ;;  %v4725_v18 = vpop.eup %4724 }
 0x643   : > { %v4727_v42 = vpop.eup %4726  ;;  %v6949_v63 = vmul.f32 %v4725_v18, %v7735_v7  ;;  %v6965_v3 = vmul.f32 %v4725_v18, %v7739_v4  ;;  %v6968_v46 = vmul.f32 %v4725_v18, %v7740_v25 }
 0x644   : > { %v6943_v14 = vmul.f32 %v4727_v42, %v7733_v13  ;;  %v6946_v12 = vmul.f32 %v4727_v42, %v7734_v41  ;;  %v4729_v13 = vpop.eup %4728 }
 0x645   : > { %2665 = vmatmul.mubr.f32.gmra.mrb[60].mxu1 %v7728_v50  ;;  %v7736_v50 = vld [vmem:[#allocation134_spill] sm:$0xff] }
 0x646   : > { %2669 = vmatprep.mubr.f32.mxu1 %v7729_v52  ;;  %v6952_v27 = vmul.f32 %v4725_v18, %v7736_v50  ;;  %v3182_v52 = vpop.xlane.xlu1 %3181  ;;  %v6982_v18 = vmul.f32 %v4729_v13, %v6753_v58 }
 0x647   : > { %4730 = vrcp.f32 %v3182_v52 }
 0x649   : > { %2670 = vmatmul.mubr.f32.gmra.mrb[62].mxu1 %v7730_v30 }
 0x64a   : > { %2674 = vmatprep.mubr.f32.mxu1 %v7731_v29  ;;  %v3185_v28 = vpop.xlane.xlu1 %3184  ;;  %v7737_v29 = vld [vmem:[#allocation140_spill] sm:$0xff] }
 0x64b   : > { %v6959_v16 = vmul.f32 %v4727_v42, %v7737_v29  ;;  %4732 = vrcp.f32 %v3185_v28 }
 0x64c   : > { %4734 = vrcp.f32 %v6867_v61 }
 0x64d   : > { %2675 = vmatmul.mubr.f32.gmra.mrb[64].mxu1 %v7732_v51  ;;  %v7738_v51 = vld [vmem:[#allocation141_spill] sm:$0xff] }
 0x64e   : > { %4132 = vmatprep.mubr.msk.f32.mxu1 %vm4815_vm2, %v7606_v48  ;;  %v6962_v36 = vmul.f32 %v4727_v42, %v7738_v51  ;;  %v6976_v42 = vmul.f32 %v4729_v13, %v6758_v54  ;;  %v6987_v61 = vpop.permute.xlu1 %2984 }
 0x651   : > { %v4731_v41 = vpop.eup %4730 }
 0x652   : > { %v6979_v7 = vmul.f32 %v4731_v41, %v6764_v17  ;;  %v6985_v50 = vmul.f32 %v4731_v41, %v6762_v45 }
 0x654   : > { %v4252_v52 = vpack.c.bf16 %v6979_v7, %v6976_v42  ;;  %v7755_v42 = vld [vmem:[#allocation120_spill] sm:$0xff]  ;;  %v7756_v7 = vld [vmem:[#allocation125_spill] sm:$0xff] }
 0x655   : > { %v4733_v54 = vpop.eup %4732 }
 0x656   : > { %v4735_v51 = vpop.eup %4734  ;;  %v6994_v58 = vmul.f32 %v4733_v54, %v6774_v20  ;;  %v7000_v4 = vmul.f32 %v4733_v54, %v6771_v11 }
 0x657   : > { %v6997_v45 = vmul.f32 %v4735_v51, %v6780_v44  ;;  %v7003_v25 = vmul.f32 %v4735_v51, %v6778_v37 }
 0x67a   : > { %v3487_v29 = vpop.xlane.xlu0 %3486 }
 0x67b   : > { %4736 = vrcp.f32 %v3487_v29 }
 0x67e   : > { %v3490_v17 = vpop.xlane.xlu1 %3489 }
 0x67f   : > { %4738 = vrcp.f32 %v3490_v17 }
 0x682   : > { %v3493_v41 = vpop.xlane.xlu0 %3492  ;;  %v1839_v29 = vpop.permute.xlu1 %1838 }
 0x683   : > { %1842 = vst.msk [vmem:[#allocation3] sm:$0xf] %vm1841_vm5, %v1839_v29  ;;  %4740 = vrcp.f32 %v3493_v41 }
 0x685   : > { %v4737_v44 = vpop.eup %4736 }
 0x686   : > { %v3496_v20 = vpop.xlane.xlu0 %3495  ;;  %v7013_v37 = vmul.f32 %v4737_v44, %v6879_v40  ;;  %v7019_v60 = vmul.f32 %v4737_v44, %v6877_v62 }
 0x687   : > { %4742 = vrcp.f32 %v3496_v20 }
 0x688   : > { %4744 = vrcp.f32 %v6701_v53  ;;  %v7741_v53 = vpack.c.bf16 %v6851_v49, %v6848_v10  ;;  %v7744_v49 = vld [vmem:[#allocation100_spill] sm:$0xff] }
 0x689   : > { %v4739_v11 = vpop.eup %4738  ;;  %4746 = vrcp.f32 %v6865_v9  ;;  %v7742_v9 = vld [vmem:[#allocation102_spill] sm:$0xff] }
 0x68a   : > { %v7010_v54 = vpop.permute.xlu0 %3292  ;;  %v7016_v51 = vmul.f32 %v4739_v11, %v6885_v19  ;;  %v7022_v59 = vmul.f32 %v4739_v11, %v6883_v47 }
 0x68d   : > { %v4741_v30 = vpop.eup %4740 }
 0x68e   : > { %v7028_v20 = vpop.permute.xlu0 %3600  ;;  %v7031_v19 = vmul.f32 %v4741_v30, %v6891_v33  ;;  %v7037_v47 = vmul.f32 %v4741_v30, %v6889_v6 }
 0x691   : > { %v4743_v40 = vpop.eup %4742 }
 0x692   : > { %v2148_v39 = vpop.permute.xlu0 %2147  ;;  %v7034_v62 = vmul.f32 %v4743_v40, %v6897_v21  ;;  %v7040_v44 = vmul.f32 %v4743_v40, %v6895_v22  ;;  %v4745_v28 = vpop.eup %4744 }
 0x693   : > { %2151 = vst.msk [vmem:[#allocation3] sm:$0xf] %vm2150_vm6, %v2148_v39 }
 0x6ff   : > { %v7047_v41 = vpop.f32.mrb[56].mxu1 }
 0x700   : > { %v4123_v33 = vpop.f32.mrb[57].mxu1 }
 0x701   : > { %v2680_v33 = vld [vmem:[%s7289_s2 + $0x4] sm:$0xf] }
 0x714   : > { %v2661_v17 = vpop.f32.mrb[58].mxu1 }
 0x715   : > { %v2663_v21 = vpop.f32.mrb[59].mxu1 }
 0x716   : > { %v4747_v21 = vpop.eup %4746 }
 0x718   : > { %v2666_v13 = vpop.f32.mrb[60].mxu1 }
 0x719   : > { %v4233_v6 = vpack.c.bf16 %v2666_v13, %v2661_v17  ;;  %v2668_v30 = vpop.f32.mrb[61].mxu1  ;;  %v2894_v13 = vmul.f32 %v4747_v21, %v6691_v24  ;;  %v2896_v17 = vmul.f32 %v4745_v28, %v6667_v0  ;;  %v7746_v24 = vld [vmem:[#allocation105_spill] sm:$0xff]  ;;  %v7747_v0 = vld [vmem:[#allocation110_spill] sm:$0xff] }
 0x71a   : > { %v2895_v30 = vmul.f32 %v4745_v28, %v6665_v32 }
 0x71b   : > { %4234 = vmatpush3.bf16.msra.mxu1 %v4233_v6  ;;  %v2893_v6 = vmul.f32 %v4747_v21, %v6689_v56 }
 0x71c   : > { %v2671_v22 = vpop.f32.mrb[62].mxu1  ;;  %4235 = vmatprep.subr.bf16.mxu1 %v7611_v31 }
 0x71d   : > { %v2673_v39 = vpop.f32.mrb[63].mxu1  ;;  %v4244_v10 = vpack.c.bf16 %v2895_v30, %v2893_v6  ;;  %v7751_v6 = vld [vmem:[#allocation122_spill] sm:$0xff]  ;;  %v7752_v30 = vpack.c.bf16 %v6985_v50, %v6982_v18  ;;  %v7760_v50 = vld [vmem:[#allocation131_spill] sm:$0xff] }
 0x71e   : > { %v7748_v39 = vld [vmem:[#allocation109_spill] sm:$0xff]  ;;  %v7759_v18 = vld [vmem:[#allocation126_spill] sm:$0xff] }
 0x720   : > { %v2676_v40 = vpop.f32.mrb[64].mxu1 }
 0x721   : > { %v4236_v11 = vpack.c.bf16 %v2676_v40, %v2671_v22  ;;  %v2678_v29 = vpop.f32.mrb[65].mxu1  ;;  %v7745_v22 = vld [vmem:[#allocation107_spill] sm:$0xff] }
 0x722   : > { %v4242_v29 = vpack.c.bf16 %v2896_v17, %v2894_v13 }
 0x723   : > { %4237 = vmatpush3.bf16.msra.mxu1 %v4236_v11  ;;  %v7743_v11 = vpack.c.bf16 %v6857_v35, %v6854_v57  ;;  %v7749_v57 = vld [vmem:[#allocation113_spill] sm:$0xff]  ;;  %v7750_v35 = vld [vmem:[#allocation111_spill] sm:$0xff] }
 0x724   : > { %4239 = vmatprep.subr.bf16.mxu1 %v7741_v53 }
 0x726   : > { %4133 = vmatmul.mubr.msk.f32.vlgmr.msra.gmra.mrb[66].mxu1 %vm1450_vm3, %v2680_v33 }
 0x727   : > { %2961 = vmatprep.mubr.f32.mxu1 %v7742_v9 }
 0x72c   : > { %4241 = vmatpush1.bf16.xpose.msra.mxu1 %v7743_v11 }
 0x72d   : > { %4243 = vmatprep.subr.bf16.mxu1 %v4242_v29 }
 0x734   : > { %4245 = vmatpush1.bf16.xpose.msra.mxu1 %v4244_v10  ;;  %v7753_v10 = vpack.c.bf16 %v6997_v45, %v6994_v58  ;;  %v7761_v58 = vld [vmem:[#allocation129_spill] sm:$0xff] }
 0x735   : > { %4246 = vmatprep.subr.bf16.mxu1 %v7611_v31 }
 0x73b   : > { %2962 = vmatmul.mubr.f32.vlgmr.msra.gmra.mrb[68].mxu1 %v7744_v49  ;;  %v7754_v49 = vpack.c.bf16 %v7003_v25, %v7000_v4 }
 0x73c   : > { %2966 = vmatprep.mubr.f32.mxu1 %v7745_v22 }
 0x73f   : > { %2967 = vmatmul.mubr.f32.gmra.mrb[70].mxu1 %v7746_v24 }
 0x740   : > { %2971 = vmatprep.mubr.f32.mxu1 %v7747_v0 }
 0x743   : > { %2972 = vmatmul.mubr.f32.gmra.mrb[72].mxu1 %v7748_v39 }
 0x744   : > { %2976 = vmatprep.mubr.f32.mxu1 %v7749_v57 }
 0x747   : > { %2977 = vmatmul.mubr.f32.gmra.mrb[74].mxu1 %v7750_v35 }
 0x748   : > { %4143 = vmatprep.mubr.msk.f32.mxu1 %vm4815_vm2, %v7606_v48 }
 0x7f9   : > { %v2750_v32 = vpop.f32.mrb[66].mxu1 }
 0x7fa   : > { %2762 = vst.msk [vmem:[#allocation3 + $0x4] sm:$0xf] %vm1532_vm4, %v2750_v32  ;;  %v4134_v56 = vpop.f32.mrb[67].mxu1 }
 0x80e   : > { %v2963_v28 = vpop.f32.mrb[68].mxu1 }
 0x80f   : > { %v2965_v40 = vpop.f32.mrb[69].mxu1 }
 0x810   : > { %v7762_v40 = vpack.c.bf16 %v7016_v51, %v7013_v37  ;;  %v7767_v37 = vld [vmem:[#allocation48_spill] sm:$0xff]  ;;  %v7768_v51 = vld [vmem:[#allocation50_spill] sm:$0xff] }
 0x812   : > { %v2968_v33 = vpop.f32.mrb[70].mxu1 }
 0x813   : > { %v4247_v21 = vpack.c.bf16 %v2968_v33, %v2963_v28  ;;  %v2970_v53 = vpop.f32.mrb[71].mxu1  ;;  %v7763_v33 = vld [vmem:[#allocation47_spill] sm:$0xff] }
 0x814   : > { %v7765_v53 = vpack.c.bf16 %v7034_v62, %v7031_v19  ;;  %v7773_v19 = vld [vmem:[#allocation146_spill] sm:$0xff] }
 0x815   : > { %4248 = vmatpush3.bf16.msra.mxu1 %v4247_v21  ;;  %v7764_v21 = vpack.c.bf16 %v7022_v59, %v7019_v60  ;;  %v7771_v59 = vld [vmem:[#allocation144_spill] sm:$0xff]  ;;  %v7772_v60 = vld [vmem:[#allocation149_spill] sm:$0xff] }
 0x816   : > { %v2973_v9 = vpop.f32.mrb[72].mxu1  ;;  %4249 = vmatprep.subr.bf16.mxu1 %v7611_v31 }
 0x817   : > { %v2975_v13 = vpop.f32.mrb[73].mxu1 }
 0x818   : > { %v7770_v13 = vld [vmem:[#allocation145_spill] sm:$0xff] }
 0x81a   : > { %v2978_v17 = vpop.f32.mrb[74].mxu1 }
 0x81b   : > { %v4250_v29 = vpack.c.bf16 %v2978_v17, %v2973_v9  ;;  %v2980_v11 = vpop.f32.mrb[75].mxu1  ;;  %v7766_v9 = vpack.c.bf16 %v7040_v44, %v7037_v47 }
 0x81d   : > { %4251 = vmatpush3.bf16.msra.mxu1 %v4250_v29 }
 0x81e   : > { %4253 = vmatprep.subr.bf16.mxu1 %v4252_v52  ;;  %v7758_v52 = vld [vmem:[#allocation128_spill] sm:$0xff] }
 0x820   : > { %4144 = vmatmul.mubr.msk.f32.vlgmr.msra.gmra.mrb[76].mxu1 %vm1450_vm3, %v6987_v61  ;;  %v7757_v61 = vld [vmem:[#allocation124_spill] sm:$0xff] }
 0x821   : > { %3269 = vmatprep.mubr.f32.mxu1 %v7751_v6 }
 0x826   : > { %4255 = vmatpush1.bf16.xpose.msra.mxu1 %v7752_v30 }
 0x827   : > { %4257 = vmatprep.subr.bf16.mxu1 %v7753_v10 }
 0x82e   : > { %4259 = vmatpush1.bf16.xpose.msra.mxu1 %v7754_v49 }
 0x82f   : > { %4260 = vmatprep.subr.bf16.mxu1 %v7611_v31 }
 0x835   : > { %3270 = vmatmul.mubr.f32.vlgmr.msra.gmra.mrb[78].mxu1 %v7755_v42 }
 0x836   : > { %3274 = vmatprep.mubr.f32.mxu1 %v7756_v7 }
 0x839   : > { %3275 = vmatmul.mubr.f32.gmra.mrb[80].mxu1 %v7757_v61  ;;  %v7774_v61 = vld [vmem:[#allocation12_spill] sm:$0xff] }
 0x83a   : > { %3279 = vmatprep.mubr.f32.mxu1 %v7758_v52  ;;  %v7775_v52 = vld [vmem:[#allocation11_spill] sm:$0xff] }
 0x83d   : > { %3280 = vmatmul.mubr.f32.gmra.mrb[82].mxu1 %v7759_v18  ;;  %v7776_v18 = vpack.c.bf16 %v7774_v61, %v7775_v52  ;;  %v7819_v61 = vld [vmem:[#allocation25_spill] sm:$0xff]  ;;  %v7820_v52 = vld [vmem:[#allocation86_spill] sm:$0xff] }
 0x83e   : > { %3284 = vmatprep.mubr.f32.mxu1 %v7760_v50  ;;  %v7778_v50 = vld [vmem:[#allocation7_spill] sm:$0xff] }
 0x841   : > { %3285 = vmatmul.mubr.f32.gmra.mrb[84].mxu1 %v7761_v58 }
 0x842   : > { %4154 = vmatprep.mubr.msk.f32.mxu1 %vm4815_vm2, %v7606_v48 }
 0x8f3   : > { %v3054_v45 = vpop.f32.mrb[76].mxu1 }
 0x8f4   : > { %v4145_v4 = vpop.f32.mrb[77].mxu1  ;;  %3067 = vrot.lane.b32.xlu0 %v3054_v45, %s4818_s22  ;;  %v7780_v45 = vld [vmem:[#allocation14_spill] sm:$0xff] }
 0x8f5   : > { %v7781_v4 = vld [vmem:[#allocation13_spill] sm:$0xff] }
 0x908   : > { %v3271_v25 = vpop.f32.mrb[78].mxu1 }
 0x909   : > { %v3273_v22 = vpop.f32.mrb[79].mxu1 }
 0x90a   : > { %v7784_v22 = vld [vmem:[#allocation9_spill] sm:$0xff] }
 0x90c   : > { %v3276_v24 = vpop.f32.mrb[80].mxu1 }
 0x90d   : > { %v4261_v0 = vpack.c.bf16 %v3276_v24, %v3271_v25  ;;  %v3278_v39 = vpop.f32.mrb[81].mxu1  ;;  %v7782_v25 = vpack.c.bf16 %v7780_v45, %v7781_v4  ;;  %v7825_v45 = vld [vmem:[#allocation30_spill] sm:$0xff]  ;;  %v7826_v4 = vld [vmem:[#allocation27_spill] sm:$0xff] }
 0x90e   : > { %v7787_v39 = vld [vmem:[#allocation15_spill] sm:$0xff] }
 0x90f   : > { %4262 = vmatpush3.bf16.msra.mxu1 %v4261_v0  ;;  %v7786_v0 = vld [vmem:[#allocation16_spill] sm:$0xff] }
 0x910   : > { %v3281_v57 = vpop.f32.mrb[82].mxu1  ;;  %4263 = vmatprep.subr.bf16.mxu1 %v7611_v31 }
 0x911   : > { %v3283_v35 = vpop.f32.mrb[83].mxu1 }
 0x912   : > { %v7789_v35 = vld [vmem:[#allocation18_spill] sm:$0xff] }
 0x914   : > { %v3286_v32 = vpop.f32.mrb[84].mxu1 }
 0x915   : > { %v4264_v56 = vpack.c.bf16 %v3286_v32, %v3281_v57  ;;  %v3288_v28 = vpop.f32.mrb[85].mxu1  ;;  %v7788_v57 = vpack.c.bf16 %v7786_v0, %v7787_v39  ;;  %v7790_v32 = vld [vmem:[#allocation17_spill] sm:$0xff]  ;;  %v7831_v0 = vpack.c.bf16 %v6817_v5, %v6814_v15  ;;  %v7835_v39 = vpack.c.bf16 %v6946_v12, %v6943_v14  ;;  %v7845_v12 = vld [vmem:[#allocation151_spill] sm:$0xff] }
 0x916   : > { %v7793_v28 = vld [vmem:[#allocation19_spill] sm:$0xff]  ;;  %v7836_v15 = vpack.c.bf16 %v6952_v27, %v6949_v63  ;;  %v7837_v5 = vpack.c.bf16 %v6962_v36, %v6959_v16  ;;  %v7848_v27 = vld [vmem:[#allocation148_spill] sm:$0xff] }
 0x917   : > { %4265 = vmatpush3.bf16.msra.mxu1 %v4264_v56  ;;  %v7791_v56 = vpack.c.bf16 %v7789_v35, %v7790_v32  ;;  %v7849_v35 = vld [vmem:[#allocation147_spill] sm:$0xff] }
 0x918   : > { %4267 = vmatprep.subr.bf16.mxu1 %v7762_v40  ;;  %v7850_v16 = vpack.c.bf16 %v7848_v27, %v7849_v35 }
 0x91a   : > { %4155 = vmatmul.mubr.msk.f32.vlgmr.msra.gmra.mrb[86].mxu1 %vm1450_vm3, %v7010_v54  ;;  %v7769_v54 = vld [vmem:[#allocation52_spill] sm:$0xff] }
 0x91b   : > { %3577 = vmatprep.mubr.f32.mxu1 %v7763_v33  ;;  %v7795_v33 = vld [vmem:[#allocation22_spill] sm:$0xff] }
 0x920   : > { %4269 = vmatpush1.bf16.xpose.msra.mxu1 %v7764_v21  ;;  %v7796_v21 = vld [vmem:[#allocation21_spill] sm:$0xff] }
 0x921   : > { %4271 = vmatprep.subr.bf16.mxu1 %v7765_v53  ;;  %v7797_v53 = vpack.c.bf16 %v7795_v33, %v7796_v21  ;;  %v4820_v21 = vmov 839922192  }
 0x928   : > { %4273 = vmatpush1.bf16.xpose.msra.mxu1 %v7766_v9  ;;  %v7798_v9 = vld [vmem:[#allocation49_spill] sm:$0xff] }
 0x929   : > { %4274 = vmatprep.subr.bf16.mxu1 %v7611_v31 }
 0x92f   : > { %3578 = vmatmul.mubr.f32.vlgmr.msra.gmra.mrb[88].mxu1 %v7767_v37  ;;  %v7799_v37 = vld [vmem:[#allocation143_spill] sm:$0xff] }
 0x930   : > { %3582 = vmatprep.mubr.f32.mxu1 %v7768_v51  ;;  %v7800_v51 = vpack.c.bf16 %v7798_v9, %v7799_v37  ;;  %v3834_v9 = vlaneseq }
 0x933   : > { %3583 = vmatmul.mubr.f32.gmra.mrb[90].mxu1 %v7769_v54  ;;  %v7801_v54 = vld [vmem:[#allocation42_spill] sm:$0xff] }
 0x934   : > { %3587 = vmatprep.mubr.f32.mxu1 %v7770_v13  ;;  %v7802_v13 = vld [vmem:[#allocation40_spill] sm:$0xff] }
 0x937   : > { %3588 = vmatmul.mubr.f32.gmra.mrb[92].mxu1 %v7771_v59  ;;  %v7803_v59 = vpack.c.bf16 %v7801_v54, %v7802_v13 }
 0x938   : > { %3592 = vmatprep.mubr.f32.mxu1 %v7772_v60  ;;  %v7804_v60 = vld [vmem:[#allocation39_spill] sm:$0xff] }
 0x93b   : > { %3593 = vmatmul.mubr.f32.gmra.mrb[94].mxu1 %v7773_v19  ;;  %v7805_v19 = vld [vmem:[#allocation41_spill] sm:$0xff] }
 0x93c   : > { %4165 = vmatprep.mubr.msk.f32.mxu1 %vm4815_vm2, %v7606_v48 }
 0x966   : > { %v3068_v62 = vpop.permute.xlu0 %3067 }
 0x967   : > { %3070 = vst.msk [vmem:[#allocation3 + $0x4] sm:$0xf] %vm1841_vm5, %v3068_v62  ;;  %v7806_v62 = vpack.c.bf16 %v7804_v60, %v7805_v19  ;;  %v4748_v60 = vld [vmem:[%s4902_s5] sm:$0xff]  ;;  %s3847_s5 = scalar_lea.sflag [#allocation5], %s188_s12 }
 0x9ed   : > { %v3362_v47 = vpop.f32.mrb[86].mxu1 }
 0x9ee   : > { %3375 = vrot.lane.b32.xlu0 %v3362_v47, %s4817_s13  ;;  %v4156_v44 = vpop.f32.mrb[87].mxu1  ;;  %v7807_v47 = vld [vmem:[#allocation43_spill] sm:$0xff]  ;;  %s3924_s13 = sshll.u32 %s188_s12, 3 }
 0x9ef   : > { %v7808_v44 = vld [vmem:[#allocation45_spill] sm:$0xff]  ;;  %s190_s14 = scalar_lea.vmem [#allocation4], %s3924_s13 }
 0x9f0   : > { %s3861_s20 = sshll.u32 %s190_s14, 4  ;;  %s7247_s20 = int_to_ptr.vmem [resolvable:$true] %s3861_s20 }
 0x9f1   : > { %s4749_s28 = scalar_lea.vmem %s7247_s20, 128 }
 0x9f2   : > { %2456 = vrot.lane.b32.xlu0 %v7047_v41, %s4816_s8  ;;  %v7777_v41 = vld [vmem:[#allocation8_spill] sm:$0xff]  ;;  %p4750_p11 = scmp.ne.s32.totalorder %s7247_s20, %s4749_s28 }
 0x9f3   : > { %v7779_v58 = vpack.c.bf16 %v7777_v41, %v7778_v50  ;;  %v7822_v41 = vpack.c.bf16 %v6590_v23, %v6587_v34  ;;  %v7823_v50 = vld [vmem:[#allocation28_spill] sm:$0xff]  ;;  %v7832_v34 = vpack.c.bf16 %v6823_v43, %v6820_v38  ;;  %v7833_v23 = vpack.c.bf16 %v6835_v8, %v6832_v26  ;;  %v7839_v43 = vld [vmem:[#allocation153_spill] sm:$0xff] }
 0x9f4   : > { %v7838_v38 = vpack.c.bf16 %v6968_v46, %v6965_v3  ;;  %v7840_v26 = vld [vmem:[#allocation152_spill] sm:$0xff]  ;;  %p4751_p12 = pnand %p4750_p11, %p4885_p5 }
 0x9f5   : > { %v7841_v8 = vpack.c.bf16 %v7839_v43, %v7840_v26  ;;  %v3826_v46 = vld [vmem:[%s7290_s3] sm:$0xf] }
 0x9f6   : > { %p4752_p13 = pneg %p4751_p12 }
 0xa02   : > { %v3579_v17 = vpop.f32.mrb[88].mxu1 }
 0xa03   : > { %v3581_v29 = vpop.f32.mrb[89].mxu1 }
 0xa04   : > { %v7810_v29 = vld [vmem:[#allocation63_spill] sm:$0xff] }
 0xa06   : > { %v3584_v11 = vpop.f32.mrb[90].mxu1 }
 0xa07   : > { %v4275_v6 = vpack.c.bf16 %v3584_v11, %v3579_v17  ;;  %v3586_v30 = vpop.f32.mrb[91].mxu1  ;;  %v7809_v17 = vpack.c.bf16 %v7807_v47, %v7808_v44  ;;  %v7811_v11 = vld [vmem:[#allocation24_spill] sm:$0xff] }
 0xa08   : > { %v7813_v30 = vld [vmem:[#allocation23_spill] sm:$0xff] }
 0xa09   : > { %4276 = vmatpush3.bf16.msra.mxu1 %v4275_v6  ;;  %v7812_v6 = vpack.c.bf16 %v7810_v29, %v7811_v11 }
 0xa0a   : > { %v3589_v10 = vpop.f32.mrb[92].mxu1  ;;  %4277 = vmatprep.subr.bf16.mxu1 %v7611_v31  ;;  %v7783_v31 = vld [vmem:[#allocation10_spill] sm:$0xff] }
 0xa0b   : > { %v3591_v48 = vpop.f32.mrb[93].mxu1  ;;  %v7785_v24 = vpack.c.bf16 %v7783_v31, %v7784_v22  ;;  %v7828_v31 = vld [vmem:[#allocation66_spill] sm:$0xff]  ;;  %v7829_v22 = vld [vmem:[#allocation29_spill] sm:$0xff] }
 0xa0e   : > { %v3594_v49 = vpop.f32.mrb[94].mxu1 }
 0xa0f   : > { %v4278_v42 = vpack.c.bf16 %v3594_v49, %v3589_v10  ;;  %v3596_v7 = vpop.f32.mrb[95].mxu1  ;;  %v7814_v10 = vld [vmem:[#allocation62_spill] sm:$0xff] }
 0xa10   : > { %v7815_v48 = vpack.c.bf16 %v7813_v30, %v7814_v10  ;;  %v7816_v49 = vld [vmem:[#allocation26_spill] sm:$0xff] }
 0xa11   : > { %4279 = vmatpush3.bf16.msra.mxu1 %v4278_v42  ;;  %v7817_v42 = vld [vmem:[#allocation76_spill] sm:$0xff] }
 0xa12   : > { %4281 = vmatprep.subr.bf16.mxu1 %v7776_v18  ;;  %v7818_v7 = vpack.c.bf16 %v7816_v49, %v7817_v42  ;;  %v7821_v18 = vpack.c.bf16 %v7819_v61, %v7820_v52 }
 0xa14   : > { %4166 = vmatmul.mubr.msk.f32.vlgmr.msra.gmra.mrb[96].mxu1 %vm1450_vm3, %v7028_v20  ;;  %v7792_v20 = vld [vmem:[#allocation20_spill] sm:$0xff] }
 0xa15   : > { %4283 = vmatpush1.bf16.msra.mxu1 %v7779_v58  ;;  %v7794_v40 = vpack.c.bf16 %v7792_v20, %v7793_v28  ;;  %v7824_v58 = vpack.c.bf16 %v6596_v2, %v7823_v50  ;;  %v7834_v2 = vpack.c.bf16 %v6841_v55, %v6838_v1  ;;  %v7842_v1 = vld [vmem:[#allocation155_spill] sm:$0xff]  ;;  %v7843_v55 = vld [vmem:[#allocation154_spill] sm:$0xff] }
 0xa16   : > { %4285 = vmatprep.subr.bf16.mxu1 %v7782_v25  ;;  %v7827_v25 = vpack.c.bf16 %v7825_v45, %v7826_v4  ;;  %v7844_v14 = vpack.c.bf16 %v7842_v1, %v7843_v55 }
 0xa19   : > { %4287 = vmatpush1.bf16.msra.mxu1 %v7785_v24  ;;  %v7830_v24 = vpack.c.bf16 %v7828_v31, %v7829_v22 }
 0xa1a   : > { %4289 = vmatprep.subr.bf16.mxu1 %v7788_v57  ;;  %v7846_v57 = vld [vmem:[#allocation150_spill] sm:$0xff] }
 0xa1b   : > { %v7847_v63 = vpack.c.bf16 %v7845_v12, %v7846_v57 }
 0xa1d   : > { %4291 = vmatpush1.bf16.msra.mxu1 %v7791_v56  ;;  %v4819_v56 = vmov 0  }
 0xa1e   : > { %4293 = vmatprep.subr.bf16.mxu1 %v7794_v40  ;;  %4393 = vset.pattern.permute.xlu0 %v4819_v56 }
 0xa1f   : > { %3829 = vperm.xlu0 %4393, %v3826_v46  }
 0xa21   : > { %4295 = vmatpush1.bf16.msra.mxu1 %v7797_v53  ;;  %v3832_v53 = vunpack.c.l.s4 %v4820_v21 }
 0xa22   : > { %4297 = vmatprep.subr.bf16.mxu1 %v7800_v51  ;;  %v3835_v51 = vshrl.u32 %v3834_v9, 7 }
 0xa23   : > { %v3833_v37 = vunpack.c.0.s8 %v3832_v53 }
 0xa25   : > { %4299 = vmatpush1.bf16.msra.mxu1 %v7803_v59  ;;  %v3836_v54 = vsub.s32 %v3833_v37, %v3835_v51 }
 0xa26   : > { %4301 = vmatprep.subr.bf16.mxu1 %v7806_v62 }
 0xa29   : > { %4303 = vmatpush1.bf16.msra.mxu1 %v7809_v17 }
 0xa2a   : > { %4305 = vmatprep.subr.bf16.mxu1 %v7812_v6 }
 0xa2d   : > { %4307 = vmatpush1.bf16.msra.mxu1 %v7815_v48 }
 0xa2e   : > { %4309 = vmatprep.subr.bf16.mxu1 %v7818_v7 }
 0xa31   : > { %4311 = vmatpush1.bf16.msra.mxu1 %v7821_v18 }
 0xa32   : > { %4313 = vmatprep.subr.bf16.mxu1 %v7822_v41 }
 0xa35   : > { %4315 = vmatpush1.bf16.msra.mxu1 %v7824_v58 }
 0xa36   : > { %4317 = vmatprep.subr.bf16.mxu1 %v7827_v25 }
 0xa39   : > { %4319 = vmatpush1.bf16.msra.mxu1 %v7830_v24 }
 0xa3a   : > { %4321 = vmatprep.subr.bf16.mxu1 %v7831_v0 }
 0xa3d   : > { %4323 = vmatpush1.bf16.msra.mxu1 %v7832_v34 }
 0xa3e   : > { %4325 = vmatprep.subr.bf16.mxu1 %v7833_v23 }
 0xa41   : > { %4327 = vmatpush1.bf16.msra.mxu1 %v7834_v2 }
 0xa42   : > { %4329 = vmatprep.subr.bf16.mxu1 %v7835_v39 }
 0xa45   : > { %4331 = vmatpush1.bf16.msra.mxu1 %v7836_v15 }
 0xa46   : > { %4333 = vmatprep.subr.bf16.mxu1 %v7837_v5 }
 0xa49   : > { %4335 = vmatpush1.bf16.msra.mxu1 %v7838_v38 }
 0xa4a   : > { %4337 = vmatprep.subr.bf16.mxu1 %v7841_v8 }
 0xa4d   : > { %4339 = vmatpush1.bf16.msra.mxu1 %v7844_v14 }
 0xa4e   : > { %4341 = vmatprep.subr.bf16.mxu1 %v7847_v63 }
 0xa51   : > { %4343 = vmatpush1.bf16.msra.mxu1 %v7850_v16 }
 0xa60   : > { %v3376_v36 = vpop.permute.xlu0 %3375 }
 0xa61   : > { %3378 = vst.msk [vmem:[#allocation3 + $0x4] sm:$0xf] %vm2150_vm6, %v3376_v36 }
 0xa64   : > { %v2457_v3 = vpop.permute.xlu0 %2456 }
 0xa65   : > { %2460 = vst.msk [vmem:[#allocation3] sm:$0xf] %vm2459_vm7, %v2457_v3 }
 0xa9e   : > { %v3830_v13 = vpop.permute.xlu0 %3829 }
 0xa9f   : > { %v3837_v59 = vrot.slane %v3830_v13, %v3836_v54 }
 0xaa1   : > { %v3839_v19 = vadd.f32 %v4748_v60, %v3837_v59 }
 0xae7   : > { %v3670_v32 = vpop.f32.mrb[96].mxu1 }
 0xae8   : > { %3683 = vrot.lane.b32.xlu1 %v3670_v32, %s4816_s8  ;;  %v4167_v20 = vpop.f32.mrb[97].mxu1  ;;  %s4039_s8 = sshll.u32 %s4868_s19, 7  ;;  %s4821_s19 = smov [#allocation4]  }
 0xae9   : > { %s7245_s27 = scalar_lea.hbm %s7291_s4, %s4039_s8  ;;  %s4753_s29 = sshll.u32 %s4821_s19, 4  ;;  %s4754_s29 = int_to_ptr.vmem [resolvable:$false] %s4753_s29 }
 0xaea   : > { %s4755_s30 = scalar_lea.vmem %s4754_s29, 256  ;;  %p4756_p0 = scmp.lt.s32.totalorder %s7247_s20, %s4754_s29 }
 0xaeb   : > { %p4757_p1 = scmp.lt.s32.totalorder %s4755_s30, %s4749_s28 }
 0xaed   : > { %p4758_p2 = por %p4757_p1, %p4756_p0 }
 0xaef   : > { %p4759_p3 = pnand %p4758_p2, %p4752_p13 }
 0xb5a   : > { %v3684_v28 = vpop.permute.xlu1 %3683 }
 0xb5b   : > { %3686 = vst.msk [vmem:[#allocation3 + $0x4] sm:$0xf] %vm2459_vm7, %v3684_v28 }
 0xb62   : > { %v3687_v40 = vld [vmem:[#allocation3] sm:$0xff] }
 0xb63   : > { %v3753_v33 = vcombine.high %v3687_v40, %v3687_v40 }
 0xb65   : > { %3819 = vmatprep.mubr.f32.mxu1 %v3753_v33 }
 0xb66   : > { %3820 = vmatmul.mubr.f32.vlgmr.msra.gmra.mrb[98].mxu1 %v3687_v40 }
 0xc39   : > { %v3821_v62 = vpop.f32.mrb[98].mxu1 }
 0xc3a   : > { %v3823_v47 = vpop.f32.mrb[99].mxu1 }
 0xc3b   : > { %v3842_v44 = vcombine.low %v3821_v62, %v3823_v47 }
 0xc3d   : > { %v3844_v17 = vadd.f32 %v3842_v44, %v3839_v19 }
 0xc3f   : > { %3845 = vst [vmem:[%s190_s14] sm:$0xff] %v3844_v17 }
 0xc40   : > { %4762 = shalt.err (!%p4759_p3)
}
 0xc41   : > { %s4763_s6 = scalar_lea.hbm %s7245_s27, 128  ;;  %s4767_s10 = scalar_lea.hbm %s7291_s4, 256 }
 0xc42   : > { %p4764_p4 = scmp.ne.s32.totalorder %s7245_s27, %s4763_s6  ;;  %p4768_p9 = scmp.lt.u32.totalorder %s7245_s27, %s7291_s4 }
 0xc43   : > { %p4769_p10 = scmp.lt.u32.totalorder %s4767_s10, %s4763_s6  ;;  %p4771_p12 = scmp.lt.u32.totalorder %s4763_s6, %s7245_s27 }
 0xc44   : > { %p4765_p7 = pnand %p4764_p4, %p4885_p5 }
 0xc45   : > { %p4770_p11 = por %p4769_p10, %p4768_p9 }
 0xc46   : > { %p4766_p8 = pneg %p4765_p7 }
 0xc47   : > { %p4772_p13 = por %p4771_p12, %p4770_p11 }
 0xc49   : > { %p4773_p0 = pnand %p4772_p13, %p4766_p8 }
 0xc4b   : > { %4776 = shalt.err (!%p4773_p0)
}
 0xc4c   : > { %4346 = dma.vmem_to_hbm [thread:$0]  (%p4885_p5), %s7247_s20, 128, %s7245_s27, %s3847_s5  }
 0xc4d PF: > { %p4352_p1 = scmp.ge.s32.totalorder %s4811_s18, 2  ;;  %s3873_s13 = sand.u32 1, %s4799_s15  }
 0xc4e   : > { %s3874_s8 = scalar_lea.sflag [#allocation5], %s3873_s13 }
 0xc4f   : > { %p4349_p2 = pnand %p4352_p1, %p4889_p6 }
 0xc51   : > { %4794 = dma.done.wait (!%p4349_p2), %s3874_s8, 128  }
 0xc52   : > { %4796 = vsyncadd (!%p4349_p2), %s3874_s8, 4294967168  ;;  %p14_p3 = scmp.ge.s32.totalorder %s4872_s21, 4   ;;  %s7851_s15 = smov %s4803_s16 }
 0xc53   : > { %s7852_s16 = smov %s4807_s17  ;;  %s7853_s17 = smov %s4883_s24 }
 0xc54   : > { %s7854_s18 = smov %s4872_s21  ;;  %16 = sbr.rel (!%p14_p3) target bundleno = 3 (0x3), region = 71 }
 0xc5b   :  { %3879 = vsyncpa [#allocation5], 1 }
 0xc5c   :  { %3881 = vsyncpa [#allocation5 + $0x1], 1 }

</bundles_post_ra>
